<compile_context>
chip_gen: v7x
topology: tpu7x:2x2x1
jax: 0.10.0
libtpu: 0.0.40
codegen_flags: <defaults>
</compile_context>

<pallas_src>
import functools

import jax
import jax.numpy as jnp
import numpy as np
from jax.experimental import pallas as pl
from jax.experimental.pallas import tpu as pltpu

# stand-in sizes (original: pool_dim=2048, low_dim=512)
POOL_DIM = 256
LOW_DIM = 64
MID_CH = 128          # raised from 32 so every head matmul has K >= 128 (v5e MXU depth)
BN_EPS = 1e-5
L2_EPS = 1e-12        # TODO(synk): PyTorch's Normalize divides by the raw norm (no eps)


# ------------------------------- fused kernel --------------------------------

def _embed_kernel(pix_ref, wtrunk_ref, btrunk_ref, mix_ref,
                  wpart_ref, bpart_ref, wfeat_ref, fscale_ref, fshift_ref,
                  wconv_ref, bconv_ref, ox_ref, oy_ref):
    """Entire eval forward in one launch:
       trunk (VPU FMAs) -> pool + part-pool (one constant mixing matmul)
       -> part2/part3 projections (2 dots) -> l2norm(x) lane-dense slabs
       -> FeatureBlock (1 dot, folded eval BN) -> cross-part sums
       -> 5 merged K=2*LOW 1x1-conv dots -> l2norm(y), single oy store."""
    f32, bf16 = jnp.float32, jnp.bfloat16
    s_mod, _, c_in = pix_ref.shape
    n = ox_ref.shape[0]                      # samples (= S*B)
    pool_d = ox_ref.shape[1] // 5
    low = oy_ref.shape[1] // 5

    # --- trunk stand-in: per-pixel 1x1 projection + ReLU.  The C_in(=3)-deep
    #     contraction runs as 3 VPU broadcast-FMAs, NOT an MXU dot (K=3 would
    #     waste an entire systolic pass). ---
    # TODO(synk): the pretrained ResNet-50 trunk (conv1..layer2) needs a
    # checkpoint; this deterministic projection only reproduces tensor shapes.
    feats = []
    for s in range(s_mod):
        xp = pix_ref[s]                                   # (R, Cin)  f32
        wt = wtrunk_ref[s]                                # (Cin, MID) f32
        acc = xp[:, 0:1] * wt[0:1, :]
        for c in range(1, c_in):
            acc = acc + xp[:, c:c + 1] * wt[c:c + 1, :]
        feats.append(jnp.maximum(acc + btrunk_ref[s], 0.0))          # (R, MID) f32
    y_pix = feats[0] if s_mod == 1 else jnp.concatenate(feats, axis=0)   # (S*R, MID)

    # --- 4x4 avg pool + width mean + pool2/pool3 part pooling: all uniform
    #     pixel means, folded into ONE constant mixing matmul (K = S*B*H*W).
    #     Row order of p_all is the stacked-slot layout
    #     [slot0 rows | slot1 | slot2 | slot3 | slot4], N rows each. ---
    p_all = jnp.dot(mix_ref[...], y_pix, preferred_element_type=f32)     # (5N, MID)

    # --- part2 / part3 projections batched by shared weight: 2 dots, K=MID. ---
    # TODO(synk): base_resnete_part2/_part3 are undefined in the source; this is
    # a shape-preserving stand-in projection (+ReLU).
    x_p2 = (jnp.dot(p_all[:2 * n].astype(bf16), wpart_ref[0],
                    preferred_element_type=f32) + bpart_ref[0:1, :])
    x_p3 = (jnp.dot(p_all[2 * n:].astype(bf16), wpart_ref[1],
                    preferred_element_type=f32) + bpart_ref[1:2, :])
    x_all = jnp.maximum(jnp.concatenate([x_p2, x_p3], axis=0), 0.0)      # (5N, POOL)

    # --- eval output 1: l2norm(x_i), written as lane-dense POOL(=256)-wide,
    #     128-aligned slabs of the (N, 5*POOL) output. ---
    inv_x = jax.lax.rsqrt(jnp.sum(x_all * x_all, axis=1, keepdims=True) + L2_EPS)
    x_nrm = x_all * inv_x
    for i in range(5):
        ox_ref[:, i * pool_d:(i + 1) * pool_d] = (
            x_nrm[i * n:(i + 1) * n, :].astype(ox_ref.dtype))

    # --- FeatureBlock (Linear + eval BatchNorm1d folded to scale/shift): ONE
    #     (5N, POOL) @ (POOL, 2*LOW) dot with 128 output lanes; slot 0 reads the
    #     feature1 half, slots 1..4 the shared feature2 half. ---
    y_feat = jnp.dot(x_all.astype(bf16), wfeat_ref[...], preferred_element_type=f32)
    y0 = y_feat[:n, :low] * fscale_ref[0:1, :] + fshift_ref[0:1, :]        # (N, LOW)
    y_rest = y_feat[n:, low:] * fscale_ref[1:2, :] + fshift_ref[1:2, :]    # (4N, LOW)
    ys = [y0] + [y_rest[(i - 1) * n:i * n, :] for i in range(1, 5)]

    # --- cross-part sums + 1x1 convs: each conv is ONE K=2*LOW(=128) dot on
    #     cat(y_i, combo_i); bf16 casts hoisted (each tensor cast exactly once). ---
    y01 = ys[0] + ys[1]
    y23 = ys[2] + ys[3]
    y34 = ys[3] + ys[4]
    y24 = ys[2] + ys[4]
    ys_bf = [v.astype(bf16) for v in ys]
    y01b, y23b, y34b, y24b = (v.astype(bf16) for v in (y01, y23, y34, y24))
    combos_bf = [y01b, y01b, y34b, y24b, y23b]
    zs = []
    for i in range(5):
        cat_i = jnp.concatenate([ys_bf[i], combos_bf[i]], axis=1)         # (N, 2*LOW) bf16
        z = (jnp.dot(cat_i, wconv_ref[i], preferred_element_type=f32)
             + bconv_ref[i:i + 1, :])
        inv_z = jax.lax.rsqrt(jnp.sum(z * z, axis=1, keepdims=True) + L2_EPS)
        zs.append(z * inv_z)
    # single (N, 5*LOW) store instead of five masked 64-lane writes
    oy_ref[...] = jnp.concatenate(zs, axis=1).astype(oy_ref.dtype)


# ------------------------------ pallas wrapper --------------------------------

def pallas_embed_forward(pix, wtrunk, btrunk, mix, wpart, bpart,
                         wfeat, fscale, fshift, wconv, bconv):
    n = mix.shape[0] // 5
    pool_d = wpart.shape[2]
    low = wconv.shape[2]
    # Grid-less single launch: whole (tiny) arrays resident in VMEM, no per-step
    # pipeline overhead.  TODO(synk): at real sizes (pool_dim=2048, low_dim=512,
    # mid~2048) add a row grid axis marked "parallel" gated on a 2-TensorCore
    # part (row block >= 8), tile POOL, and re-budget vmem_limit_bytes for v7x's
    # 64 MiB.  Outputs stay f32 to match the PyTorch reference (bf16 would halve
    # writeback bytes if the consumer tolerates it).
    return pl.pallas_call(
        _embed_kernel,
        out_shape=(jax.ShapeDtypeStruct((n, 5 * pool_d), jnp.float32),
                   jax.ShapeDtypeStruct((n, 5 * low), jnp.float32)),
        compiler_params=pltpu.CompilerParams(vmem_limit_bytes=32 * 1024 * 1024),
    )(pix, wtrunk, btrunk, mix, wpart, bpart, wfeat, fscale, fshift, wconv, bconv)


# ------------------------------- parameters -----------------------------------

def init_params(key, in_ch=3, mid_ch=MID_CH, pool_dim=POOL_DIM, low_dim=LOW_DIM):
    keys = iter(jax.random.split(key, 32))

    def nrm(shape, scale):
        return scale * jax.random.normal(next(keys), shape, jnp.float32)

    p = {}
    for name in ("trunk_v", "trunk_t"):                       # visible_net / thermal_net
        p[f"{name}_w"] = nrm((in_ch, mid_ch), (2.0 / in_ch) ** 0.5)
        p[f"{name}_b"] = jnp.zeros((mid_ch,), jnp.float32)
    for name in ("part2", "part3"):                           # base_resnete_part2/3 stand-ins
        p[f"{name}_w"] = nrm((mid_ch, pool_dim), (2.0 / mid_ch) ** 0.5)
        p[f"{name}_b"] = jnp.zeros((pool_dim,), jnp.float32)
    for name in ("feature1", "feature2"):                     # FeatureBlock (Linear + BN1d)
        p[f"{name}_w"] = nrm((pool_dim, low_dim), (2.0 / low_dim) ** 0.5)   # kaiming fan_out
        p[f"{name}_b"] = jnp.zeros((low_dim,), jnp.float32)
        p[f"{name}_gamma"] = 1.0 + nrm((low_dim,), 0.01)                    # N(1, 0.01)
        p[f"{name}_beta"] = jnp.zeros((low_dim,), jnp.float32)
        p[f"{name}_rm"] = jnp.zeros((low_dim,), jnp.float32)
        p[f"{name}_rv"] = jnp.ones((low_dim,), jnp.float32)
    for i in range(5):                                        # conv0..conv4 (1x1)
        p[f"conv{i}_w"] = nrm((2 * low_dim, low_dim), (2.0 / (2 * low_dim)) ** 0.5)
        p[f"conv{i}_b"] = jnp.zeros((low_dim,), jnp.float32)
    # TODO(synk): basenet_share / self.bn / classifier / classifier1..5 only feed
    # outputs that the eval-mode forward discards, so they are omitted entirely.
    return p


# -------------------- constant pooling / part-pooling matrix ------------------

def _build_mix(s, b, h, w):
    """Fold (4x4 avg pool -> mean over pooled width -> pool2 / overlapping pool3
    over pooled rows) into one constant (5N, S*B*H*W) matrix of uniform weights.
    Row layout: [slot0 x N samples, slot1 x N, ..., slot4 x N], N = s*b."""
    h4 = h // 4
    half = h4 // 2
    slot_strips = [list(range(0, half)), list(range(half, h4)),
                   list(range(0, half)), list(range(h4 // 4, h4 // 4 + half)),
                   list(range(half, h4))]
    n = s * b
    r = b * h * w
    px_per_strip = 4 * w
    mix = np.zeros((5 * n, s * r), np.float32)
    for i, strips in enumerate(slot_strips):
        wgt = 1.0 / (len(strips) * px_per_strip)
        for si in range(s):
            for bi in range(b):
                row = i * n + si * b + bi
                base = si * r + bi * h * w
                for q in strips:
                    mix[row, base + q * px_per_strip: base + (q + 1) * px_per_strip] = wgt
    return jnp.asarray(mix)


# --------------------------------- forward ------------------------------------

@functools.partial(jax.jit, static_argnums=(3,))
def embed_net_forward(p, x1, x2, modal=0):
    """Eval-mode forward of embed_net (model.eval()): returns (x, y)."""
    if modal == 0:
        imgs = jnp.stack([x1, x2], axis=0)
        tw = jnp.stack([p["trunk_v_w"], p["trunk_t_w"]], axis=0)
        tb = jnp.stack([p["trunk_v_b"], p["trunk_t_b"]], axis=0)[:, None, :]
    elif modal == 1:
        imgs, tw, tb = x1[None], p["trunk_v_w"][None], p["trunk_v_b"][None, None, :]
    else:
        imgs, tw, tb = x2[None], p["trunk_t_w"][None], p["trunk_t_b"][None, None, :]

    s, b, c, h, w = imgs.shape
    assert h // 4 == 4 and w % 4 == 0, "stand-in part pooling assumes a 4-row pooled map"
    pix = jnp.transpose(imgs, (0, 1, 3, 4, 2)).reshape(s, b * h * w, c)   # (S, B*H*W, C)
    mix = _build_mix(s, b, h, w)                                          # trace-time constant

    # fold eval BatchNorm1d into scale/shift; pack bf16 MXU operands
    def fold_bn(name):
        sc = p[f"{name}_gamma"] * jax.lax.rsqrt(p[f"{name}_rv"] + BN_EPS)
        sh = (p[f"{name}_b"] - p[f"{name}_rm"]) * sc + p[f"{name}_beta"]
        return sc, sh

    sc1, sh1 = fold_bn("feature1")
    sc2, sh2 = fold_bn("feature2")
    wpart = jnp.stack([p["part2_w"], p["part3_w"]]).astype(jnp.bfloat16)      # (2, MID, POOL)
    bpart = jnp.stack([p["part2_b"], p["part3_b"]])                           # (2, POOL)
    wfeat = jnp.concatenate([p["feature1_w"], p["feature2_w"]],
                            axis=1).astype(jnp.bfloat16)                      # (POOL, 2*LOW)
    fscale = jnp.stack([sc1, sc2])                                            # (2, LOW)
    fshift = jnp.stack([sh1, sh2])
    wconv = jnp.stack([p[f"conv{i}_w"] for i in range(5)]).astype(jnp.bfloat16)   # (5, 2*LOW, LOW)
    bconv = jnp.stack([p[f"conv{i}_b"] for i in range(5)])

    # TODO(synk): training-mode Dropout / classifiers and the training return
    # tuple are omitted; this is the deterministic eval path returning (x, y).
    return pallas_embed_forward(pix, tw, tb, mix, wpart, bpart,
                                wfeat, fscale, fshift, wconv, bconv)


# ------------------------- pure-JAX f32 reference -----------------------------

def embed_net_reference(p, x1, x2, modal=0):
    """f32 mirror of the fused kernel (same stand-ins) for validation."""
    if modal == 0:
        imgs = jnp.stack([x1, x2], 0)
        tw = jnp.stack([p["trunk_v_w"], p["trunk_t_w"]], 0)
        tb = jnp.stack([p["trunk_v_b"], p["trunk_t_b"]], 0)
    elif modal == 1:
        imgs, tw, tb = x1[None], p["trunk_v_w"][None], p["trunk_v_b"][None]
    else:
        imgs, tw, tb = x2[None], p["trunk_t_w"][None], p["trunk_t_b"][None]
    s, b, c, h, w = imgs.shape
    mid = tw.shape[-1]
    pix = jnp.transpose(imgs, (0, 1, 3, 4, 2)).reshape(s, b * h * w, c)
    f = jnp.maximum(jnp.einsum("src,scm->srm", pix, tw) + tb[:, None, :], 0.0)
    f = f.reshape(s, b, h, w, mid)
    f = f.reshape(s * b, h // 4, 4, w // 4, 4, mid).mean(axis=(2, 4))      # (N, 4, 4, MID)
    colpool = f.mean(axis=2)                                               # (N, 4, MID)
    slots = [colpool[:, 0:2].mean(1), colpool[:, 2:4].mean(1),
             colpool[:, 0:2].mean(1), colpool[:, 1:3].mean(1), colpool[:, 2:4].mean(1)]

    def fold_bn(name):
        sc = p[f"{name}_gamma"] * jax.lax.rsqrt(p[f"{name}_rv"] + BN_EPS)
        return sc, (p[f"{name}_b"] - p[f"{name}_rm"]) * sc + p[f"{name}_beta"]

    def l2n(v):
        return v * jax.lax.rsqrt(jnp.sum(v * v, axis=1, keepdims=True) + L2_EPS)

    xs, ys = [], []
    for i, pin in enumerate(slots):
        part = "part2" if i < 2 else "part3"
        xi = jnp.maximum(pin @ p[f"{part}_w"] + p[f"{part}_b"], 0.0)
        feat = "feature1" if i == 0 else "feature2"
        sc, sh = fold_bn(feat)
        xs.append(xi)
        ys.append((xi @ p[f"{feat}_w"]) * sc + sh)
    y01, y23 = ys[0] + ys[1], ys[2] + ys[3]
    y34, y24 = ys[3] + ys[4], ys[2] + ys[4]
    combos = [y01, y01, y34, y24, y23]
    x_cat = jnp.concatenate([l2n(v) for v in xs], axis=1)
    zs = [l2n(jnp.concatenate([ys[i], combos[i]], 1) @ p[f"conv{i}_w"] + p[f"conv{i}_b"])
          for i in range(5)]
    return x_cat, jnp.concatenate(zs, axis=1)


# ----------------------------------- main --------------------------------------

if __name__ == "__main__":
    key = jax.random.PRNGKey(0)
    kp, k1, k2 = jax.random.split(key, 3)
    B, C, H, W = 2, 3, 16, 16
    params = init_params(kp)
    x1 = jax.random.normal(k1, (B, C, H, W), jnp.float32)
    x2 = jax.random.normal(k2, (B, C, H, W), jnp.float32)

    x_out, y_out = embed_net_forward(params, x1, x2, 0)
    jax.block_until_ready((x_out, y_out))

    assert x_out.shape == (2 * B, 5 * POOL_DIM), x_out.shape
    assert y_out.shape == (2 * B, 5 * LOW_DIM), y_out.shape
    assert bool(jnp.all(jnp.isfinite(x_out))) and bool(jnp.all(jnp.isfinite(y_out)))

    # validate against the pure-JAX f32 reference (bf16 MXU operands -> loose tol)
    x_exp, y_exp = embed_net_reference(params, x1, x2, 0)
    err_x = float(jnp.max(jnp.abs(x_out - x_exp)))
    err_y = float(jnp.max(jnp.abs(y_out - y_exp)))
    assert err_x < 5e-2 and err_y < 5e-2, (err_x, err_y)

    print("KERNEL_OK")
</pallas_src>

<mosaic_0001>
module attributes {stable_mosaic.version = 11 : i64} {
  func.func @_embed_kernel(%arg0: memref<2x512x3xf32, #tpu.memory_space<vmem>>, %arg1: memref<2x3x128xf32, #tpu.memory_space<vmem>>, %arg2: memref<2x1x128xf32, #tpu.memory_space<vmem>>, %arg3: memref<20x1024xf32, #tpu.memory_space<vmem>>, %arg4: memref<2x128x256xbf16, #tpu.memory_space<vmem>>, %arg5: memref<2x256xf32, #tpu.memory_space<vmem>>, %arg6: memref<256x128xbf16, #tpu.memory_space<vmem>>, %arg7: memref<2x64xf32, #tpu.memory_space<vmem>>, %arg8: memref<2x64xf32, #tpu.memory_space<vmem>>, %arg9: memref<5x128x64xbf16, #tpu.memory_space<vmem>>, %arg10: memref<5x64xf32, #tpu.memory_space<vmem>>, %arg11: memref<4x1280xf32, #tpu.memory_space<vmem>>, %arg12: memref<4x320xf32, #tpu.memory_space<vmem>>) attributes {dimension_semantics = [], scalar_prefetch = 0 : i64, scratch_operands = 0 : i64, tpu.core_type = #tpu.core_type<tc>} {
    %c0 = arith.constant 0 : index
    %c0_0 = arith.constant 0 : index
    %c0_1 = arith.constant 0 : index
    %0 = vector.load %arg0[%c0, %c0_0, %c0_1] : memref<2x512x3xf32, #tpu.memory_space<vmem>>, vector<1x512x3xf32>
    %1 = vector.shape_cast %0 : vector<1x512x3xf32> to vector<512x3xf32>
    %c0_2 = arith.constant 0 : index
    %c0_3 = arith.constant 0 : index
    %c0_4 = arith.constant 0 : index
    %2 = vector.load %arg1[%c0_2, %c0_3, %c0_4] : memref<2x3x128xf32, #tpu.memory_space<vmem>>, vector<1x3x128xf32>
    %3 = vector.shape_cast %2 : vector<1x3x128xf32> to vector<3x128xf32>
    %4 = vector.extract_strided_slice %1 {offsets = [0, 0], sizes = [512, 1], strides = [1, 1]} : vector<512x3xf32> to vector<512x1xf32>
    %5 = vector.extract_strided_slice %3 {offsets = [0, 0], sizes = [1, 128], strides = [1, 1]} : vector<3x128xf32> to vector<1x128xf32>
    %6 = vector.broadcast %4 : vector<512x1xf32> to vector<512x128xf32>
    %7 = vector.broadcast %5 : vector<1x128xf32> to vector<512x128xf32>
    %8 = arith.mulf %6, %7 : vector<512x128xf32>
    %9 = vector.extract_strided_slice %1 {offsets = [0, 1], sizes = [512, 1], strides = [1, 1]} : vector<512x3xf32> to vector<512x1xf32>
    %10 = vector.extract_strided_slice %3 {offsets = [1, 0], sizes = [1, 128], strides = [1, 1]} : vector<3x128xf32> to vector<1x128xf32>
    %11 = vector.broadcast %9 : vector<512x1xf32> to vector<512x128xf32>
    %12 = vector.broadcast %10 : vector<1x128xf32> to vector<512x128xf32>
    %13 = arith.mulf %11, %12 : vector<512x128xf32>
    %14 = arith.addf %8, %13 : vector<512x128xf32>
    %15 = vector.extract_strided_slice %1 {offsets = [0, 2], sizes = [512, 1], strides = [1, 1]} : vector<512x3xf32> to vector<512x1xf32>
    %16 = vector.extract_strided_slice %3 {offsets = [2, 0], sizes = [1, 128], strides = [1, 1]} : vector<3x128xf32> to vector<1x128xf32>
    %17 = vector.broadcast %15 : vector<512x1xf32> to vector<512x128xf32>
    %18 = vector.broadcast %16 : vector<1x128xf32> to vector<512x128xf32>
    %19 = arith.mulf %17, %18 : vector<512x128xf32>
    %20 = arith.addf %14, %19 : vector<512x128xf32>
    %c0_5 = arith.constant 0 : index
    %c0_6 = arith.constant 0 : index
    %c0_7 = arith.constant 0 : index
    %21 = vector.load %arg2[%c0_5, %c0_6, %c0_7] : memref<2x1x128xf32, #tpu.memory_space<vmem>>, vector<1x1x128xf32>
    %22 = vector.shape_cast %21 : vector<1x1x128xf32> to vector<1x128xf32>
    %23 = vector.broadcast %22 : vector<1x128xf32> to vector<512x128xf32>
    %24 = arith.addf %20, %23 : vector<512x128xf32>
    %cst = arith.constant 0.000000e+00 : f32
    %25 = vector.broadcast %cst : f32 to vector<512x128xf32>
    %26 = arith.maximumf %24, %25 : vector<512x128xf32>
    %c1 = arith.constant 1 : index
    %c0_8 = arith.constant 0 : index
    %c0_9 = arith.constant 0 : index
    %27 = vector.load %arg0[%c1, %c0_8, %c0_9] : memref<2x512x3xf32, #tpu.memory_space<vmem>>, vector<1x512x3xf32>
    %28 = vector.shape_cast %27 : vector<1x512x3xf32> to vector<512x3xf32>
    %c1_10 = arith.constant 1 : index
    %c0_11 = arith.constant 0 : index
    %c0_12 = arith.constant 0 : index
    %29 = vector.load %arg1[%c1_10, %c0_11, %c0_12] : memref<2x3x128xf32, #tpu.memory_space<vmem>>, vector<1x3x128xf32>
    %30 = vector.shape_cast %29 : vector<1x3x128xf32> to vector<3x128xf32>
    %31 = vector.extract_strided_slice %28 {offsets = [0, 0], sizes = [512, 1], strides = [1, 1]} : vector<512x3xf32> to vector<512x1xf32>
    %32 = vector.extract_strided_slice %30 {offsets = [0, 0], sizes = [1, 128], strides = [1, 1]} : vector<3x128xf32> to vector<1x128xf32>
    %33 = vector.broadcast %31 : vector<512x1xf32> to vector<512x128xf32>
    %34 = vector.broadcast %32 : vector<1x128xf32> to vector<512x128xf32>
    %35 = arith.mulf %33, %34 : vector<512x128xf32>
    %36 = vector.extract_strided_slice %28 {offsets = [0, 1], sizes = [512, 1], strides = [1, 1]} : vector<512x3xf32> to vector<512x1xf32>
    %37 = vector.extract_strided_slice %30 {offsets = [1, 0], sizes = [1, 128], strides = [1, 1]} : vector<3x128xf32> to vector<1x128xf32>
    %38 = vector.broadcast %36 : vector<512x1xf32> to vector<512x128xf32>
    %39 = vector.broadcast %37 : vector<1x128xf32> to vector<512x128xf32>
    %40 = arith.mulf %38, %39 : vector<512x128xf32>
    %41 = arith.addf %35, %40 : vector<512x128xf32>
    %42 = vector.extract_strided_slice %28 {offsets = [0, 2], sizes = [512, 1], strides = [1, 1]} : vector<512x3xf32> to vector<512x1xf32>
    %43 = vector.extract_strided_slice %30 {offsets = [2, 0], sizes = [1, 128], strides = [1, 1]} : vector<3x128xf32> to vector<1x128xf32>
    %44 = vector.broadcast %42 : vector<512x1xf32> to vector<512x128xf32>
    %45 = vector.broadcast %43 : vector<1x128xf32> to vector<512x128xf32>
    %46 = arith.mulf %44, %45 : vector<512x128xf32>
    %47 = arith.addf %41, %46 : vector<512x128xf32>
    %c1_13 = arith.constant 1 : index
    %c0_14 = arith.constant 0 : index
    %c0_15 = arith.constant 0 : index
    %48 = vector.load %arg2[%c1_13, %c0_14, %c0_15] : memref<2x1x128xf32, #tpu.memory_space<vmem>>, vector<1x1x128xf32>
    %49 = vector.shape_cast %48 : vector<1x1x128xf32> to vector<1x128xf32>
    %50 = vector.broadcast %49 : vector<1x128xf32> to vector<512x128xf32>
    %51 = arith.addf %47, %50 : vector<512x128xf32>
    %cst_16 = arith.constant 0.000000e+00 : f32
    %52 = vector.broadcast %cst_16 : f32 to vector<512x128xf32>
    %53 = arith.maximumf %51, %52 : vector<512x128xf32>
    %54 = tpu.concatenate %26, %53 in 0 : vector<512x128xf32>, vector<512x128xf32> -> vector<1024x128xf32>
    %c0_17 = arith.constant 0 : index
    %c0_18 = arith.constant 0 : index
    %55 = vector.load %arg3[%c0_17, %c0_18] : memref<20x1024xf32, #tpu.memory_space<vmem>>, vector<20x1024xf32>
    %cst_19 = arith.constant dense<0.000000e+00> : vector<20x128xf32>
    %56 = tpu.matmul %55, %54, %cst_19 {dimension_numbers = #tpu.dot_dimension_numbers<[1], [0], [0], [1], [0, 0, 1, 1], [], []>} : vector<20x1024xf32>, vector<1024x128xf32>, vector<20x128xf32> -> vector<20x128xf32>
    %57 = vector.extract_strided_slice %56 {offsets = [0, 0], sizes = [8, 128], strides = [1, 1]} : vector<20x128xf32> to vector<8x128xf32>
    %58 = arith.truncf %57 : vector<8x128xf32> to vector<8x128xbf16>
    %c0_20 = arith.constant 0 : index
    %c0_21 = arith.constant 0 : index
    %c0_22 = arith.constant 0 : index
    %59 = vector.load %arg4[%c0_20, %c0_21, %c0_22] : memref<2x128x256xbf16, #tpu.memory_space<vmem>>, vector<1x128x256xbf16>
    %60 = vector.shape_cast %59 : vector<1x128x256xbf16> to vector<128x256xbf16>
    %cst_23 = arith.constant dense<0.000000e+00> : vector<8x256xf32>
    %61 = tpu.matmul %58, %60, %cst_23 {dimension_numbers = #tpu.dot_dimension_numbers<[1], [0], [0], [1], [0, 0, 1, 1], [], []>} : vector<8x128xbf16>, vector<128x256xbf16>, vector<8x256xf32> -> vector<8x256xf32>
    %c0_24 = arith.constant 0 : index
    %c0_25 = arith.constant 0 : index
    %62 = vector.load %arg5[%c0_24, %c0_25] : memref<2x256xf32, #tpu.memory_space<vmem>>, vector<1x256xf32>
    %63 = vector.broadcast %62 : vector<1x256xf32> to vector<8x256xf32>
    %64 = arith.addf %61, %63 : vector<8x256xf32>
    %65 = vector.extract_strided_slice %56 {offsets = [8, 0], sizes = [12, 128], strides = [1, 1]} : vector<20x128xf32> to vector<12x128xf32>
    %66 = arith.truncf %65 : vector<12x128xf32> to vector<12x128xbf16>
    %c1_26 = arith.constant 1 : index
    %c0_27 = arith.constant 0 : index
    %c0_28 = arith.constant 0 : index
    %67 = vector.load %arg4[%c1_26, %c0_27, %c0_28] : memref<2x128x256xbf16, #tpu.memory_space<vmem>>, vector<1x128x256xbf16>
    %68 = vector.shape_cast %67 : vector<1x128x256xbf16> to vector<128x256xbf16>
    %cst_29 = arith.constant dense<0.000000e+00> : vector<12x256xf32>
    %69 = tpu.matmul %66, %68, %cst_29 {dimension_numbers = #tpu.dot_dimension_numbers<[1], [0], [0], [1], [0, 0, 1, 1], [], []>} : vector<12x128xbf16>, vector<128x256xbf16>, vector<12x256xf32> -> vector<12x256xf32>
    %c1_30 = arith.constant 1 : index
    %c0_31 = arith.constant 0 : index
    %70 = vector.load %arg5[%c1_30, %c0_31] : memref<2x256xf32, #tpu.memory_space<vmem>>, vector<1x256xf32>
    %71 = vector.broadcast %70 : vector<1x256xf32> to vector<12x256xf32>
    %72 = arith.addf %69, %71 : vector<12x256xf32>
    %73 = tpu.concatenate %64, %72 in 0 : vector<8x256xf32>, vector<12x256xf32> -> vector<20x256xf32>
    %cst_32 = arith.constant 0.000000e+00 : f32
    %74 = vector.broadcast %cst_32 : f32 to vector<20x256xf32>
    %75 = arith.maximumf %73, %74 : vector<20x256xf32>
    %76 = arith.mulf %75, %75 : vector<20x256xf32>
    %cst_33 = arith.constant dense<0.000000e+00> : vector<20xf32>
    %77 = vector.multi_reduction <add>, %76, %cst_33 [1] : vector<20x256xf32> to vector<20xf32>
    %78 = vector.shape_cast %77 : vector<20xf32> to vector<20x1xf32>
    %cst_34 = arith.constant 9.99999996E-13 : f32
    %79 = vector.broadcast %cst_34 : f32 to vector<20x1xf32>
    %80 = arith.addf %78, %79 : vector<20x1xf32>
    %81 = math.rsqrt %80 : vector<20x1xf32>
    %82 = vector.broadcast %81 : vector<20x1xf32> to vector<20x256xf32>
    %83 = arith.mulf %75, %82 : vector<20x256xf32>
    %84 = vector.extract_strided_slice %83 {offsets = [0, 0], sizes = [4, 256], strides = [1, 1]} : vector<20x256xf32> to vector<4x256xf32>
    %c0_35 = arith.constant 0 : index
    %c0_36 = arith.constant 0 : index
    %85 = vector.load %arg11[%c0_35, %c0_36] : memref<4x1280xf32, #tpu.memory_space<vmem>>, vector<4x256xf32>
    tpu.vector_store %arg11[%c0_35, %c0_36], %84 {strides = array<i32>} : memref<4x1280xf32, #tpu.memory_space<vmem>>, vector<4x256xf32>,
    %86 = vector.extract_strided_slice %83 {offsets = [4, 0], sizes = [4, 256], strides = [1, 1]} : vector<20x256xf32> to vector<4x256xf32>
    %c0_37 = arith.constant 0 : index
    %c256 = arith.constant 256 : index
    %87 = vector.load %arg11[%c0_37, %c256] : memref<4x1280xf32, #tpu.memory_space<vmem>>, vector<4x256xf32>
    tpu.vector_store %arg11[%c0_37, %c256], %86 {strides = array<i32>} : memref<4x1280xf32, #tpu.memory_space<vmem>>, vector<4x256xf32>,
    %88 = vector.extract_strided_slice %83 {offsets = [8, 0], sizes = [4, 256], strides = [1, 1]} : vector<20x256xf32> to vector<4x256xf32>
    %c0_38 = arith.constant 0 : index
    %c512 = arith.constant 512 : index
    %89 = vector.load %arg11[%c0_38, %c512] : memref<4x1280xf32, #tpu.memory_space<vmem>>, vector<4x256xf32>
    tpu.vector_store %arg11[%c0_38, %c512], %88 {strides = array<i32>} : memref<4x1280xf32, #tpu.memory_space<vmem>>, vector<4x256xf32>,
    %90 = vector.extract_strided_slice %83 {offsets = [12, 0], sizes = [4, 256], strides = [1, 1]} : vector<20x256xf32> to vector<4x256xf32>
    %c0_39 = arith.constant 0 : index
    %c768 = arith.constant 768 : index
    %91 = vector.load %arg11[%c0_39, %c768] : memref<4x1280xf32, #tpu.memory_space<vmem>>, vector<4x256xf32>
    tpu.vector_store %arg11[%c0_39, %c768], %90 {strides = array<i32>} : memref<4x1280xf32, #tpu.memory_space<vmem>>, vector<4x256xf32>,
    %92 = vector.extract_strided_slice %83 {offsets = [16, 0], sizes = [4, 256], strides = [1, 1]} : vector<20x256xf32> to vector<4x256xf32>
    %c0_40 = arith.constant 0 : index
    %c1024 = arith.constant 1024 : index
    %93 = vector.load %arg11[%c0_40, %c1024] : memref<4x1280xf32, #tpu.memory_space<vmem>>, vector<4x256xf32>
    tpu.vector_store %arg11[%c0_40, %c1024], %92 {strides = array<i32>} : memref<4x1280xf32, #tpu.memory_space<vmem>>, vector<4x256xf32>,
    %94 = arith.truncf %75 : vector<20x256xf32> to vector<20x256xbf16>
    %c0_41 = arith.constant 0 : index
    %c0_42 = arith.constant 0 : index
    %95 = vector.load %arg6[%c0_41, %c0_42] : memref<256x128xbf16, #tpu.memory_space<vmem>>, vector<256x128xbf16>
    %cst_43 = arith.constant dense<0.000000e+00> : vector<20x128xf32>
    %96 = tpu.matmul %94, %95, %cst_43 {dimension_numbers = #tpu.dot_dimension_numbers<[1], [0], [0], [1], [0, 0, 1, 1], [], []>} : vector<20x256xbf16>, vector<256x128xbf16>, vector<20x128xf32> -> vector<20x128xf32>
    %97 = vector.extract_strided_slice %96 {offsets = [0, 0], sizes = [4, 64], strides = [1, 1]} : vector<20x128xf32> to vector<4x64xf32>
    %c0_44 = arith.constant 0 : index
    %c0_45 = arith.constant 0 : index
    %98 = vector.load %arg7[%c0_44, %c0_45] : memref<2x64xf32, #tpu.memory_space<vmem>>, vector<1x64xf32>
    %99 = vector.broadcast %98 : vector<1x64xf32> to vector<4x64xf32>
    %100 = arith.mulf %97, %99 : vector<4x64xf32>
    %c0_46 = arith.constant 0 : index
    %c0_47 = arith.constant 0 : index
    %101 = vector.load %arg8[%c0_46, %c0_47] : memref<2x64xf32, #tpu.memory_space<vmem>>, vector<1x64xf32>
    %102 = vector.broadcast %101 : vector<1x64xf32> to vector<4x64xf32>
    %103 = arith.addf %100, %102 : vector<4x64xf32>
    %104 = vector.extract_strided_slice %96 {offsets = [4, 64], sizes = [16, 64], strides = [1, 1]} : vector<20x128xf32> to vector<16x64xf32>
    %c1_48 = arith.constant 1 : index
    %c0_49 = arith.constant 0 : index
    %105 = vector.load %arg7[%c1_48, %c0_49] : memref<2x64xf32, #tpu.memory_space<vmem>>, vector<1x64xf32>
    %106 = vector.broadcast %105 : vector<1x64xf32> to vector<16x64xf32>
    %107 = arith.mulf %104, %106 : vector<16x64xf32>
    %c1_50 = arith.constant 1 : index
    %c0_51 = arith.constant 0 : index
    %108 = vector.load %arg8[%c1_50, %c0_51] : memref<2x64xf32, #tpu.memory_space<vmem>>, vector<1x64xf32>
    %109 = vector.broadcast %108 : vector<1x64xf32> to vector<16x64xf32>
    %110 = arith.addf %107, %109 : vector<16x64xf32>
    %111 = vector.extract_strided_slice %110 {offsets = [0, 0], sizes = [4, 64], strides = [1, 1]} : vector<16x64xf32> to vector<4x64xf32>
    %112 = vector.extract_strided_slice %110 {offsets = [4, 0], sizes = [4, 64], strides = [1, 1]} : vector<16x64xf32> to vector<4x64xf32>
    %113 = vector.extract_strided_slice %110 {offsets = [8, 0], sizes = [4, 64], strides = [1, 1]} : vector<16x64xf32> to vector<4x64xf32>
    %114 = vector.extract_strided_slice %110 {offsets = [12, 0], sizes = [4, 64], strides = [1, 1]} : vector<16x64xf32> to vector<4x64xf32>
    %115 = arith.addf %103, %111 : vector<4x64xf32>
    %116 = arith.addf %112, %113 : vector<4x64xf32>
    %117 = arith.addf %113, %114 : vector<4x64xf32>
    %118 = arith.addf %112, %114 : vector<4x64xf32>
    %119 = arith.truncf %103 : vector<4x64xf32> to vector<4x64xbf16>
    %120 = arith.truncf %111 : vector<4x64xf32> to vector<4x64xbf16>
    %121 = arith.truncf %112 : vector<4x64xf32> to vector<4x64xbf16>
    %122 = arith.truncf %113 : vector<4x64xf32> to vector<4x64xbf16>
    %123 = arith.truncf %114 : vector<4x64xf32> to vector<4x64xbf16>
    %124 = arith.truncf %115 : vector<4x64xf32> to vector<4x64xbf16>
    %125 = arith.truncf %116 : vector<4x64xf32> to vector<4x64xbf16>
    %126 = arith.truncf %117 : vector<4x64xf32> to vector<4x64xbf16>
    %127 = arith.truncf %118 : vector<4x64xf32> to vector<4x64xbf16>
    %128 = tpu.concatenate %119, %124 in 1 : vector<4x64xbf16>, vector<4x64xbf16> -> vector<4x128xbf16>
    %c0_52 = arith.constant 0 : index
    %c0_53 = arith.constant 0 : index
    %c0_54 = arith.constant 0 : index
    %129 = vector.load %arg9[%c0_52, %c0_53, %c0_54] : memref<5x128x64xbf16, #tpu.memory_space<vmem>>, vector<1x128x64xbf16>
    %130 = vector.shape_cast %129 : vector<1x128x64xbf16> to vector<128x64xbf16>
    %cst_55 = arith.constant dense<0.000000e+00> : vector<4x64xf32>
    %131 = tpu.matmul %128, %130, %cst_55 {dimension_numbers = #tpu.dot_dimension_numbers<[1], [0], [0], [1], [0, 0, 1, 1], [], []>} : vector<4x128xbf16>, vector<128x64xbf16>, vector<4x64xf32> -> vector<4x64xf32>
    %c0_56 = arith.constant 0 : index
    %c0_57 = arith.constant 0 : index
    %132 = vector.load %arg10[%c0_56, %c0_57] : memref<5x64xf32, #tpu.memory_space<vmem>>, vector<1x64xf32>
    %133 = vector.broadcast %132 : vector<1x64xf32> to vector<4x64xf32>
    %134 = arith.addf %131, %133 : vector<4x64xf32>
    %135 = arith.mulf %134, %134 : vector<4x64xf32>
    %cst_58 = arith.constant dense<0.000000e+00> : vector<4xf32>
    %136 = vector.multi_reduction <add>, %135, %cst_58 [1] : vector<4x64xf32> to vector<4xf32>
    %137 = vector.shape_cast %136 : vector<4xf32> to vector<4x1xf32>
    %cst_59 = arith.constant 9.99999996E-13 : f32
    %138 = vector.broadcast %cst_59 : f32 to vector<4x1xf32>
    %139 = arith.addf %137, %138 : vector<4x1xf32>
    %140 = math.rsqrt %139 : vector<4x1xf32>
    %141 = vector.broadcast %140 : vector<4x1xf32> to vector<4x64xf32>
    %142 = arith.mulf %134, %141 : vector<4x64xf32>
    %143 = tpu.concatenate %120, %124 in 1 : vector<4x64xbf16>, vector<4x64xbf16> -> vector<4x128xbf16>
    %c1_60 = arith.constant 1 : index
    %c0_61 = arith.constant 0 : index
    %c0_62 = arith.constant 0 : index
    %144 = vector.load %arg9[%c1_60, %c0_61, %c0_62] : memref<5x128x64xbf16, #tpu.memory_space<vmem>>, vector<1x128x64xbf16>
    %145 = vector.shape_cast %144 : vector<1x128x64xbf16> to vector<128x64xbf16>
    %cst_63 = arith.constant dense<0.000000e+00> : vector<4x64xf32>
    %146 = tpu.matmul %143, %145, %cst_63 {dimension_numbers = #tpu.dot_dimension_numbers<[1], [0], [0], [1], [0, 0, 1, 1], [], []>} : vector<4x128xbf16>, vector<128x64xbf16>, vector<4x64xf32> -> vector<4x64xf32>
    %c1_64 = arith.constant 1 : index
    %c0_65 = arith.constant 0 : index
    %147 = vector.load %arg10[%c1_64, %c0_65] : memref<5x64xf32, #tpu.memory_space<vmem>>, vector<1x64xf32>
    %148 = vector.broadcast %147 : vector<1x64xf32> to vector<4x64xf32>
    %149 = arith.addf %146, %148 : vector<4x64xf32>
    %150 = arith.mulf %149, %149 : vector<4x64xf32>
    %cst_66 = arith.constant dense<0.000000e+00> : vector<4xf32>
    %151 = vector.multi_reduction <add>, %150, %cst_66 [1] : vector<4x64xf32> to vector<4xf32>
    %152 = vector.shape_cast %151 : vector<4xf32> to vector<4x1xf32>
    %cst_67 = arith.constant 9.99999996E-13 : f32
    %153 = vector.broadcast %cst_67 : f32 to vector<4x1xf32>
    %154 = arith.addf %152, %153 : vector<4x1xf32>
    %155 = math.rsqrt %154 : vector<4x1xf32>
    %156 = vector.broadcast %155 : vector<4x1xf32> to vector<4x64xf32>
    %157 = arith.mulf %149, %156 : vector<4x64xf32>
    %158 = tpu.concatenate %121, %126 in 1 : vector<4x64xbf16>, vector<4x64xbf16> -> vector<4x128xbf16>
    %c2 = arith.constant 2 : index
    %c0_68 = arith.constant 0 : index
    %c0_69 = arith.constant 0 : index
    %159 = vector.load %arg9[%c2, %c0_68, %c0_69] : memref<5x128x64xbf16, #tpu.memory_space<vmem>>, vector<1x128x64xbf16>
    %160 = vector.shape_cast %159 : vector<1x128x64xbf16> to vector<128x64xbf16>
    %cst_70 = arith.constant dense<0.000000e+00> : vector<4x64xf32>
    %161 = tpu.matmul %158, %160, %cst_70 {dimension_numbers = #tpu.dot_dimension_numbers<[1], [0], [0], [1], [0, 0, 1, 1], [], []>} : vector<4x128xbf16>, vector<128x64xbf16>, vector<4x64xf32> -> vector<4x64xf32>
    %c2_71 = arith.constant 2 : index
    %c0_72 = arith.constant 0 : index
    %162 = vector.load %arg10[%c2_71, %c0_72] : memref<5x64xf32, #tpu.memory_space<vmem>>, vector<1x64xf32>
    %163 = vector.broadcast %162 : vector<1x64xf32> to vector<4x64xf32>
    %164 = arith.addf %161, %163 : vector<4x64xf32>
    %165 = arith.mulf %164, %164 : vector<4x64xf32>
    %cst_73 = arith.constant dense<0.000000e+00> : vector<4xf32>
    %166 = vector.multi_reduction <add>, %165, %cst_73 [1] : vector<4x64xf32> to vector<4xf32>
    %167 = vector.shape_cast %166 : vector<4xf32> to vector<4x1xf32>
    %cst_74 = arith.constant 9.99999996E-13 : f32
    %168 = vector.broadcast %cst_74 : f32 to vector<4x1xf32>
    %169 = arith.addf %167, %168 : vector<4x1xf32>
    %170 = math.rsqrt %169 : vector<4x1xf32>
    %171 = vector.broadcast %170 : vector<4x1xf32> to vector<4x64xf32>
    %172 = arith.mulf %164, %171 : vector<4x64xf32>
    %173 = tpu.concatenate %122, %127 in 1 : vector<4x64xbf16>, vector<4x64xbf16> -> vector<4x128xbf16>
    %c3 = arith.constant 3 : index
    %c0_75 = arith.constant 0 : index
    %c0_76 = arith.constant 0 : index
    %174 = vector.load %arg9[%c3, %c0_75, %c0_76] : memref<5x128x64xbf16, #tpu.memory_space<vmem>>, vector<1x128x64xbf16>
    %175 = vector.shape_cast %174 : vector<1x128x64xbf16> to vector<128x64xbf16>
    %cst_77 = arith.constant dense<0.000000e+00> : vector<4x64xf32>
    %176 = tpu.matmul %173, %175, %cst_77 {dimension_numbers = #tpu.dot_dimension_numbers<[1], [0], [0], [1], [0, 0, 1, 1], [], []>} : vector<4x128xbf16>, vector<128x64xbf16>, vector<4x64xf32> -> vector<4x64xf32>
    %c3_78 = arith.constant 3 : index
    %c0_79 = arith.constant 0 : index
    %177 = vector.load %arg10[%c3_78, %c0_79] : memref<5x64xf32, #tpu.memory_space<vmem>>, vector<1x64xf32>
    %178 = vector.broadcast %177 : vector<1x64xf32> to vector<4x64xf32>
    %179 = arith.addf %176, %178 : vector<4x64xf32>
    %180 = arith.mulf %179, %179 : vector<4x64xf32>
    %cst_80 = arith.constant dense<0.000000e+00> : vector<4xf32>
    %181 = vector.multi_reduction <add>, %180, %cst_80 [1] : vector<4x64xf32> to vector<4xf32>
    %182 = vector.shape_cast %181 : vector<4xf32> to vector<4x1xf32>
    %cst_81 = arith.constant 9.99999996E-13 : f32
    %183 = vector.broadcast %cst_81 : f32 to vector<4x1xf32>
    %184 = arith.addf %182, %183 : vector<4x1xf32>
    %185 = math.rsqrt %184 : vector<4x1xf32>
    %186 = vector.broadcast %185 : vector<4x1xf32> to vector<4x64xf32>
    %187 = arith.mulf %179, %186 : vector<4x64xf32>
    %188 = tpu.concatenate %123, %125 in 1 : vector<4x64xbf16>, vector<4x64xbf16> -> vector<4x128xbf16>
    %c4 = arith.constant 4 : index
    %c0_82 = arith.constant 0 : index
    %c0_83 = arith.constant 0 : index
    %189 = vector.load %arg9[%c4, %c0_82, %c0_83] : memref<5x128x64xbf16, #tpu.memory_space<vmem>>, vector<1x128x64xbf16>
    %190 = vector.shape_cast %189 : vector<1x128x64xbf16> to vector<128x64xbf16>
    %cst_84 = arith.constant dense<0.000000e+00> : vector<4x64xf32>
    %191 = tpu.matmul %188, %190, %cst_84 {dimension_numbers = #tpu.dot_dimension_numbers<[1], [0], [0], [1], [0, 0, 1, 1], [], []>} : vector<4x128xbf16>, vector<128x64xbf16>, vector<4x64xf32> -> vector<4x64xf32>
    %c4_85 = arith.constant 4 : index
    %c0_86 = arith.constant 0 : index
    %192 = vector.load %arg10[%c4_85, %c0_86] : memref<5x64xf32, #tpu.memory_space<vmem>>, vector<1x64xf32>
    %193 = vector.broadcast %192 : vector<1x64xf32> to vector<4x64xf32>
    %194 = arith.addf %191, %193 : vector<4x64xf32>
    %195 = arith.mulf %194, %194 : vector<4x64xf32>
    %cst_87 = arith.constant dense<0.000000e+00> : vector<4xf32>
    %196 = vector.multi_reduction <add>, %195, %cst_87 [1] : vector<4x64xf32> to vector<4xf32>
    %197 = vector.shape_cast %196 : vector<4xf32> to vector<4x1xf32>
    %cst_88 = arith.constant 9.99999996E-13 : f32
    %198 = vector.broadcast %cst_88 : f32 to vector<4x1xf32>
    %199 = arith.addf %197, %198 : vector<4x1xf32>
    %200 = math.rsqrt %199 : vector<4x1xf32>
    %201 = vector.broadcast %200 : vector<4x1xf32> to vector<4x64xf32>
    %202 = arith.mulf %194, %201 : vector<4x64xf32>
    %203 = tpu.concatenate %142, %157, %172, %187, %202 in 1 : vector<4x64xf32>, vector<4x64xf32>, vector<4x64xf32>, vector<4x64xf32>, vector<4x64xf32> -> vector<4x320xf32>
    %c0_89 = arith.constant 0 : index
    %c0_90 = arith.constant 0 : index
    %204 = vector.load %arg12[%c0_89, %c0_90] : memref<4x320xf32, #tpu.memory_space<vmem>>, vector<4x320xf32>
    tpu.vector_store %arg12[%c0_89, %c0_90], %203 {strides = array<i32>} : memref<4x320xf32, #tpu.memory_space<vmem>>, vector<4x320xf32>,
    return
  }
}

</mosaic_0001>

<bundles_post_ra>
// kernel: embed_net_forward.1
= control target key start
LH: loop header
LB: loop body
LE: loop exit
PB: predicated region body
PF: predicated region fallthrough
CT: control target
= control target key end

     0   :  { %18 = vsyncpa [#allocation3], 0  ;;  %v8718_v2 = vmov 1   ;;  %v8716_v3 = vmov 0   ;;  %s8703_s0 = inlined_call_operand.vmem [shape: f32[2,512,3], index: 0, kind: input, shape index: {}]   ;;  %s8704_s1 = inlined_call_operand.vmem [shape: f32[2,3,128], index: 1, kind: input, shape index: {}]   ;;  %s8705_s2 = inlined_call_operand.vmem [shape: f32[2,1,128], index: 2, kind: input, shape index: {}]   ;;  %s8706_s3 = inlined_call_operand.vmem [shape: f32[20,1024], index: 3, kind: input, shape index: {}]   ;;  %s8707_s4 = inlined_call_operand.vmem [shape: bf16[2,128,256], index: 4, kind: input, shape index: {}]   ;;  %s8708_s5 = inlined_call_operand.vmem [shape: f32[2,256], index: 5, kind: input, shape index: {}]   ;;  %s8709_s6 = inlined_call_operand.vmem [shape: bf16[256,128], index: 6, kind: input, shape index: {}]   ;;  %s8710_s7 = inlined_call_operand.vmem [shape: f32[2,64], index: 7, kind: input, shape index: {}]   ;;  %s8711_s8 = inlined_call_operand.vmem [shape: f32[2,64], index: 8, kind: input, shape index: {}]   ;;  %s8712_s9 = inlined_call_operand.vmem [shape: bf16[5,128,64], index: 9, kind: input, shape index: {}]   ;;  %s8713_s10 = inlined_call_operand.vmem [shape: f32[5,64], index: 10, kind: input, shape index: {}]   ;;  %s8714_s11 = inlined_call_operand.hbm [shape: f32[4,1280], index: 11, kind: output, shape index: {0}]   ;;  %s8715_s12 = inlined_call_operand.hbm [shape: f32[4,320], index: 12, kind: output, shape index: {1}]  }
   0x1   :  { %v5535_v0 = vld [vmem:[%s8703_s0 + $0x10] sm:$0xff]  ;;  %v5540_v1 = vld [vmem:[%s8703_s0] sm:$0xff]  ;;  %5110 = vset.pattern.permute.xlu0 %v8718_v2  ;;  %5109 = vset.pattern.permute.xlu1 %v8716_v3  ;;  %v5549_v4 = vld [vmem:[%s8703_s0 + $0x18] sm:$0xff] }
   0x2   :  { %120 = vperm.xlu1 %5109, %v5535_v0   ;;  %497 = vperm.xlu0 %5110, %v5540_v1   ;;  %v5556_v5 = vld [vmem:[%s8703_s0 + $0x28] sm:$0xff]  ;;  %v5563_v6 = vld [vmem:[%s8703_s0 + $0x38] sm:$0xff]  ;;  %v5617_v16 = vld [vmem:[%s8703_s0 + $0x180] sm:$0xff] }
   0x3   :  { %v5570_v7 = vld [vmem:[%s8703_s0 + $0x48] sm:$0xff]  ;;  %v54_v8 = vld [vmem:[%s8703_s0 + $0x58] sm:$0xff]  ;;  %v5655_v22 = vld [vmem:[%s8703_s0 + $0x110] sm:$0xff] }
   0x4   :  { %v56_v9 = vld [vmem:[%s8703_s0 + $0x68] sm:$0xff]  ;;  %v58_v10 = vld [vmem:[%s8703_s0 + $0x78] sm:$0xff]  ;;  %v5672_v25 = vld [vmem:[%s8703_s0 + $0x120] sm:$0xff] }
   0x5   :  { %v5586_v11 = vld [vmem:[%s8703_s0 + $0x88] sm:$0xff]  ;;  %v5593_v12 = vld [vmem:[%s8703_s0 + $0x98] sm:$0xff] }
   0x6   :  { %125 = vperm.xlu1 %5109, %v5549_v4   ;;  %509 = vperm.xlu0 %5110, %v5549_v4   ;;  %v5600_v13 = vld [vmem:[%s8703_s0 + $0xa8] sm:$0xff]  ;;  %v5607_v14 = vld [vmem:[%s8703_s0 + $0xb8] sm:$0xff] }
   0x7   :  { %v5612_v15 = vld [vmem:[%s8703_s0 + $0xc8] sm:$0xff]  ;;  %v5624_v17 = vld [vmem:[%s8703_s0 + $0xd8] sm:$0xff] }
   0x8   :  { %v5629_v18 = vld [vmem:[%s8703_s0 + $0x108] sm:$0xff]  ;;  %v5641_v20 = vld [vmem:[%s8703_s0 + $0x198] sm:$0xff] }
   0x9   :  { %v5636_v19 = vld [vmem:[%s8703_s0 + $0xe8] sm:$0xff]  ;;  %v5648_v21 = vld [vmem:[%s8703_s0 + $0xf8] sm:$0xff] }
   0xa   :  { %135 = vperm.xlu1 %5109, %v5556_v5   ;;  %517 = vperm.xlu0 %5110, %v5556_v5   ;;  %v5660_v23 = vld [vmem:[%s8703_s0 + $0x1a8] sm:$0xff]  ;;  %v5667_v24 = vld [vmem:[%s8703_s0 + $0x118] sm:$0xff] }
   0xe   :  { %145 = vperm.xlu1 %5109, %v5563_v6   ;;  %525 = vperm.xlu0 %5110, %v5563_v6  }
  0x12   :  { %155 = vperm.xlu1 %5109, %v5570_v7   ;;  %533 = vperm.xlu0 %5110, %v5570_v7  }
  0x16   :  { %165 = vperm.xlu1 %5109, %v54_v8   ;;  %541 = vperm.xlu0 %5110, %v54_v8  }
  0x1a   :  { %175 = vperm.xlu1 %5109, %v56_v9   ;;  %549 = vperm.xlu0 %5110, %v56_v9  }
  0x1e   :  { %185 = vperm.xlu1 %5109, %v58_v10   ;;  %557 = vperm.xlu0 %5110, %v58_v10  }
  0x22   :  { %195 = vperm.xlu1 %5109, %v5586_v11   ;;  %565 = vperm.xlu0 %5110, %v5586_v11  }
  0x26   :  { %205 = vperm.xlu1 %5109, %v5593_v12   ;;  %573 = vperm.xlu0 %5110, %v5593_v12  }
  0x2a   :  { %215 = vperm.xlu1 %5109, %v5600_v13   ;;  %581 = vperm.xlu0 %5110, %v5600_v13  }
  0x2e   :  { %225 = vperm.xlu1 %5109, %v5607_v14   ;;  %589 = vperm.xlu0 %5110, %v5607_v14  }
  0x32   :  { %235 = vperm.xlu1 %5109, %v5612_v15   ;;  %689 = vperm.xlu0 %5110, %v5617_v16  }
  0x36   :  { %245 = vperm.xlu1 %5109, %v5624_v17   ;;  %629 = vperm.xlu0 %5110, %v5629_v18  }
  0x3a   :  { %255 = vperm.xlu1 %5109, %v5636_v19   ;;  %701 = vperm.xlu0 %5110, %v5641_v20  }
  0x3e   :  { %265 = vperm.xlu1 %5109, %v5648_v21   ;;  %633 = vperm.xlu0 %5110, %v5655_v22  }
  0x42   :  { %275 = vperm.xlu1 %5109, %v5629_v18   ;;  %709 = vperm.xlu0 %5110, %v5660_v23  }
  0x43   :  { %19 = vsyncpa [#allocation5], 0  ;;  %v5681_v26 = vld [vmem:[%s8703_s0 + $0x128] sm:$0xff]  ;;  %v5686_v27 = vld [vmem:[%s8703_s0 + $0x1b8] sm:$0xff]  ;;  %s5462_s20 = smov 64   ;;  %vm5464_vm0 = vmmov 0  }
  0x44   :  { %v5693_v28 = vld [vmem:[%s8703_s0 + $0x138] sm:$0xff]  ;;  %v5698_v29 = vld [vmem:[%s8703_s0 + $0x130] sm:$0xff]  ;;  %v5705_v30 = vld [vmem:[%s8703_s0 + $0x148] sm:$0xff]  ;;  %vm3721_vm1 = vcmask 523264   ;;  %vm3836_vm2 = vcmask 519168   ;;  %vm3440_vm3 = vcmask 1043456  }
  0x45   :  { %v5710_v31 = vld [vmem:[%s8703_s0 + $0x1c0] sm:$0xff]  ;;  %v5717_v32 = vld [vmem:[%s8703_s0 + $0x158] sm:$0xff]  ;;  %v5722_v33 = vld [vmem:[%s8703_s0 + $0xd0] sm:$0xff] }
  0x46   :  { %285 = vperm.xlu1 %5109, %v5667_v24   ;;  %641 = vperm.xlu0 %5110, %v5672_v25   ;;  %v5729_v34 = vld [vmem:[%s8703_s0 + $0x168] sm:$0xff]  ;;  %v5734_v35 = vld [vmem:[%s8703_s0 + $0x1d0] sm:$0xff]  ;;  %v5741_v36 = vld [vmem:[%s8703_s0 + $0x178] sm:$0xff] }
  0x47   :  { %v5746_v37 = vld [vmem:[%s8703_s0 + $0xe0] sm:$0xff]  ;;  %v5753_v38 = vld [vmem:[%s8703_s0 + $0x188] sm:$0xff]  ;;  %v5765_v40 = vld [vmem:[%s8703_s0 + $0xf0] sm:$0xff] }
  0x48   :  { %v5758_v39 = vld [vmem:[%s8703_s0 + $0x1e0] sm:$0xff]  ;;  %v5772_v41 = vld [vmem:[%s8703_s0 + $0x1f0] sm:$0xff]  ;;  %v5779_v42 = vld [vmem:[%s8703_s0 + $0x288] sm:$0xff] }
  0x49   :  { %v5786_v43 = vld [vmem:[%s8703_s0 + $0x1c8] sm:$0xff]  ;;  %v5798_v45 = vld [vmem:[%s8703_s0 + $0x1d8] sm:$0xff]  ;;  %v5803_v46 = vld [vmem:[%s8703_s0 + $0x380] sm:$0xff] }
  0x4a   :  { %295 = vperm.xlu1 %5109, %v5681_v26   ;;  %717 = vperm.xlu0 %5110, %v5686_v27   ;;  %v5791_v44 = vld [vmem:[%s8703_s0 + $0x208] sm:$0xff]  ;;  %8735 = vst [vmem:[#allocation9_spill] sm:$0xff] %v5803_v46  ;;  %v5818_v48 = vld [vmem:[%s8703_s0 + $0x1f8] sm:$0xff]  ;;  %v5830_v50 = vld [vmem:[%s8703_s0 + $0x20] sm:$0xff] }
  0x4b   :  { %8734 = vst [vmem:[#allocation8_spill] sm:$0xff] %v5791_v44  ;;  %v5810_v47 = vld [vmem:[%s8703_s0 + $0x1e8] sm:$0xff]  ;;  %v5842_v53 = vld [vmem:[%s8703_s0 + $0x30] sm:$0xff]  ;;  %v5853_v56 = vld [vmem:[%s8703_s0 + $0x40] sm:$0xff] }
  0x4c   :  { %v5823_v49 = vld [vmem:[%s8703_s0 + $0x8] sm:$0xff]  ;;  %v5864_v59 = vld [vmem:[%s8703_s0 + $0x50] sm:$0xff]  ;;  %v5875_v62 = vld [vmem:[%s8703_s0 + $0x60] sm:$0xff] }
  0x4d   :  { %v5886_v8 = vld [vmem:[%s8703_s0 + $0x70] sm:$0xff] }
  0x4e   :  { %305 = vperm.xlu1 %5109, %v5693_v28   ;;  %649 = vperm.xlu0 %5110, %v5698_v29  }
  0x52   :  { %315 = vperm.xlu1 %5109, %v5705_v30   ;;  %721 = vperm.xlu0 %5110, %v5710_v31  }
  0x56   :  { %325 = vperm.xlu1 %5109, %v5717_v32   ;;  %601 = vperm.xlu0 %5110, %v5722_v33  }
  0x5a   :  { %335 = vperm.xlu1 %5109, %v5729_v34   ;;  %729 = vperm.xlu0 %5110, %v5734_v35  }
  0x5e   :  { %345 = vperm.xlu1 %5109, %v5741_v36   ;;  %609 = vperm.xlu0 %5110, %v5746_v37  }
  0x62   :  { %355 = vperm.xlu1 %5109, %v5753_v38   ;;  %737 = vperm.xlu0 %5110, %v5758_v39  }
  0x66   :  { %365 = vperm.xlu1 %5109, %v5641_v20   ;;  %617 = vperm.xlu0 %5110, %v5765_v40  }
  0x6a   :  { %375 = vperm.xlu1 %5109, %v5660_v23   ;;  %745 = vperm.xlu0 %5110, %v5772_v41  }
  0x6e   :  { %385 = vperm.xlu1 %5109, %v5686_v27   ;;  %1931 = vperm.xlu0 %5110, %v5779_v42  }
  0x72   :  { %395 = vperm.xlu1 %5109, %v5786_v43   ;;  %1867 = vperm.xlu0 %5110, %v5791_v44  }
  0x76   :  { %405 = vperm.xlu1 %5109, %v5798_v45   ;;  %2055 = vperm.xlu0 %5110, %v5803_v46  }
  0x7a   :  { %415 = vperm.xlu1 %5109, %v5810_v47   ;;  %5157 = vset.pattern.permute.xlu0 %v8716_v3  ;;  %v5897_v3 = vld [vmem:[%s8703_s0 + $0x80] sm:$0xff] }
  0x7b   :  { %110 = vperm.xlu0 %5157, %v5540_v1  }
  0x7e   :  { %425 = vperm.xlu1 %5109, %v5818_v48  }
  0x7f   :  { %115 = vperm.xlu0 %5157, %v5823_v49  }
  0x81   :  { %v5832_v51 = vpop.permute.xlu1 %120  ;;  %v5834_v52 = vpop.permute.xlu0 %497 }
  0x82   :  { %5111 = vset.pattern.permute.xlu1 %v8718_v2 }
  0x83   :  { %501 = vperm.xlu1 %5111, %v5823_v49   ;;  %130 = vperm.xlu0 %5157, %v5830_v50  }
  0x85   :  { %v5844_v54 = vpop.permute.xlu1 %125  ;;  %v5846_v55 = vpop.permute.xlu0 %509 }
  0x86   :  { %8736 = vst [vmem:[#allocation10_spill] sm:$0xff] %v5844_v54  ;;  %8737 = vst [vmem:[#allocation11_spill] sm:$0xff] %v5846_v55 }
  0x87   :  { %505 = vperm.xlu1 %5111, %v5535_v0   ;;  %140 = vperm.xlu0 %5157, %v5842_v53  }
  0x89   :  { %v5855_v57 = vpop.permute.xlu1 %135  ;;  %v5857_v58 = vpop.permute.xlu0 %517 }
  0x8a   :  { %8738 = vst [vmem:[#allocation12_spill] sm:$0xff] %v5855_v57  ;;  %8739 = vst [vmem:[#allocation13_spill] sm:$0xff] %v5857_v58  ;;  %v8766_v57 = vmov 1  }
  0x8b   :  { %513 = vperm.xlu1 %5111, %v5830_v50   ;;  %150 = vperm.xlu0 %5157, %v5853_v56  }
  0x8d   :  { %v5866_v60 = vpop.permute.xlu1 %145  ;;  %v5868_v61 = vpop.permute.xlu0 %525 }
  0x8e   :  { %8740 = vst [vmem:[#allocation14_spill] sm:$0xff] %v5866_v60  ;;  %8741 = vst [vmem:[#allocation15_spill] sm:$0xff] %v5868_v61 }
  0x8f   :  { %521 = vperm.xlu1 %5111, %v5842_v53   ;;  %160 = vperm.xlu0 %5157, %v5864_v59  }
  0x91   :  { %v5877_v63 = vpop.permute.xlu1 %155  ;;  %v5879_v0 = vpop.permute.xlu0 %533 }
  0x92   :  { %8742 = vst [vmem:[#allocation16_spill] sm:$0xff] %v5877_v63  ;;  %8743 = vst [vmem:[#allocation17_spill] sm:$0xff] %v5879_v0 }
  0x93   :  { %529 = vperm.xlu1 %5111, %v5853_v56   ;;  %170 = vperm.xlu0 %5157, %v5875_v62  }
  0x95   :  { %v5888_v9 = vpop.permute.xlu1 %165  ;;  %v5890_v10 = vpop.permute.xlu0 %541 }
  0x96   :  { %8744 = vst [vmem:[#allocation18_spill] sm:$0xff] %v5888_v9  ;;  %8745 = vst [vmem:[#allocation19_spill] sm:$0xff] %v5890_v10  ;;  %v5908_v10 = vld [vmem:[%s8703_s0 + $0x90] sm:$0xff] }
  0x97   :  { %537 = vperm.xlu1 %5111, %v5864_v59   ;;  %180 = vperm.xlu0 %5157, %v5886_v8  }
  0x99   :  { %v5899_v2 = vpop.permute.xlu1 %175  ;;  %v5901_v44 = vpop.permute.xlu0 %549 }
  0x9a   :  { %8746 = vst [vmem:[#allocation20_spill] sm:$0xff] %v5899_v2  ;;  %8747 = vst [vmem:[#allocation21_spill] sm:$0xff] %v5901_v44  ;;  %v5919_v44 = vld [vmem:[%s8703_s0 + $0xa0] sm:$0xff] }
  0x9b   :  { %545 = vperm.xlu1 %5111, %v5875_v62   ;;  %190 = vperm.xlu0 %5157, %v5897_v3  }
  0x9d   :  { %v5910_v9 = vpop.permute.xlu1 %185  ;;  %v5912_v0 = vpop.permute.xlu0 %557 }
  0x9e   :  { %8748 = vst [vmem:[#allocation22_spill] sm:$0xff] %v5910_v9  ;;  %8749 = vst [vmem:[#allocation23_spill] sm:$0xff] %v5912_v0  ;;  %v5930_v0 = vld [vmem:[%s8703_s0 + $0xb0] sm:$0xff] }
  0x9f   :  { %553 = vperm.xlu1 %5111, %v5886_v8   ;;  %200 = vperm.xlu0 %5157, %v5908_v10  }
  0xa1   :  { %v5921_v2 = vpop.permute.xlu1 %195  ;;  %v5923_v63 = vpop.permute.xlu0 %565 }
  0xa2   :  { %8750 = vst [vmem:[#allocation24_spill] sm:$0xff] %v5921_v2  ;;  %8751 = vst [vmem:[#allocation25_spill] sm:$0xff] %v5923_v63  ;;  %v5941_v63 = vld [vmem:[%s8703_s0 + $0xc0] sm:$0xff] }
  0xa3   :  { %561 = vperm.xlu1 %5111, %v5897_v3   ;;  %210 = vperm.xlu0 %5157, %v5919_v44  }
  0xa5   :  { %v5932_v9 = vpop.permute.xlu1 %205  ;;  %v5934_v61 = vpop.permute.xlu0 %573 }
  0xa6   :  { %8752 = vst [vmem:[#allocation26_spill] sm:$0xff] %v5932_v9  ;;  %8753 = vst [vmem:[#allocation27_spill] sm:$0xff] %v5934_v61 }
  0xa7   :  { %569 = vperm.xlu1 %5111, %v5908_v10   ;;  %220 = vperm.xlu0 %5157, %v5930_v0  }
  0xa9   :  { %v5943_v2 = vpop.permute.xlu1 %215  ;;  %v5945_v60 = vpop.permute.xlu0 %581 }
  0xaa   :  { %8754 = vst [vmem:[#allocation28_spill] sm:$0xff] %v5943_v2  ;;  %8755 = vst [vmem:[#allocation29_spill] sm:$0xff] %v5945_v60 }
  0xab   :  { %577 = vperm.xlu1 %5111, %v5919_v44   ;;  %230 = vperm.xlu0 %5157, %v5941_v63  }
  0xad   :  { %v5949_v9 = vpop.permute.xlu1 %225  ;;  %v5951_v61 = vpop.permute.xlu0 %589 }
  0xae   :  { %8756 = vst [vmem:[#allocation30_spill] sm:$0xff] %v5949_v9  ;;  %8757 = vst [vmem:[#allocation31_spill] sm:$0xff] %v5951_v61  ;;  %v75_v61 = vld [vmem:[%s8703_s0 + $0x100] sm:$0xff] }
  0xaf   :  { %585 = vperm.xlu1 %5111, %v5930_v0   ;;  %240 = vperm.xlu0 %5157, %v5722_v33  }
  0xb1   :  { %v5955_v46 = vpop.permute.xlu1 %235  ;;  %v5957_v58 = vpop.permute.xlu0 %689 }
  0xb2   :  { %8758 = vst [vmem:[#allocation32_spill] sm:$0xff] %v5955_v46  ;;  %8759 = vst [vmem:[#allocation33_spill] sm:$0xff] %v5957_v58  ;;  %v8722_v58 = vmov 2  }
  0xb3   :  { %593 = vperm.xlu1 %5111, %v5941_v63   ;;  %250 = vperm.xlu0 %5157, %v5746_v37  }
  0xb5   :  { %v5961_v60 = vpop.permute.xlu1 %245  ;;  %v5963_v2 = vpop.permute.xlu0 %629 }
  0xb6   :  { %8760 = vst [vmem:[#allocation34_spill] sm:$0xff] %v5961_v60  ;;  %8761 = vst [vmem:[#allocation35_spill] sm:$0xff] %v5963_v2 }
  0xb7   :  { %693 = vperm.xlu1 %5111, %v5753_v38   ;;  %260 = vperm.xlu0 %5157, %v5765_v40  }
  0xb9   :  { %v5970_v9 = vpop.permute.xlu1 %255  ;;  %v5972_v46 = vpop.permute.xlu0 %701 }
  0xba   :  { %8762 = vst [vmem:[#allocation36_spill] sm:$0xff] %v5970_v9  ;;  %8763 = vst [vmem:[#allocation37_spill] sm:$0xff] %v5972_v46 }
  0xbb   :  { %5112 = vset.pattern.permute.xlu1 %v8722_v58  ;;  %270 = vperm.xlu0 %5157, %v75_v61  }
  0xbc   :  { %953 = vperm.xlu1 %5112, %v5586_v11  }
  0xbd   :  { %v5976_v60 = vpop.permute.xlu1 %265  ;;  %v5978_v2 = vpop.permute.xlu0 %633 }
  0xbe   :  { %8764 = vst [vmem:[#allocation38_spill] sm:$0xff] %v5976_v60  ;;  %8765 = vst [vmem:[#allocation39_spill] sm:$0xff] %v5978_v2  ;;  %v5997_v60 = vld [vmem:[%s8703_s0 + $0x140] sm:$0xff] }
  0xbf   :  { %280 = vperm.xlu0 %5157, %v5655_v22  }
  0xc0   :  { %5113 = vset.pattern.permute.xlu1 %v8766_v57 }
  0xc1   :  { %v5982_v55 = vpop.permute.xlu1 %275  ;;  %625 = vperm.xlu1 %5113, %v75_v61   ;;  %v5984_v9 = vpop.permute.xlu0 %709 }
  0xc2   :  { %8767 = vst [vmem:[#allocation40_spill] sm:$0xff] %v5982_v55  ;;  %8768 = vst [vmem:[#allocation41_spill] sm:$0xff] %v5984_v9 }
  0xc3   :  { %290 = vperm.xlu0 %5157, %v5672_v25  }
  0xc5   :  { %v5987_v46 = vpop.permute.xlu1 %285  ;;  %5114 = vset.pattern.permute.xlu1 %v8722_v58  ;;  %v5990_v11 = vpop.permute.xlu0 %641  ;;  %v6008_v58 = vld [vmem:[%s8703_s0 + $0x150] sm:$0xff] }
  0xc6   :  { %8769 = vst [vmem:[#allocation42_spill] sm:$0xff] %v5987_v46  ;;  %8770 = vst [vmem:[#allocation43_spill] sm:$0xff] %v5990_v11  ;;  %885 = vperm.xlu1 %5114, %v5540_v1  }
  0xc7   :  { %300 = vperm.xlu0 %5157, %v5698_v29  }
  0xc9   :  { %v5999_v2 = vpop.permute.xlu1 %295  ;;  %v6001_v9 = vpop.permute.xlu0 %717 }
  0xca   :  { %8771 = vst [vmem:[#allocation44_spill] sm:$0xff] %v5999_v2  ;;  %8772 = vst [vmem:[#allocation45_spill] sm:$0xff] %v6001_v9  ;;  %889 = vperm.xlu1 %5114, %v5823_v49   ;;  %v6019_v9 = vld [vmem:[%s8703_s0 + $0x160] sm:$0xff] }
  0xcb   :  { %310 = vperm.xlu0 %5157, %v5997_v60  }
  0xcd   :  { %v6010_v1 = vpop.permute.xlu1 %305  ;;  %v6012_v11 = vpop.permute.xlu0 %649 }
  0xce   :  { %8773 = vst [vmem:[#allocation46_spill] sm:$0xff] %v6010_v1  ;;  %8774 = vst [vmem:[#allocation47_spill] sm:$0xff] %v6012_v11  ;;  %1081 = vperm.xlu1 %5114, %v5753_v38   ;;  %v93_v11 = vld [vmem:[%s8703_s0 + $0x190] sm:$0xff] }
  0xcf   :  { %320 = vperm.xlu0 %5157, %v6008_v58   ;;  %v6032_v38 = vld [vmem:[%s8703_s0 + $0x170] sm:$0xff] }
  0xd1   :  { %v6021_v49 = vpop.permute.xlu1 %315  ;;  %v6023_v2 = vpop.permute.xlu0 %721 }
  0xd2   :  { %8775 = vst [vmem:[#allocation48_spill] sm:$0xff] %v6021_v49  ;;  %8776 = vst [vmem:[#allocation49_spill] sm:$0xff] %v6023_v2  ;;  %1013 = vperm.xlu1 %5114, %v75_v61   ;;  %v8781_v49 = vmov 2  }
  0xd3   :  { %330 = vperm.xlu0 %5157, %v6019_v9  }
  0xd5   :  { %v6034_v1 = vpop.permute.xlu1 %325  ;;  %v6036_v46 = vpop.permute.xlu0 %601 }
  0xd6   :  { %8777 = vst [vmem:[#allocation50_spill] sm:$0xff] %v6034_v1  ;;  %8778 = vst [vmem:[#allocation51_spill] sm:$0xff] %v6036_v46  ;;  %5115 = vset.pattern.permute.xlu1 %v8766_v57  ;;  %v95_v46 = vld [vmem:[%s8703_s0 + $0x1a0] sm:$0xff] }
  0xd7   :  { %697 = vperm.xlu1 %5115, %v93_v11   ;;  %340 = vperm.xlu0 %5157, %v6032_v38  }
  0xd9   :  { %v6040_v61 = vpop.permute.xlu1 %335  ;;  %v6042_v2 = vpop.permute.xlu0 %729 }
  0xda   :  { %8779 = vst [vmem:[#allocation52_spill] sm:$0xff] %v6040_v61  ;;  %8780 = vst [vmem:[#allocation53_spill] sm:$0xff] %v6042_v2 }
  0xdb   :  { %5116 = vset.pattern.permute.xlu1 %v8781_v49  ;;  %350 = vperm.xlu0 %5157, %v5617_v16  }
  0xdc   :  { %957 = vperm.xlu1 %5116, %v5908_v10   ;;  %v6063_v10 = vld [vmem:[%s8703_s0 + $0x1b0] sm:$0xff] }
  0xdd   :  { %v6047_v55 = vpop.permute.xlu1 %345  ;;  %v6049_v1 = vpop.permute.xlu0 %609 }
  0xde   :  { %8782 = vst [vmem:[#allocation54_spill] sm:$0xff] %v6047_v55  ;;  %8783 = vst [vmem:[#allocation55_spill] sm:$0xff] %v6049_v1 }
  0xdf   :  { %360 = vperm.xlu0 %5157, %v93_v11  }
  0xe0   :  { %961 = vperm.xlu1 %5116, %v5593_v12  }
  0xe1   :  { %v6055_v61 = vpop.permute.xlu1 %355  ;;  %v6057_v2 = vpop.permute.xlu0 %737 }
  0xe2   :  { %8784 = vst [vmem:[#allocation56_spill] sm:$0xff] %v6055_v61  ;;  %8785 = vst [vmem:[#allocation57_spill] sm:$0xff] %v6057_v2 }
  0xe3   :  { %370 = vperm.xlu0 %5157, %v95_v46  }
  0xe4   :  { %5117 = vset.pattern.permute.xlu1 %v8766_v57 }
  0xe5   :  { %v6065_v55 = vpop.permute.xlu1 %365  ;;  %637 = vperm.xlu1 %5117, %v5667_v24   ;;  %v6068_v12 = vpop.permute.xlu0 %617 }
  0xe6   :  { %8786 = vst [vmem:[#allocation58_spill] sm:$0xff] %v6065_v55  ;;  %8787 = vst [vmem:[#allocation59_spill] sm:$0xff] %v6068_v12 }
  0xe7   :  { %380 = vperm.xlu0 %5157, %v6063_v10  }
  0xe9   :  { %v6071_v1 = vpop.permute.xlu1 %375  ;;  %5118 = vset.pattern.permute.xlu1 %v8781_v49  ;;  %v6074_v2 = vpop.permute.xlu0 %745 }
  0xea   :  { %8788 = vst [vmem:[#allocation60_spill] sm:$0xff] %v6074_v2  ;;  %897 = vperm.xlu1 %5118, %v5549_v4  }
  0xeb   :  { %390 = vperm.xlu0 %5157, %v5710_v31  }
  0xed   :  { %v6078_v61 = vpop.permute.xlu1 %385  ;;  %v6080_v54 = vpop.permute.xlu0 %1931 }
  0xee   :  { %8789 = vst [vmem:[#allocation61_spill] sm:$0xff] %v6080_v54  ;;  %1085 = vperm.xlu1 %5118, %v93_v11   ;;  %v6098_v11 = vld [vmem:[%s8703_s0 + $0x280] sm:$0xff] }
  0xef   :  { %400 = vperm.xlu0 %5157, %v5734_v35  }
  0xf1   :  { %v6083_v12 = vpop.permute.xlu1 %395  ;;  %v6085_v55 = vpop.permute.xlu0 %1867 }
  0xf2   :  { %8790 = vst [vmem:[#allocation62_spill] sm:$0xff] %v6083_v12  ;;  %8791 = vst [vmem:[#allocation63_spill] sm:$0xff] %v6085_v55  ;;  %1021 = vperm.xlu1 %5118, %v5655_v22   ;;  %v6110_v22 = vld [vmem:[%s8703_s0 + $0x200] sm:$0xff] }
  0xf3   :  { %410 = vperm.xlu0 %5157, %v5758_v39  }
  0xf5   :  { %v6089_v2 = vpop.permute.xlu1 %405  ;;  %v6091_v4 = vpop.permute.xlu0 %2055 }
  0xf6   :  { %8792 = vst [vmem:[#allocation64_spill] sm:$0xff] %v6089_v2  ;;  %8793 = vst [vmem:[#allocation65_spill] sm:$0xff] %v6091_v4  ;;  %5119 = vset.pattern.permute.xlu1 %v8766_v57 }
  0xf7   :  { %705 = vperm.xlu1 %5119, %v95_v46   ;;  %420 = vperm.xlu0 %5157, %v5772_v41  }
  0xf9   :  { %v6100_v54 = vpop.permute.xlu1 %415 }
  0xfa   :  { %8794 = vst [vmem:[#allocation66_spill] sm:$0xff] %v6100_v54  ;;  %v6102_v55 = vpop.permute.xlu0 %110  ;;  %v4424_v54 = vld [vmem:[%s8703_s0 + $0x308] sm:$0xff] }
  0xfb   :  { %8795 = vst [vmem:[#allocation67_spill] sm:$0xff] %v6102_v55  ;;  %5120 = vset.pattern.permute.xlu1 %v8781_v49  ;;  %1556 = vperm.xlu0 %5157, %v6098_v11  }
  0xfc   :  { %965 = vperm.xlu1 %5120, %v5919_v44  }
  0xfd   :  { %v6112_v4 = vpop.permute.xlu1 %425 }
  0xfe   :  { %8796 = vst [vmem:[#allocation68_spill] sm:$0xff] %v6112_v4  ;;  %v6114_v2 = vpop.permute.xlu0 %115  ;;  %v4410_v4 = vld [vmem:[%s8703_s0 + $0x298] sm:$0xff] }
  0xff   :  { %8797 = vst [vmem:[#allocation69_spill] sm:$0xff] %v6114_v2  ;;  %1476 = vperm.xlu0 %5157, %v6110_v22  }
 0x100   :  { %969 = vperm.xlu1 %5120, %v5600_v13  }
 0x102   :  { %v6121_v12 = vpop.permute.xlu1 %501  ;;  %v6123_v44 = vpop.permute.xlu0 %130 }
 0x103   :  { %8798 = vst [vmem:[#allocation70_spill] sm:$0xff] %v6121_v12  ;;  %8799 = vst [vmem:[#allocation71_spill] sm:$0xff] %v6123_v44  ;;  %1641 = vperm.xlu0 %5157, %v4424_v54   ;;  %v4394_v12 = vld [vmem:[%s8703_s0 + $0x218] sm:$0xff] }
 0x104   :  { %5121 = vset.pattern.permute.xlu1 %v8766_v57 }
 0x105   :  { %645 = vperm.xlu1 %5121, %v5681_v26  }
 0x106   :  { %v6130_v2 = vpop.permute.xlu1 %505  ;;  %v6132_v13 = vpop.permute.xlu0 %140 }
 0x107   :  { %8800 = vst [vmem:[#allocation72_spill] sm:$0xff] %v6130_v2  ;;  %8801 = vst [vmem:[#allocation73_spill] sm:$0xff] %v6132_v13  ;;  %1571 = vperm.xlu0 %5157, %v4410_v4   ;;  %v4442_v2 = vld [vmem:[%s8703_s0 + $0x398] sm:$0xff] }
 0x108   :  { %v4426_v13 = vld [vmem:[%s8703_s0 + $0x318] sm:$0xff] }
 0x109   :  { %5122 = vset.pattern.permute.xlu1 %v8781_v49 }
 0x10a   :  { %v6138_v54 = vpop.permute.xlu1 %513  ;;  %905 = vperm.xlu1 %5122, %v5556_v5   ;;  %v6141_v44 = vpop.permute.xlu0 %150 }
 0x10b   :  { %8802 = vst [vmem:[#allocation74_spill] sm:$0xff] %v6138_v54  ;;  %8803 = vst [vmem:[#allocation75_spill] sm:$0xff] %v6141_v44  ;;  %1491 = vperm.xlu0 %5157, %v4394_v12   ;;  %v4412_v12 = vld [vmem:[%s8703_s0 + $0x2a8] sm:$0xff] }
 0x10e   :  { %v6146_v55 = vpop.permute.xlu1 %521  ;;  %1093 = vperm.xlu1 %5122, %v95_v46   ;;  %v6148_v4 = vpop.permute.xlu0 %160 }
 0x10f   :  { %8804 = vst [vmem:[#allocation76_spill] sm:$0xff] %v6146_v55  ;;  %8805 = vst [vmem:[#allocation77_spill] sm:$0xff] %v6148_v4  ;;  %1731 = vperm.xlu0 %5157, %v4442_v2   ;;  %v4446_v4 = vld [vmem:[%s8703_s0 + $0x3b8] sm:$0xff] }
 0x112   :  { %v6153_v54 = vpop.permute.xlu1 %529  ;;  %1029 = vperm.xlu1 %5122, %v5672_v25   ;;  %v6156_v5 = vpop.permute.xlu0 %170  ;;  %v4396_v25 = vld [vmem:[%s8703_s0 + $0x228] sm:$0xff] }
 0x113   :  { %8806 = vst [vmem:[#allocation78_spill] sm:$0xff] %v6153_v54  ;;  %8807 = vst [vmem:[#allocation79_spill] sm:$0xff] %v6156_v5  ;;  %1651 = vperm.xlu0 %5157, %v4426_v13  }
 0x116   :  { %v6161_v44 = vpop.permute.xlu1 %537  ;;  %5123 = vset.pattern.permute.xlu1 %v8766_v57  ;;  %v6164_v2 = vpop.permute.xlu0 %180 }
 0x117   :  { %8808 = vst [vmem:[#allocation80_spill] sm:$0xff] %v6161_v44  ;;  %8809 = vst [vmem:[#allocation81_spill] sm:$0xff] %v6164_v2  ;;  %713 = vperm.xlu1 %5123, %v6063_v10   ;;  %1581 = vperm.xlu0 %5157, %v4412_v12   ;;  %v4444_v2 = vld [vmem:[%s8703_s0 + $0x3a8] sm:$0xff] }
 0x11a   :  { %v6170_v46 = vpop.permute.xlu1 %545  ;;  %v6172_v13 = vpop.permute.xlu0 %190 }
 0x11b   :  { %8810 = vst [vmem:[#allocation82_spill] sm:$0xff] %v6170_v46  ;;  %5124 = vset.pattern.permute.xlu1 %v8781_v49  ;;  %1501 = vperm.xlu0 %5157, %v4396_v25   ;;  %v4428_v46 = vld [vmem:[%s8703_s0 + $0x328] sm:$0xff] }
 0x11c   :  { %973 = vperm.xlu1 %5124, %v5930_v0   ;;  %v4414_v0 = vld [vmem:[%s8703_s0 + $0x2b8] sm:$0xff] }
 0x11e   :  { %v6179_v44 = vpop.permute.xlu1 %553  ;;  %v6181_v12 = vpop.permute.xlu0 %200 }
 0x11f   :  { %8811 = vst [vmem:[#allocation83_spill] sm:$0xff] %v6179_v44  ;;  %1741 = vperm.xlu0 %5157, %v4444_v2   ;;  %v4398_v44 = vld [vmem:[%s8703_s0 + $0x238] sm:$0xff] }
 0x120   :  { %977 = vperm.xlu1 %5124, %v5607_v14  }
 0x122   :  { %v6187_v5 = vpop.permute.xlu1 %561  ;;  %v6189_v25 = vpop.permute.xlu0 %210 }
 0x123   :  { %1661 = vperm.xlu0 %5157, %v4428_v46  }
 0x124   :  { %5125 = vset.pattern.permute.xlu1 %v8766_v57 }
 0x125   :  { %653 = vperm.xlu1 %5125, %v5693_v28  }
 0x126   :  { %v6196_v2 = vpop.permute.xlu1 %569  ;;  %v6198_v14 = vpop.permute.xlu0 %220 }
 0x127   :  { %8812 = vst [vmem:[#allocation84_spill] sm:$0xff] %v6198_v14  ;;  %1591 = vperm.xlu0 %5157, %v4414_v0  }
 0x129   :  { %5126 = vset.pattern.permute.xlu1 %v8781_v49 }
 0x12a   :  { %v6204_v46 = vpop.permute.xlu1 %577  ;;  %913 = vperm.xlu1 %5126, %v5563_v6   ;;  %v6207_v54 = vpop.permute.xlu0 %230  ;;  %v4430_v6 = vld [vmem:[%s8703_s0 + $0x338] sm:$0xff] }
 0x12b   :  { %8813 = vst [vmem:[#allocation85_spill] sm:$0xff] %v6207_v54  ;;  %1511 = vperm.xlu0 %5157, %v4398_v44  }
 0x12e   :  { %v6212_v55 = vpop.permute.xlu1 %585  ;;  %5127 = vset.pattern.permute.xlu1 %v8766_v57  ;;  %v6215_v0 = vpop.permute.xlu0 %240 }
 0x12f   :  { %8814 = vst [vmem:[#allocation86_spill] sm:$0xff] %v6212_v55  ;;  %8815 = vst [vmem:[#allocation87_spill] sm:$0xff] %v6215_v0  ;;  %597 = vperm.xlu1 %5127, %v5612_v15   ;;  %1751 = vperm.xlu0 %5157, %v4446_v4   ;;  %v4416_v0 = vld [vmem:[%s8703_s0 + $0x2c8] sm:$0xff] }
 0x130   :  { %v4400_v4 = vld [vmem:[%s8703_s0 + $0x248] sm:$0xff] }
 0x132   :  { %v6221_v14 = vpop.permute.xlu1 %593  ;;  %v6223_v44 = vpop.permute.xlu0 %250 }
 0x133   :  { %8816 = vst [vmem:[#allocation88_spill] sm:$0xff] %v6221_v14  ;;  %8817 = vst [vmem:[#allocation89_spill] sm:$0xff] %v6223_v44  ;;  %5128 = vset.pattern.permute.xlu1 %v8781_v49  ;;  %1671 = vperm.xlu0 %5157, %v4430_v6   ;;  %v4418_v14 = vld [vmem:[%s8703_s0 + $0x2d8] sm:$0xff] }
 0x134   :  { %1105 = vperm.xlu1 %5128, %v5686_v27   ;;  %v4448_v27 = vld [vmem:[%s8703_s0 + $0x3c8] sm:$0xff] }
 0x136   :  { %v6230_v54 = vpop.permute.xlu1 %693  ;;  %v6232_v15 = vpop.permute.xlu0 %260 }
 0x137   :  { %8818 = vst [vmem:[#allocation90_spill] sm:$0xff] %v6232_v15  ;;  %1601 = vperm.xlu0 %5157, %v4416_v0   ;;  %v4432_v15 = vld [vmem:[%s8703_s0 + $0x348] sm:$0xff] }
 0x138   :  { %1041 = vperm.xlu1 %5128, %v5693_v28  }
 0x13a   :  { %v6238_v44 = vpop.permute.xlu0 %270 }
 0x13b   :  { %v6240_v6 = vpop.permute.xlu1 %953  ;;  %1521 = vperm.xlu0 %5157, %v4400_v4  }
 0x13c   :  { %5129 = vset.pattern.permute.xlu1 %v8766_v57 }
 0x13d   :  { %725 = vperm.xlu1 %5129, %v5786_v43  }
 0x13e   :  { %v6247_v0 = vpop.permute.xlu0 %280 }
 0x13f   :  { %8819 = vst [vmem:[#allocation91_spill] sm:$0xff] %v6247_v0  ;;  %1761 = vperm.xlu0 %5157, %v4448_v27  }
 0x140   :  { %v6249_v28 = vpop.permute.xlu1 %625 }
 0x141   :  { %8820 = vst [vmem:[#allocation92_spill] sm:$0xff] %v6249_v28  ;;  %5130 = vset.pattern.permute.xlu1 %v8781_v49 }
 0x142   :  { %981 = vperm.xlu1 %5130, %v5941_v63   ;;  %v6256_v4 = vpop.permute.xlu0 %290  ;;  %v4402_v63 = vld [vmem:[%s8703_s0 + $0x258] sm:$0xff] }
 0x143   :  { %8821 = vst [vmem:[#allocation93_spill] sm:$0xff] %v6256_v4  ;;  %1681 = vperm.xlu0 %5157, %v4432_v15   ;;  %v4450_v4 = vld [vmem:[%s8703_s0 + $0x3d8] sm:$0xff] }
 0x145   :  { %v6261_v55 = vpop.permute.xlu1 %885 }
 0x146   :  { %5131 = vset.pattern.permute.xlu1 %v8766_v57  ;;  %v6264_v27 = vpop.permute.xlu0 %300 }
 0x147   :  { %8822 = vst [vmem:[#allocation94_spill] sm:$0xff] %v6264_v27  ;;  %657 = vperm.xlu1 %5131, %v5997_v60   ;;  %1611 = vperm.xlu0 %5157, %v4418_v14   ;;  %v4434_v14 = vld [vmem:[%s8703_s0 + $0x358] sm:$0xff] }
 0x149   :  { %v6270_v0 = vpop.permute.xlu1 %889 }
 0x14a   :  { %v6272_v15 = vpop.permute.xlu0 %310 }
 0x14b   :  { %8823 = vst [vmem:[#allocation95_spill] sm:$0xff] %v6272_v15  ;;  %661 = vperm.xlu1 %5131, %v5705_v30   ;;  %1531 = vperm.xlu0 %5157, %v4402_v63  }
 0x14d   :  { %v6278_v28 = vpop.permute.xlu1 %1081 }
 0x14e   :  { %v6280_v27 = vpop.permute.xlu0 %320 }
 0x14f   :  { %8824 = vst [vmem:[#allocation96_spill] sm:$0xff] %v6280_v27  ;;  %5132 = vset.pattern.permute.xlu1 %v8781_v49  ;;  %1771 = vperm.xlu0 %5157, %v4450_v4   ;;  %v4420_v27 = vld [vmem:[%s8703_s0 + $0x2e8] sm:$0xff] }
 0x150   :  { %921 = vperm.xlu1 %5132, %v5570_v7  }
 0x151   :  { %v6287_v15 = vpop.permute.xlu1 %1013 }
 0x152   :  { %8825 = vst [vmem:[#allocation97_spill] sm:$0xff] %v6287_v15  ;;  %v6289_v63 = vpop.permute.xlu0 %330  ;;  %v4404_v15 = vld [vmem:[%s8703_s0 + $0x268] sm:$0xff] }
 0x153   :  { %8826 = vst [vmem:[#allocation98_spill] sm:$0xff] %v6289_v63  ;;  %1691 = vperm.xlu0 %5157, %v4434_v14  }
 0x154   :  { %5133 = vset.pattern.permute.xlu1 %v8766_v57 }
 0x155   :  { %605 = vperm.xlu1 %5133, %v5624_v17   ;;  %v4452_v17 = vld [vmem:[%s8703_s0 + $0x3e8] sm:$0xff] }
 0x156   :  { %v6296_v4 = vpop.permute.xlu1 %697  ;;  %v6298_v7 = vpop.permute.xlu0 %340 }
 0x157   :  { %8827 = vst [vmem:[#allocation99_spill] sm:$0xff] %v6296_v4  ;;  %8828 = vst [vmem:[#allocation100_spill] sm:$0xff] %v6298_v7  ;;  %1621 = vperm.xlu0 %5157, %v4420_v27  }
 0x159   :  { %5134 = vset.pattern.permute.xlu1 %v8781_v49 }
 0x15a   :  { %1109 = vperm.xlu1 %5134, %v5710_v31   ;;  %v6305_v14 = vpop.permute.xlu0 %350  ;;  %v4436_v31 = vld [vmem:[%s8703_s0 + $0x368] sm:$0xff] }
 0x15b   :  { %v6307_v63 = vpop.permute.xlu1 %957  ;;  %1541 = vperm.xlu0 %5157, %v4404_v15  }
 0x15e   :  { %1045 = vperm.xlu1 %5134, %v5997_v60   ;;  %v6313_v27 = vpop.permute.xlu0 %360  ;;  %v4422_v60 = vld [vmem:[%s8703_s0 + $0x2f8] sm:$0xff] }
 0x15f   :  { %8829 = vst [vmem:[#allocation101_spill] sm:$0xff] %v6313_v27  ;;  %v6315_v7 = vpop.permute.xlu1 %961  ;;  %1781 = vperm.xlu0 %5157, %v4452_v17  }
 0x162   :  { %1049 = vperm.xlu1 %5134, %v5705_v30   ;;  %v6321_v4 = vpop.permute.xlu0 %370  ;;  %v4406_v30 = vld [vmem:[%s8703_s0 + $0x278] sm:$0xff] }
 0x163   :  { %8830 = vst [vmem:[#allocation102_spill] sm:$0xff] %v6321_v4  ;;  %1701 = vperm.xlu0 %5157, %v4436_v31  }
 0x164   :  { %v6323_v15 = vpop.permute.xlu1 %637 }
 0x165   :  { %8831 = vst [vmem:[#allocation103_spill] sm:$0xff] %v6323_v15 }
 0x166   :  { %5135 = vset.pattern.permute.xlu1 %v8766_v57  ;;  %v6329_v27 = vpop.permute.xlu0 %380 }
 0x167   :  { %8832 = vst [vmem:[#allocation104_spill] sm:$0xff] %v6329_v27  ;;  %733 = vperm.xlu1 %5135, %v5798_v45   ;;  %1631 = vperm.xlu0 %5157, %v4422_v60   ;;  %v4454_v27 = vld [vmem:[%s8703_s0 + $0x3f8] sm:$0xff] }
 0x169   :  { %v6335_v17 = vpop.permute.xlu1 %897 }
 0x16a   :  { %v6337_v31 = vpop.permute.xlu0 %390 }
 0x16b   :  { %8833 = vst [vmem:[#allocation105_spill] sm:$0xff] %v6337_v31  ;;  %5136 = vset.pattern.permute.xlu1 %v8781_v49  ;;  %1551 = vperm.xlu0 %5157, %v4406_v30   ;;  %v4438_v31 = vld [vmem:[%s8703_s0 + $0x378] sm:$0xff] }
 0x16c   :  { %989 = vperm.xlu1 %5136, %v5722_v33  }
 0x16d   :  { %v6344_v4 = vpop.permute.xlu1 %1085 }
 0x16e   :  { %8834 = vst [vmem:[#allocation106_spill] sm:$0xff] %v6344_v4  ;;  %v6346_v60 = vpop.permute.xlu0 %400 }
 0x16f   :  { %8835 = vst [vmem:[#allocation107_spill] sm:$0xff] %v6346_v60  ;;  %1791 = vperm.xlu0 %5157, %v4454_v27   ;;  %v5368_v27 = vld [vmem:[%s8703_s0 + $0x58] sm:$0xff] }
 0x170   :  { %5137 = vset.pattern.permute.xlu1 %v8766_v57 }
 0x171   :  { %665 = vperm.xlu1 %5137, %v6008_v58   ;;  %v6353_v30 = vpop.permute.xlu1 %1021 }
 0x172   :  { %v6355_v33 = vpop.permute.xlu0 %410 }
 0x173   :  { %8836 = vst [vmem:[#allocation108_spill] sm:$0xff] %v6355_v33  ;;  %1711 = vperm.xlu0 %5157, %v4438_v31  }
 0x175   :  { %669 = vperm.xlu1 %5137, %v5717_v32  }
 0x176   :  { %v6358_v15 = vpop.permute.xlu1 %705  ;;  %v6360_v4 = vpop.permute.xlu0 %420 }
 0x177   :  { %8837 = vst [vmem:[#allocation109_spill] sm:$0xff] %v6358_v15  ;;  %8838 = vst [vmem:[#allocation110_spill] sm:$0xff] %v6360_v4  ;;  %5245 = vset.pattern.permute.xlu0 %v8781_v49 }
 0x178   :  { %949 = vperm.xlu0 %5245, %v5897_v3  }
 0x179   :  { %5138 = vset.pattern.permute.xlu1 %v8781_v49 }
 0x17a   :  { %929 = vperm.xlu1 %5138, %v5368_v27   ;;  %v6368_v60 = vpop.permute.xlu0 %1556 }
 0x17b   :  { %8839 = vst [vmem:[#allocation111_spill] sm:$0xff] %v6368_v60  ;;  %v6370_v31 = vpop.permute.xlu1 %965 }
 0x17c   :  { %1077 = vperm.xlu0 %5245, %v5617_v16   ;;  %v5369_v16 = vld [vmem:[%s8703_s0 + $0x10] sm:$0xff] }
 0x17e   :  { %5139 = vset.pattern.permute.xlu1 %v8766_v57  ;;  %v6374_v4 = vpop.permute.xlu0 %1476 }
 0x17f   :  { %8840 = vst [vmem:[#allocation112_spill] sm:$0xff] %v6374_v4  ;;  %613 = vperm.xlu1 %5139, %v5636_v19   ;;  %v6377_v3 = vpop.permute.xlu1 %969 }
 0x180   :  { %1017 = vperm.xlu0 %5245, %v5629_v18  }
 0x182   :  { %v6380_v33 = vpop.permute.xlu0 %1641 }
 0x183   :  { %8841 = vst [vmem:[#allocation113_spill] sm:$0xff] %v6380_v33  ;;  %5140 = vset.pattern.permute.xlu1 %v8781_v49 }
 0x184   :  { %1117 = vperm.xlu1 %5140, %v5734_v35   ;;  %v6384_v27 = vpop.permute.xlu1 %645  ;;  %893 = vperm.xlu0 %5245, %v5369_v16  }
 0x185   :  { %8842 = vst [vmem:[#allocation114_spill] sm:$0xff] %v6384_v27  ;;  %v8910_v27 = vld [vmem:[#allocation31_spill] sm:$0xff] }
 0x186   :  { %v6389_v4 = vpop.permute.xlu0 %1571 }
 0x187   :  { %8843 = vst [vmem:[#allocation115_spill] sm:$0xff] %v6389_v4  ;;  %v8890_v4 = vld [vmem:[#allocation12_spill] sm:$0xff] }
 0x188   :  { %1053 = vperm.xlu1 %5140, %v6008_v58   ;;  %1089 = vperm.xlu0 %5245, %v5641_v20  }
 0x189   :  { %v6393_v18 = vpop.permute.xlu1 %905 }
 0x18a   :  { %v6395_v33 = vpop.permute.xlu0 %1491 }
 0x18b   :  { %8844 = vst [vmem:[#allocation116_spill] sm:$0xff] %v6395_v33  ;;  %v8889_v33 = vld [vmem:[#allocation11_spill] sm:$0xff] }
 0x18c   :  { %1057 = vperm.xlu1 %5140, %v5717_v32   ;;  %1025 = vperm.xlu0 %5245, %v5667_v24  }
 0x18d   :  { %v6399_v35 = vpop.permute.xlu1 %1093 }
 0x18e   :  { %8845 = vst [vmem:[#allocation117_spill] sm:$0xff] %v6399_v35  ;;  %v6401_v60 = vpop.permute.xlu0 %1731 }
 0x18f   :  { %8846 = vst [vmem:[#allocation118_spill] sm:$0xff] %v6401_v60 }
 0x190   :  { %5141 = vset.pattern.permute.xlu1 %v8766_v57  ;;  %901 = vperm.xlu0 %5245, %v5830_v50  }
 0x191   :  { %741 = vperm.xlu1 %5141, %v5810_v47   ;;  %v6406_v58 = vpop.permute.xlu1 %1029 }
 0x192   :  { %8847 = vst [vmem:[#allocation119_spill] sm:$0xff] %v6406_v58  ;;  %v6408_v20 = vpop.permute.xlu0 %1651 }
 0x193   :  { %8848 = vst [vmem:[#allocation120_spill] sm:$0xff] %v6408_v20  ;;  %v8888_v20 = vld [vmem:[#allocation10_spill] sm:$0xff] }
 0x194   :  { %1097 = vperm.xlu0 %5245, %v5660_v23  }
 0x195   :  { %5142 = vset.pattern.permute.xlu1 %v8781_v49 }
 0x196   :  { %997 = vperm.xlu1 %5142, %v5746_v37   ;;  %v6413_v24 = vpop.permute.xlu1 %713  ;;  %v6415_v32 = vpop.permute.xlu0 %1581 }
 0x197   :  { %8849 = vst [vmem:[#allocation121_spill] sm:$0xff] %v6413_v24  ;;  %8850 = vst [vmem:[#allocation122_spill] sm:$0xff] %v6415_v32  ;;  %v8906_v24 = vld [vmem:[#allocation27_spill] sm:$0xff] }
 0x198   :  { %1033 = vperm.xlu0 %5245, %v5681_v26   ;;  %v5370_v26 = vld [vmem:[%s8703_s0 + $0x68] sm:$0xff] }
 0x19a   :  { %5143 = vset.pattern.permute.xlu1 %v8766_v57  ;;  %v6419_v50 = vpop.permute.xlu0 %1501 }
 0x19b   :  { %8851 = vst [vmem:[#allocation123_spill] sm:$0xff] %v6419_v50  ;;  %673 = vperm.xlu1 %5143, %v6019_v9   ;;  %v6422_v16 = vpop.permute.xlu1 %973 }
 0x19c   :  { %8852 = vst [vmem:[#allocation124_spill] sm:$0xff] %v6422_v16  ;;  %909 = vperm.xlu0 %5245, %v5842_v53   ;;  %v8914_v16 = vld [vmem:[#allocation40_spill] sm:$0xff] }
 0x19e   :  { %v6425_v23 = vpop.permute.xlu0 %1741 }
 0x19f   :  { %8853 = vst [vmem:[#allocation125_spill] sm:$0xff] %v6425_v23  ;;  %677 = vperm.xlu1 %5143, %v5729_v34   ;;  %v6428_v37 = vpop.permute.xlu1 %977 }
 0x1a0   :  { %8854 = vst [vmem:[#allocation126_spill] sm:$0xff] %v6428_v37  ;;  %1101 = vperm.xlu0 %5245, %v6063_v10   ;;  %v5371_v10 = vld [vmem:[%s8703_s0 + $0xc8] sm:$0xff] }
 0x1a2   :  { %v6431_v32 = vpop.permute.xlu0 %1661 }
 0x1a3   :  { %8855 = vst [vmem:[#allocation127_spill] sm:$0xff] %v6431_v32  ;;  %5144 = vset.pattern.permute.xlu1 %v8781_v49 }
 0x1a4   :  { %937 = vperm.xlu1 %5144, %v5370_v26   ;;  %v6437_v50 = vpop.permute.xlu1 %653  ;;  %1037 = vperm.xlu0 %5245, %v5698_v29  }
 0x1a5   :  { %8856 = vst [vmem:[#allocation128_spill] sm:$0xff] %v6437_v50  ;;  %v8905_v50 = vld [vmem:[#allocation26_spill] sm:$0xff] }
 0x1a6   :  { %v6440_v53 = vpop.permute.xlu0 %1591 }
 0x1a7   :  { %8857 = vst [vmem:[#allocation129_spill] sm:$0xff] %v6440_v53 }
 0x1a8   :  { %5145 = vset.pattern.permute.xlu1 %v8766_v57  ;;  %985 = vperm.xlu0 %5245, %v5371_v10  }
 0x1a9   :  { %621 = vperm.xlu1 %5145, %v5648_v21   ;;  %v6447_v32 = vpop.permute.xlu1 %913 }
 0x1aa   :  { %8858 = vst [vmem:[#allocation130_spill] sm:$0xff] %v6447_v32  ;;  %v6449_v23 = vpop.permute.xlu0 %1511  ;;  %v8909_v32 = vld [vmem:[#allocation30_spill] sm:$0xff] }
 0x1ab   :  { %8859 = vst [vmem:[#allocation131_spill] sm:$0xff] %v6449_v23 }
 0x1ac   :  { %917 = vperm.xlu0 %5245, %v5853_v56   ;;  %v5372_v56 = vld [vmem:[%s8703_s0 + $0xd8] sm:$0xff] }
 0x1ad   :  { %5146 = vset.pattern.permute.xlu1 %v8781_v49 }
 0x1ae   :  { %1125 = vperm.xlu1 %5146, %v5758_v39   ;;  %v6454_v29 = vpop.permute.xlu1 %597  ;;  %v6456_v26 = vpop.permute.xlu0 %1751 }
 0x1af   :  { %8860 = vst [vmem:[#allocation132_spill] sm:$0xff] %v6454_v29  ;;  %8861 = vst [vmem:[#allocation133_spill] sm:$0xff] %v6456_v26 }
 0x1b0   :  { %1113 = vperm.xlu0 %5245, %v5786_v43  }
 0x1b2   :  { %1061 = vperm.xlu1 %5146, %v6019_v9   ;;  %v6460_v10 = vpop.permute.xlu0 %1671 }
 0x1b3   :  { %8862 = vst [vmem:[#allocation134_spill] sm:$0xff] %v6460_v10  ;;  %v6462_v53 = vpop.permute.xlu1 %1105 }
 0x1b4   :  { %8863 = vst [vmem:[#allocation135_spill] sm:$0xff] %v6462_v53  ;;  %993 = vperm.xlu0 %5245, %v5372_v56   ;;  %v8908_v53 = vld [vmem:[#allocation29_spill] sm:$0xff] }
 0x1b6   :  { %1065 = vperm.xlu1 %5146, %v5729_v34   ;;  %v6468_v39 = vpop.permute.xlu0 %1601 }
 0x1b7   :  { %8864 = vst [vmem:[#allocation136_spill] sm:$0xff] %v6468_v39  ;;  %v6470_v23 = vpop.permute.xlu1 %1041 }
 0x1b8   :  { %8865 = vst [vmem:[#allocation137_spill] sm:$0xff] %v6470_v23  ;;  %925 = vperm.xlu0 %5245, %v5864_v59   ;;  %v8903_v23 = vld [vmem:[#allocation24_spill] sm:$0xff] }
 0x1ba   :  { %5147 = vset.pattern.permute.xlu1 %v8766_v57  ;;  %v6474_v43 = vpop.permute.xlu0 %1521 }
 0x1bb   :  { %8866 = vst [vmem:[#allocation138_spill] sm:$0xff] %v6474_v43  ;;  %749 = vperm.xlu1 %5147, %v5818_v48   ;;  %v8880_v43 = vmov 0  }
 0x1bc   :  { %v6477_v9 = vpop.permute.xlu1 %725  ;;  %1121 = vperm.xlu0 %5245, %v5798_v45  }
 0x1bd   :  { %8867 = vst [vmem:[#allocation139_spill] sm:$0xff] %v6477_v9 }
 0x1be   :  { %v6480_v10 = vpop.permute.xlu0 %1761 }
 0x1bf   :  { %8868 = vst [vmem:[#allocation140_spill] sm:$0xff] %v6480_v10  ;;  %5148 = vset.pattern.permute.xlu1 %v8781_v49 }
 0x1c0   :  { %1005 = vperm.xlu1 %5148, %v5765_v40   ;;  %1001 = vperm.xlu0 %5245, %v5636_v19  }
 0x1c1   :  { %v6485_v34 = vpop.permute.xlu1 %981 }
 0x1c2   :  { %8869 = vst [vmem:[#allocation141_spill] sm:$0xff] %v6485_v34  ;;  %v6487_v59 = vpop.permute.xlu0 %1681 }
 0x1c3   :  { %8870 = vst [vmem:[#allocation142_spill] sm:$0xff] %v6487_v59 }
 0x1c4   :  { %5149 = vset.pattern.permute.xlu1 %v8766_v57  ;;  %933 = vperm.xlu0 %5245, %v5875_v62   ;;  %v5373_v62 = vld [vmem:[%s8703_s0 + $0x78] sm:$0xff] }
 0x1c5   :  { %681 = vperm.xlu1 %5149, %v6032_v38  }
 0x1c6   :  { %v6492_v56 = vpop.permute.xlu1 %657  ;;  %v6494_v45 = vpop.permute.xlu0 %1611 }
 0x1c7   :  { %8871 = vst [vmem:[#allocation143_spill] sm:$0xff] %v6492_v56  ;;  %8872 = vst [vmem:[#allocation144_spill] sm:$0xff] %v6494_v45  ;;  %v428_v45 = vlaneseq }
 0x1c8   :  { %1129 = vperm.xlu0 %5245, %v5810_v47  }
 0x1c9   :  { %685 = vperm.xlu1 %5149, %v5741_v36  }
 0x1ca   :  { %v6498_v40 = vpop.permute.xlu1 %661  ;;  %v6500_v19 = vpop.permute.xlu0 %1531 }
 0x1cb   :  { %8873 = vst [vmem:[#allocation145_spill] sm:$0xff] %v6498_v40  ;;  %8874 = vst [vmem:[#allocation146_spill] sm:$0xff] %v6500_v19  ;;  %v6515_v19 = vshrl.u32 %v428_v45, 7 }
 0x1cc   :  { %1009 = vperm.xlu0 %5245, %v5648_v21  }
 0x1cd   :  { %5150 = vset.pattern.permute.xlu1 %v8781_v49  ;;  %8878 = vst [vmem:[#allocation150_spill] sm:$0xff] %v6515_v19  ;;  %v8729_v37 = vsub.s32 2, %v6515_v19 }
 0x1ce   :  { %945 = vperm.xlu1 %5150, %v5373_v62   ;;  %v6507_v59 = vpop.permute.xlu0 %1771 }
 0x1cf   :  { %8875 = vst [vmem:[#allocation147_spill] sm:$0xff] %v6507_v59  ;;  %v6509_v10 = vpop.permute.xlu1 %921  ;;  %v6524_v59 = vsub.s32 0, %v6515_v19 }
 0x1d0   :  { %8876 = vst [vmem:[#allocation148_spill] sm:$0xff] %v6509_v10  ;;  %941 = vperm.xlu0 %5245, %v5886_v8   ;;  %v6533_v8 = vsub.s32 1, %v6515_v19  ;;  %v8937_v19 = vld [vmem:[#allocation45_spill] sm:$0xff] }
 0x1d1   :  { %8882 = vst [vmem:[#allocation153_spill] sm:$0xff] %v6524_v59 }
 0x1d2   :  { %1137 = vperm.xlu1 %5150, %v5818_v48   ;;  %v6513_v47 = vpop.permute.xlu0 %1691  ;;  %v6530_v48 = vld [vmem:[%s8704_s1] sm:$0x7]  ;;  %8883 = vst [vmem:[#allocation154_spill] sm:$0xff] %v6533_v8 }
 0x1d3   :  { %8877 = vst [vmem:[#allocation149_spill] sm:$0xff] %v6513_v47 }
 0x1d4   :  { %v6517_v21 = vpop.permute.xlu1 %605  ;;  %1133 = vperm.xlu0 %5245, %v5772_v41  }
 0x1d5   :  { %8879 = vst [vmem:[#allocation151_spill] sm:$0xff] %v6517_v21  ;;  %v8893_v21 = vld [vmem:[#allocation14_spill] sm:$0xff] }
 0x1d6   :  { %5151 = vset.pattern.permute.xlu1 %v8880_v43  ;;  %v6521_v62 = vpop.permute.xlu0 %1621 }
 0x1d7   :  { %8881 = vst [vmem:[#allocation152_spill] sm:$0xff] %v6521_v62  ;;  %1561 = vperm.xlu1 %5151, %v5779_v42   ;;  %v6542_v62 = vrot.slane %v6530_v48, %v6524_v59  ;;  %v6547_v42 = vrot.slane %v6530_v48, %v6533_v8  ;;  %v8891_v8 = vld [vmem:[#allocation13_spill] sm:$0xff] }
 0x1d8   :  { %2315 = vperm.xlu0 %5245, %v6098_v11  }
 0x1d9   :  { %v6536_v41 = vpop.permute.xlu1 %1109  ;;  %v6561_v26 = vmul.f32 %v6547_v42, %v5834_v52  ;;  %v435_v60 = vmul.f32 %v6542_v62, %v8888_v20  ;;  %v437_v59 = vmul.f32 %v6542_v62, %v8890_v4  ;;  %v439_v52 = vmul.f32 %v6542_v62, %v8893_v21  ;;  %v8895_v20 = vld [vmem:[#allocation16_spill] sm:$0xff] }
 0x1da   :  { %8884 = vst [vmem:[#allocation155_spill] sm:$0xff] %v6536_v41  ;;  %v6538_v45 = vpop.permute.xlu0 %1541  ;;  %v441_v41 = vmul.f32 %v6542_v62, %v8895_v20  ;;  %v8900_v21 = vld [vmem:[#allocation20_spill] sm:$0xff] }
 0x1db   :  { %8885 = vst [vmem:[#allocation156_spill] sm:$0xff] %v6538_v45  ;;  %5152 = vset.pattern.permute.xlu1 %v8766_v57  ;;  %v6557_v45 = vmul.f32 %v6542_v62, %v5832_v51  ;;  %v8892_v51 = vld [vmem:[#allocation9_spill] sm:$0xff]  ;;  %v445_v29 = vmul.f32 %v6542_v62, %v8900_v21 }
 0x1dc   :  { %1927 = vperm.xlu1 %5152, %v6098_v11   ;;  %2251 = vperm.xlu0 %5245, %v6110_v22   ;;  %v759_v11 = vmul.f32 %v6547_v42, %v8889_v33  ;;  %v8896_v33 = vld [vmem:[#allocation17_spill] sm:$0xff] }
 0x1dd   :  { %v6551_v47 = vpop.permute.xlu1 %1045  ;;  %v765_v56 = vmul.f32 %v6547_v42, %v8896_v33  ;;  %v449_v33 = vmul.f32 %v6542_v62, %v8903_v23  ;;  %v6605_v21 = vld [vmem:[%s8703_s0 + $0x300] sm:$0xff]  ;;  %v777_v23 = vmul.f32 %v6547_v42, %v8908_v53  ;;  %v8913_v53 = vld [vmem:[#allocation35_spill] sm:$0xff] }
 0x1de   :  { %8886 = vst [vmem:[#allocation157_spill] sm:$0xff] %v6551_v47  ;;  %v6553_v39 = vpop.permute.xlu0 %1781  ;;  %v8894_v47 = vld [vmem:[#allocation15_spill] sm:$0xff] }
 0x1df   :  { %8887 = vst [vmem:[#allocation158_spill] sm:$0xff] %v6553_v39  ;;  %v761_v39 = vmul.f32 %v6547_v42, %v8891_v8  ;;  %v763_v9 = vmul.f32 %v6547_v42, %v8894_v47  ;;  %v8898_v8 = vld [vmem:[#allocation18_spill] sm:$0xff]  ;;  %v8901_v47 = vld [vmem:[#allocation21_spill] sm:$0xff]  ;;  %v6622_v15 = vadd.f32 %v765_v56, %v441_v41 }
 0x1e0   :  { %5153 = vset.pattern.permute.xlu1 %v8781_v49  ;;  %2443 = vperm.xlu0 %5245, %v8892_v51   ;;  %v443_v40 = vmul.f32 %v6542_v62, %v8898_v8  ;;  %v8899_v51 = vld [vmem:[#allocation19_spill] sm:$0xff]  ;;  %v769_v34 = vmul.f32 %v6547_v42, %v8901_v47  ;;  %v451_v8 = vmul.f32 %v6542_v62, %v8905_v50  ;;  %v8907_v47 = vld [vmem:[#allocation28_spill] sm:$0xff] }
 0x1e1   :  { %1069 = vperm.xlu1 %5153, %v6032_v38   ;;  %v6582_v4 = vpop.permute.xlu1 %1049  ;;  %v767_v10 = vmul.f32 %v6547_v42, %v8899_v51  ;;  %v8904_v38 = vld [vmem:[#allocation25_spill] sm:$0xff]  ;;  %v775_v51 = vmul.f32 %v6547_v42, %v8906_v24  ;;  %v779_v50 = vmul.f32 %v6547_v42, %v8910_v27  ;;  %v6616_v24 = vadd.f32 %v759_v11, %v435_v60 }
 0x1e2   :  { %8897 = vst [vmem:[#allocation10_spill] sm:$0xff] %v6582_v4  ;;  %v6592_v20 = vpop.permute.xlu0 %1701  ;;  %v773_v4 = vmul.f32 %v6547_v42, %v8904_v38  ;;  %v455_v38 = vmul.f32 %v6542_v62, %v8909_v32  ;;  %v6618_v58 = vadd.f32 %v761_v39, %v437_v59  ;;  %v6620_v35 = vadd.f32 %v763_v9, %v439_v52  ;;  %v8918_v59 = vld [vmem:[#allocation22_spill] sm:$0xff] }
 0x1e3   :  { %8902 = vst [vmem:[#allocation11_spill] sm:$0xff] %v6592_v20  ;;  %v453_v20 = vmul.f32 %v6542_v62, %v8907_v47  ;;  %8911 = vst [vmem:[#allocation12_spill] sm:$0xff] %v6622_v15  ;;  %v6625_v47 = vadd.f32 %v767_v10, %v443_v40  ;;  %v789_v32 = vmul.f32 %v6547_v42, %v8913_v53  ;;  %v8924_v53 = vld [vmem:[#allocation33_spill] sm:$0xff]  ;;  %v8952_v15 = vld [vmem:[#allocation52_spill] sm:$0xff] }
 0x1e4   :  { %2379 = vperm.xlu0 %5245, %v6605_v21   ;;  %v465_v27 = vmul.f32 %v6542_v62, %v8914_v16  ;;  %v6636_v9 = vadd.f32 %v769_v34, %v445_v29  ;;  %v6640_v56 = vmul.f32 %v6542_v62, %v8918_v59  ;;  %v6646_v40 = vadd.f32 %v773_v4, %v449_v33  ;;  %v6651_v16 = vld [vmem:[%s8703_s0 + $0x290] sm:$0xff]  ;;  %v8925_v33 = vld [vmem:[#allocation34_spill] sm:$0xff] }
 0x1e5   :  { %1073 = vperm.xlu1 %5153, %v5741_v36   ;;  %8912 = vst [vmem:[#allocation13_spill] sm:$0xff] %v6625_v47  ;;  %v8920_v36 = vld [vmem:[#allocation23_spill] sm:$0xff]  ;;  %v6653_v41 = vadd.f32 %v775_v51, %v451_v8  ;;  %v6655_v11 = vadd.f32 %v777_v23, %v453_v20  ;;  %v6657_v29 = vadd.f32 %v779_v50, %v455_v38  ;;  %v8922_v34 = vld [vmem:[#allocation32_spill] sm:$0xff]  ;;  %v8929_v51 = vld [vmem:[#allocation37_spill] sm:$0xff] }
 0x1e6   :  { %v6632_v60 = vpop.permute.xlu1 %733  ;;  %v6634_v39 = vpop.permute.xlu0 %1631  ;;  %8917 = vst [vmem:[#allocation15_spill] sm:$0xff] %v6636_v9  ;;  %8919 = vst [vmem:[#allocation16_spill] sm:$0xff] %v6640_v56  ;;  %v6644_v10 = vmul.f32 %v6547_v42, %v8920_v36  ;;  %v6661_v52 = vmul.f32 %v6542_v62, %v8922_v34  ;;  %v6666_v4 = vmul.f32 %v6547_v42, %v8924_v53  ;;  %v8927_v8 = vld [vmem:[#allocation36_spill] sm:$0xff]  ;;  %v8930_v38 = vld [vmem:[#allocation39_spill] sm:$0xff] }
 0x1e7   :  { %8915 = vst [vmem:[#allocation9_spill] sm:$0xff] %v6632_v60  ;;  %8916 = vst [vmem:[#allocation14_spill] sm:$0xff] %v6634_v39  ;;  %v6670_v59 = vmul.f32 %v6542_v62, %v8925_v33  ;;  %v6674_v20 = vmul.f32 %v6542_v62, %v8927_v8  ;;  %v807_v23 = vmul.f32 %v6547_v42, %v8929_v51  ;;  %v8931_v34 = vld [vmem:[#allocation41_spill] sm:$0xff]  ;;  %v8932_v8 = vld [vmem:[#allocation8_spill] sm:$0xff] }
 0x1e8   :  { %8921 = vst [vmem:[#allocation17_spill] sm:$0xff] %v6644_v10  ;;  %8923 = vst [vmem:[#allocation18_spill] sm:$0xff] %v6661_v52  ;;  %2323 = vperm.xlu0 %5245, %v6651_v16   ;;  %v6681_v50 = vmul.f32 %v6547_v42, %v8930_v38  ;;  %v6683_v36 = vadd.f32 %v789_v32, %v465_v27  ;;  %v809_v53 = vmul.f32 %v6547_v42, %v8931_v34  ;;  %v8934_v51 = vld [vmem:[#allocation42_spill] sm:$0xff]  ;;  %v8935_v38 = vld [vmem:[#allocation43_spill] sm:$0xff] }
 0x1e9   :  { %8926 = vst [vmem:[#allocation19_spill] sm:$0xff] %v6670_v59  ;;  %8928 = vst [vmem:[#allocation20_spill] sm:$0xff] %v6674_v20  ;;  %5154 = vset.pattern.permute.xlu1 %v8880_v43  ;;  %v6690_v33 = vrot.slane %v6530_v48, %v8729_v37  ;;  %v6697_v10 = vmul.f32 %v6542_v62, %v8934_v51  ;;  %v6701_v32 = vmul.f32 %v6547_v42, %v8935_v38  ;;  %v8936_v27 = vld [vmem:[#allocation44_spill] sm:$0xff]  ;;  %v8940_v51 = vld [vmem:[#allocation46_spill] sm:$0xff] }
 0x1ea   :  { %1481 = vperm.xlu1 %5154, %v8932_v8   ;;  %v6693_v39 = vpop.permute.xlu0 %1551  ;;  %v6705_v34 = vmul.f32 %v6542_v62, %v8936_v27  ;;  %v811_v48 = vmul.f32 %v6547_v42, %v8937_v19  ;;  %v6714_v8 = vld [vmem:[%s8703_s0 + $0x210] sm:$0xff]  ;;  %v8943_v27 = vld [vmem:[#allocation58_spill] sm:$0xff]  ;;  %v485_v19 = vmul.f32 %v6542_v62, %v6071_v1  ;;  %v8946_v47 = vld [vmem:[#allocation49_spill] sm:$0xff]  ;;  %v6747_v1 = vmul.f32 %v6542_v62, %v8952_v15 }
 0x1eb   :  { %8933 = vst [vmem:[#allocation21_spill] sm:$0xff] %v6693_v39  ;;  %v6709_v37 = vpop.permute.xlu1 %989  ;;  %8939 = vst [vmem:[#allocation25_spill] sm:$0xff] %v6714_v8  ;;  %v6718_v39 = vmul.f32 %v6542_v62, %v8940_v51  ;;  %v8941_v38 = vld [vmem:[#allocation47_spill] sm:$0xff]  ;;  %v483_v9 = vmul.f32 %v6542_v62, %v8943_v27  ;;  %v8944_v20 = vld [vmem:[#allocation48_spill] sm:$0xff]  ;;  %v6735_v51 = vmul.f32 %v6547_v42, %v8946_v47 }
 0x1ec   :  { %8938 = vst [vmem:[#allocation24_spill] sm:$0xff] %v6709_v37  ;;  %v6722_v56 = vmul.f32 %v6547_v42, %v8941_v38  ;;  %2259 = vperm.xlu0 %5245, %v6714_v8   ;;  %v6731_v60 = vmul.f32 %v6542_v62, %v8944_v20  ;;  %v8948_v59 = vld [vmem:[#allocation50_spill] sm:$0xff]  ;;  %v8950_v37 = vld [vmem:[#allocation51_spill] sm:$0xff]  ;;  %8953 = vst [vmem:[#allocation31_spill] sm:$0xff] %v6747_v1  ;;  %v487_v47 = vmul.f32 %v6542_v62, %v6078_v61 }
 0x1ed   :  { %8947 = vst [vmem:[#allocation28_spill] sm:$0xff] %v6735_v51  ;;  %v6739_v38 = vmul.f32 %v6542_v62, %v8948_v59  ;;  %v6743_v27 = vmul.f32 %v6547_v42, %v8950_v37  ;;  %v8954_v8 = vld [vmem:[#allocation53_spill] sm:$0xff]  ;;  %v8958_v37 = vld [vmem:[#allocation55_spill] sm:$0xff]  ;;  %v8960_v15 = vld [vmem:[#allocation56_spill] sm:$0xff] }
 0x1ee   :  { %8942 = vst [vmem:[#allocation26_spill] sm:$0xff] %v6722_v56  ;;  %8945 = vst [vmem:[#allocation27_spill] sm:$0xff] %v6731_v60  ;;  %v6751_v20 = vmul.f32 %v6547_v42, %v8954_v8  ;;  %v8956_v60 = vld [vmem:[#allocation67_spill] sm:$0xff]  ;;  %5155 = vset.pattern.permute.xlu1 %v8766_v57  ;;  %v6758_v59 = vpop.permute.xlu0 %1791  ;;  %v481_v1 = vmul.f32 %v6542_v62, %v8960_v15  ;;  %v8961_v52 = vld [vmem:[#allocation69_spill] sm:$0xff]  ;;  %v774_v56 = vmul.f32 %v6547_v42, %v6196_v2 }
 0x1ef   :  { %8949 = vst [vmem:[#allocation29_spill] sm:$0xff] %v6739_v38  ;;  %8951 = vst [vmem:[#allocation30_spill] sm:$0xff] %v6743_v27  ;;  %v432_v51 = vmul.f32 %v6542_v62, %v8956_v60  ;;  %v6762_v38 = vmul.f32 %v6547_v42, %v8958_v37  ;;  %v433_v8 = vmul.f32 %v6542_v62, %v8961_v52  ;;  %1863 = vperm.xlu1 %5155, %v6110_v22   ;;  %v6774_v60 = vld [vmem:[%s8703_s0 + $0x390] sm:$0xff] }
 0x1f0   :  { %8955 = vst [vmem:[#allocation35_spill] sm:$0xff] %v6751_v20  ;;  %8957 = vst [vmem:[#allocation40_spill] sm:$0xff] %v6758_v59  ;;  %v8962_v20 = vld [vmem:[#allocation70_spill] sm:$0xff]  ;;  %v8964_v59 = vld [vmem:[#allocation57_spill] sm:$0xff]  ;;  %v6786_v52 = vadd.f32 %v809_v53, %v485_v19  ;;  %2451 = vperm.xlu0 %5245, %v6774_v60   ;;  %v450_v22 = vmul.f32 %v6542_v62, %v6181_v12  ;;  %v805_v2 = vmul.f32 %v6547_v42, %v6230_v54 }
 0x1f1   :  { %8959 = vst [vmem:[#allocation22_spill] sm:$0xff] %v6762_v38  ;;  %v757_v61 = vmul.f32 %v6547_v42, %v8962_v20  ;;  %8963 = vst [vmem:[#allocation23_spill] sm:$0xff] %v6774_v60  ;;  %v6778_v37 = vmul.f32 %v6547_v42, %v8964_v59  ;;  %v6780_v38 = vadd.f32 %v807_v23, %v483_v9  ;;  %v8965_v15 = vld [vmem:[#allocation59_spill] sm:$0xff]  ;;  %v6788_v20 = vpop.permute.xlu1 %665  ;;  %v8967_v19 = vld [vmem:[#allocation72_spill] sm:$0xff] }
 0x1f2   :  { %v6784_v27 = vmul.f32 %v6547_v42, %v8965_v15  ;;  %v1161_v9 = vmul.f32 %v6690_v33, %v6240_v6  ;;  %v1145_v23 = vmul.f32 %v6690_v33, %v6270_v0  ;;  %v6799_v59 = vadd.f32 %v811_v48, %v487_v47  ;;  %v6806_v12 = vpop.permute.xlu0 %1711 }
 0x1f3   :  { %v820_v53 = vadd.f32 %v6561_v26, %v432_v51  ;;  %v758_v15 = vmul.f32 %v6547_v42, %v8967_v19  ;;  %v821_v60 = vadd.f32 %v757_v61, %v433_v8  ;;  %v1144_v6 = vmul.f32 %v6690_v33, %v6261_v55  ;;  %5156 = vset.pattern.permute.xlu1 %v8880_v43  ;;  %v6818_v26 = vld [vmem:[%s8703_s0 + $0x310] sm:$0xff] }
 0x1f4   :  { %8966 = vst [vmem:[#allocation32_spill] sm:$0xff] %v6784_v27  ;;  %v1163_v27 = vmul.f32 %v6690_v33, %v6315_v7  ;;  %v1162_v0 = vmul.f32 %v6690_v33, %v6307_v63  ;;  %v8968_v7 = vld [vmem:[#allocation71_spill] sm:$0xff]  ;;  %v448_v54 = vmul.f32 %v6542_v62, %v6172_v13  ;;  %v772_v55 = vmul.f32 %v6547_v42, %v6187_v5  ;;  %v5374_v63 = vld [vmem:[%s8703_s0 + $0x380] sm:$0xff] }
 0x1f5   :  { %v6822_v48 = vmul.f32 %v6542_v62, %v8968_v7  ;;  %1716 = vperm.xlu1 %5156, %v5374_v63   ;;  %v6831_v51 = vpop.permute.xlu1 %669  ;;  %2387 = vperm.xlu0 %5245, %v6818_v26   ;;  %v838_v47 = vadd.f32 %v774_v56, %v450_v22  ;;  %v1225_v8 = vadd.f32 %v1161_v9, %v6646_v40  ;;  %v6840_v5 = vld [vmem:[%s8703_s0 + $0x388] sm:$0xff]  ;;  %v6852_v40 = vld [vmem:[%s8705_s2] ss:$0 sm:$0xff] }
 0x1f6   :  { %v1209_v61 = vadd.f32 %v1145_v23, %v821_v60  ;;  %v1193_v19 = vmul.f32 %v6690_v33, %v6278_v28  ;;  %v6843_v13 = vadd.f32 %v758_v15, %v6557_v45  ;;  %v452_v7 = vmul.f32 %v6542_v62, %v6189_v25  ;;  %v4411_v25 = vld [vmem:[%s8703_s0 + $0x2a0] sm:$0xff] }
 0x1f7   :  { %v480_v56 = vmul.f32 %v6542_v62, %v6305_v14  ;;  %v1227_v28 = vadd.f32 %v1163_v27, %v6653_v41  ;;  %v776_v60 = vmul.f32 %v6547_v42, %v6204_v46  ;;  %v869_v22 = vadd.f32 %v805_v2, %v481_v1  ;;  %v950_v23 = vpop.permute.xlu0 %949  ;;  %v8969_v41 = vld [vmem:[#allocation92_spill] sm:$0xff] }
 0x1f8   :  { %v1208_v9 = vadd.f32 %v1144_v6, %v820_v53  ;;  %v1226_v45 = vadd.f32 %v1162_v0, %v838_v47  ;;  %v836_v15 = vadd.f32 %v772_v55, %v448_v54  ;;  %v464_v14 = vmul.f32 %v6542_v62, %v6238_v44  ;;  %v8970_v6 = vld [vmem:[#allocation84_spill] sm:$0xff] }
 0x1f9   :  { %v1160_v63 = vmul.f32 %v6690_v33, %v950_v23  ;;  %1721 = vperm.xlu1 %5156, %v6840_v5   ;;  %2331 = vperm.xlu0 %5245, %v4411_v25   ;;  %v788_v46 = vmul.f32 %v6547_v42, %v8969_v41  ;;  %v1257_v27 = vadd.f32 %v1193_v19, %v869_v22  ;;  %v6866_v1 = vpop.permute.xlu1 %929  ;;  %v8971_v23 = vld [vmem:[#allocation97_spill] sm:$0xff] }
 0x1fa   :  { %v1296_v53 = vadd.f32 %v6852_v40, %v1225_v8  ;;  %v1280_v2 = vadd.f32 %v6852_v40, %v1209_v61  ;;  %v454_v0 = vmul.f32 %v6542_v62, %v8970_v6  ;;  %v868_v44 = vadd.f32 %v6666_v4, %v480_v56  ;;  %v4395_v8 = vld [vmem:[%s8703_s0 + $0x220] sm:$0xff] }
 0x1fb   :  { %v1298_v54 = vadd.f32 %v6852_v40, %v1227_v28  ;;  %v1224_v55 = vadd.f32 %v1160_v63, %v836_v15  ;;  %v840_v47 = vadd.f32 %v776_v60, %v452_v7  ;;  %v1176_v25 = vmul.f32 %v6690_v33, %v8971_v23  ;;  %v1078_v22 = vpop.permute.xlu0 %1077  ;;  %v8972_v61 = vld [vmem:[#allocation86_spill] sm:$0xff] }
 0x1fc   :  { %v1297_v19 = vadd.f32 %v6852_v40, %v1226_v45  ;;  %v1279_v41 = vadd.f32 %v6852_v40, %v1208_v9  ;;  %v778_v6 = vmul.f32 %v6547_v42, %v8972_v61  ;;  %v1192_v4 = vmul.f32 %v6690_v33, %v1078_v22 }
 0x1fd   :  { %5158 = vset.pattern.permute.xlu1 %v8766_v57  ;;  %v1295_v7 = vadd.f32 %v6852_v40, %v1224_v55  ;;  %2267 = vperm.xlu0 %5245, %v4395_v8   ;;  %v852_v56 = vadd.f32 %v788_v46, %v464_v14  ;;  %v1360_v28 = vmax.f32 %v1296_v53, 0.0  ;;  %v1344_v60 = vmax.f32 %v1280_v2, 0.0 }
 0x1fe   :  { %2059 = vperm.xlu1 %5158, %v6840_v5   ;;  %v1328_v9 = vadd.f32 %v6852_v40, %v1257_v27  ;;  %v1165_v45 = vmul.f32 %v6690_v33, %v6377_v3  ;;  %v1256_v15 = vadd.f32 %v1192_v4, %v868_v44  ;;  %v6890_v63 = vpop.permute.xlu1 %613  ;;  %v1362_v22 = vmax.f32 %v1298_v54, 0.0  ;;  %v8973_v44 = vld [vmem:[#allocation91_spill] sm:$0xff] }
 0x1ff   :  { %v1359_v23 = vmax.f32 %v1295_v7, 0.0  ;;  %v1240_v61 = vadd.f32 %v1176_v25, %v852_v56  ;;  %v1147_v55 = vmul.f32 %v6690_v33, %v6335_v17  ;;  %v1018_v8 = vpop.permute.xlu0 %1017  ;;  %v1343_v14 = vmax.f32 %v1279_v41, 0.0  ;;  %v8974_v7 = vld [vmem:[#allocation101_spill] sm:$0xff] }
 0x200   :  { %v1361_v46 = vmax.f32 %v1297_v19, 0.0  ;;  %v1164_v53 = vmul.f32 %v6690_v33, %v6370_v31  ;;  %v1177_v27 = vmul.f32 %v6690_v33, %v1018_v8  ;;  %v1327_v3 = vadd.f32 %v6852_v40, %v1256_v15  ;;  %v5375_v31 = vld [vmem:[%s8703_s0 + $0x288] sm:$0xff] }
 0x201   :  { %v4973_v2 = vpack.c.bf16 %v1360_v28, %v1359_v23  ;;  %v466_v4 = vmul.f32 %v6542_v62, %v8973_v44  ;;  %v482_v54 = vmul.f32 %v6542_v62, %v8974_v7  ;;  %v4975_v17 = vpack.c.bf16 %v1344_v60, %v1343_v14  ;;  %v8975_v15 = vld [vmem:[#allocation99_spill] sm:$0xff]  ;;  %v8976_v44 = vld [vmem:[#allocation106_spill] sm:$0xff] }
 0x202   :  { %5159 = vset.pattern.permute.xlu1 %v8781_v49  ;;  %v1392_v25 = vmax.f32 %v1328_v9, 0.0  ;;  %v1229_v19 = vadd.f32 %v1165_v45, %v6655_v11  ;;  %v1241_v41 = vadd.f32 %v1177_v27, %v6683_v36  ;;  %v4977_v56 = vpack.c.bf16 %v1362_v22, %v1361_v46  ;;  %v8977_v27 = vld [vmem:[#allocation74_spill] sm:$0xff] }
 0x203   :  { %2319 = vperm.xlu1 %5159, %v5375_v31   ;;  %4974 = vmatprep.subr.bf16.mxu0 %v4973_v2  ;;  %v1391_v28 = vmax.f32 %v1327_v3, 0.0  ;;  %v806_v23 = vmul.f32 %v6547_v42, %v8975_v15  ;;  %v1211_v8 = vadd.f32 %v1147_v55, %v6616_v24  ;;  %v1194_v60 = vmul.f32 %v6690_v33, %v8976_v44  ;;  %v6913_v9 = vpop.permute.xlu1 %1117  ;;  %v894_v11 = vpop.permute.xlu0 %893  ;;  %v8980_v15 = vld [vmem:[#allocation126_spill] sm:$0xff] }
 0x204   :  { %4976 = vmatpush3.bf16.msra.mxu0 %v4975_v17  ;;  %v1311_v36 = vadd.f32 %v6852_v40, %v1240_v61  ;;  %v1228_v45 = vadd.f32 %v1164_v53, %v840_v47  ;;  %v1146_v14 = vmul.f32 %v6690_v33, %v894_v11  ;;  %v1312_v46 = vadd.f32 %v6852_v40, %v1241_v41  ;;  %v8978_v53 = vld [vmem:[#allocation103_spill] sm:$0xff]  ;;  %v8981_v44 = vld [vmem:[#allocation102_spill] sm:$0xff] }
 0x205   :  { %4978 = vmatprep.subr.bf16.mxu0 %v4977_v56  ;;  %v5005_v22 = vpack.c.bf16 %v1392_v25, %v1391_v28  ;;  %v760_v2 = vmul.f32 %v6547_v42, %v8977_v27  ;;  %v854_v24 = vadd.f32 %v6681_v50, %v466_v4  ;;  %v870_v55 = vadd.f32 %v806_v23, %v482_v54 }
 0x206   :  { %v1178_v3 = vmul.f32 %v6690_v33, %v6353_v30  ;;  %v842_v7 = vadd.f32 %v778_v6, %v454_v0  ;;  %v1300_v17 = vadd.f32 %v6852_v40, %v1229_v19  ;;  %v1210_v47 = vadd.f32 %v1146_v14, %v6843_v13  ;;  %v8979_v6 = vld [vmem:[#allocation93_spill] sm:$0xff] }
 0x207   :  { %5160 = vset.pattern.permute.xlu1 %v8880_v43  ;;  %5006 = vmatprep.subr.bf16.mxu1 %v5005_v22  ;;  %v1376_v61 = vmax.f32 %v1312_v46, 0.0  ;;  %v791_v25 = vmul.f32 %v6547_v42, %v8978_v53  ;;  %v1282_v41 = vadd.f32 %v6852_v40, %v1211_v8  ;;  %v1258_v31 = vadd.f32 %v1194_v60, %v870_v55  ;;  %v6930_v50 = vpop.permute.xlu1 %1053  ;;  %v1090_v30 = vpop.permute.xlu0 %1089  ;;  %v8982_v46 = vld [vmem:[#allocation124_spill] sm:$0xff] }
 0x208   :  { %1636 = vperm.xlu1 %5160, %v6605_v21   ;;  %v1375_v0 = vmax.f32 %v1311_v36, 0.0  ;;  %v468_v4 = vmul.f32 %v6542_v62, %v8979_v6  ;;  %v1299_v13 = vadd.f32 %v6852_v40, %v1228_v45  ;;  %v1281_v54 = vadd.f32 %v6852_v40, %v1210_v47 }
 0x209   :  { %v1195_v19 = vmul.f32 %v6690_v33, %v1090_v30  ;;  %v1242_v56 = vadd.f32 %v1178_v3, %v854_v24  ;;  %v1149_v28 = vmul.f32 %v6690_v33, %v6393_v18  ;;  %v1167_v23 = vmul.f32 %v6690_v33, %v8980_v15  ;;  %v8983_v3 = vld [vmem:[#allocation109_spill] sm:$0xff] }
 0x20a   :  { %v5007_v8 = vpack.c.bf16 %v1376_v61, %v1375_v0  ;;  %v484_v60 = vmul.f32 %v6542_v62, %v8981_v44  ;;  %v1345_v36 = vmax.f32 %v1281_v54, 0.0  ;;  %v1364_v14 = vmax.f32 %v1300_v17, 0.0  ;;  %v6959_v61 = vld [vmem:[%s8703_s0 + $0x3a0] sm:$0xff] }
 0x20b   :  { %v1259_v11 = vadd.f32 %v1195_v19, %v6780_v38  ;;  %v855_v45 = vadd.f32 %v791_v25, %v6697_v10  ;;  %v1329_v22 = vadd.f32 %v6852_v40, %v1258_v31  ;;  %v1166_v27 = vmul.f32 %v6690_v33, %v8982_v46  ;;  %v6949_v18 = vpop.permute.xlu1 %1057  ;;  %v1026_v24 = vpop.permute.xlu0 %1025  ;;  %2459 = vperm.xlu0 %5245, %v6959_v61   ;;  %v8984_v30 = vld [vmem:[#allocation117_spill] sm:$0xff]  ;;  %v8987_v46 = vld [vmem:[#allocation64_spill] sm:$0xff] }
 0x20c   :  { %5008 = vmatpush3.bf16.msra.mxu1 %v5007_v8  ;;  %5161 = vset.pattern.permute.xlu1 %v8766_v57  ;;  %v1346_v55 = vmax.f32 %v1282_v41, 0.0  ;;  %v808_v47 = vmul.f32 %v6547_v42, %v8983_v3  ;;  %v1179_v17 = vmul.f32 %v6690_v33, %v1026_v24  ;;  %v1363_v10 = vmax.f32 %v1299_v13, 0.0  ;;  %v8988_v24 = vld [vmem:[#allocation73_spill] sm:$0xff] }
 0x20d   :  { %v1330_v38 = vadd.f32 %v6852_v40, %v1259_v11  ;;  %1991 = vperm.xlu1 %5161, %v6605_v21   ;;  %v1313_v53 = vadd.f32 %v6852_v40, %v1242_v56  ;;  %v1213_v25 = vadd.f32 %v1149_v28, %v6618_v58  ;;  %v1231_v41 = vadd.f32 %v1167_v23, %v6657_v29  ;;  %v6974_v23 = vld [vmem:[%s8703_s0 + $0x308] sm:$0xff] }
 0x20e   :  { %v4979_v31 = vpack.c.bf16 %v1346_v55, %v1345_v36  ;;  %v1196_v0 = vmul.f32 %v6690_v33, %v8984_v30  ;;  %v1243_v6 = vadd.f32 %v1179_v17, %v855_v45  ;;  %v4981_v21 = vpack.c.bf16 %v1364_v14, %v1363_v10  ;;  %v8986_v45 = vld [vmem:[#allocation62_spill] sm:$0xff] }
 0x20f   :  { %v1394_v13 = vmax.f32 %v1330_v38, 0.0  ;;  %v824_v54 = vadd.f32 %v760_v2, %v6822_v48  ;;  %v856_v19 = vadd.f32 %v6701_v32, %v468_v4  ;;  %v1230_v15 = vadd.f32 %v1166_v27, %v842_v7  ;;  %v902_v56 = vpop.permute.xlu0 %901  ;;  %v8989_v38 = vld [vmem:[#allocation114_spill] sm:$0xff] }
 0x210   :  { %4980 = vmatpush3.bf16.msra.mxu0 %v4979_v31  ;;  %v1393_v8 = vmax.f32 %v1329_v22, 0.0  ;;  %v872_v58 = vadd.f32 %v808_v47, %v484_v60  ;;  %v1314_v29 = vadd.f32 %v6852_v40, %v1243_v6  ;;  %v1148_v28 = vmul.f32 %v6690_v33, %v902_v56  ;;  %v6977_v48 = vpop.permute.xlu1 %741  ;;  %v8985_v60 = vld [vmem:[#allocation119_spill] sm:$0xff]  ;;  %v8991_v30 = vld [vmem:[#allocation130_spill] sm:$0xff] }
 0x211   :  { %4982 = vmatprep.subr.bf16.mxu0 %v4981_v21  ;;  %1995 = vperm.xlu1 %5161, %v6974_v23   ;;  %v1284_v32 = vadd.f32 %v6852_v40, %v1213_v25  ;;  %v1302_v2 = vadd.f32 %v6852_v40, %v1231_v41  ;;  %v1377_v4 = vmax.f32 %v1313_v53, 0.0  ;;  %v1180_v11 = vmul.f32 %v6690_v33, %v8985_v60  ;;  %v8990_v41 = vld [vmem:[#allocation76_spill] sm:$0xff]  ;;  %v5377_v6 = vld [vmem:[%s8703_s0 + $0x208] sm:$0xff]  ;;  %v8994_v60 = vld [vmem:[#allocation77_spill] sm:$0xff] }
 0x212   :  { %v5009_v7 = vpack.c.bf16 %v1394_v13, %v1393_v8  ;;  %v1260_v44 = vadd.f32 %v1196_v0, %v872_v58  ;;  %v1212_v36 = vadd.f32 %v1148_v28, %v824_v54  ;;  %v1378_v14 = vmax.f32 %v1314_v29, 0.0  ;;  %v8992_v29 = vld [vmem:[#allocation66_spill] sm:$0xff] }
 0x213   :  { %v6985_v22 = vmul.f32 %v6542_v62, %v8986_v45  ;;  %v6989_v27 = vmul.f32 %v6542_v62, %v8987_v46  ;;  %v438_v55 = vmul.f32 %v6542_v62, %v8988_v24  ;;  %v1301_v3 = vadd.f32 %v6852_v40, %v1230_v15  ;;  %v1098_v47 = vpop.permute.xlu0 %1097  ;;  %v8995_v46 = vld [vmem:[#allocation135_spill] sm:$0xff] }
 0x214   :  { %5010 = vmatprep.subr.bf16.mxu1 %v5009_v7  ;;  %v793_v17 = vmul.f32 %v6547_v42, %v8989_v38  ;;  %v1283_v10 = vadd.f32 %v6852_v40, %v1212_v36  ;;  %v1197_v53 = vmul.f32 %v6690_v33, %v1098_v47  ;;  %v5011_v25 = vpack.c.bf16 %v1378_v14, %v1377_v4  ;;  %v8993_v7 = vld [vmem:[#allocation75_spill] sm:$0xff] }
 0x215   :  { %5162 = vset.pattern.permute.xlu1 %v8781_v49  ;;  %v762_v31 = vmul.f32 %v6547_v42, %v8990_v41  ;;  %v1151_v0 = vmul.f32 %v6690_v33, %v8991_v30  ;;  %v7006_v21 = vpop.permute.xlu1 %997  ;;  %v1348_v13 = vmax.f32 %v1284_v32, 0.0  ;;  %v1366_v54 = vmax.f32 %v1302_v2, 0.0  ;;  %v8998_v41 = vld [vmem:[#allocation104_spill] sm:$0xff]  ;;  %v8999_v30 = vld [vmem:[#allocation121_spill] sm:$0xff] }
 0x216   :  { %2255 = vperm.xlu1 %5162, %v5377_v6   ;;  %v1331_v15 = vadd.f32 %v6852_v40, %v1260_v44  ;;  %v1244_v56 = vadd.f32 %v1180_v11, %v856_v19  ;;  %v1261_v8 = vadd.f32 %v1197_v53, %v6786_v52  ;;  %5012 = vmatpush3.bf16.msra.mxu1 %v5011_v25  ;;  %v1347_v58 = vmax.f32 %v1283_v10, 0.0  ;;  %v8996_v53 = vld [vmem:[#allocation78_spill] sm:$0xff] }
 0x217   :  { %v7012_v28 = vmul.f32 %v6542_v62, %v8992_v29  ;;  %v7016_v4 = vmul.f32 %v6542_v62, %v8993_v7  ;;  %v7020_v36 = vmul.f32 %v6542_v62, %v8994_v60  ;;  %v1034_v32 = vpop.permute.xlu0 %1033  ;;  %v1365_v2 = vmax.f32 %v1301_v3, 0.0  ;;  %v9001_v29 = vld [vmem:[#allocation80_spill] sm:$0xff]  ;;  %v9002_v60 = vld [vmem:[#allocation94_spill] sm:$0xff] }
 0x218   :  { %v857_v19 = vadd.f32 %v793_v17, %v6705_v34  ;;  %v1332_v52 = vadd.f32 %v6852_v40, %v1261_v8  ;;  %v1181_v44 = vmul.f32 %v6690_v33, %v1034_v32  ;;  %v4983_v11 = vpack.c.bf16 %v1348_v13, %v1347_v58  ;;  %v2775_v13 = vld [vmem:[%s8706_s3 + $0x8] sm:$0xff] }
 0x219   :  { %v826_v14 = vadd.f32 %v762_v31, %v438_v55  ;;  %v1215_v45 = vadd.f32 %v1151_v0, %v6620_v35  ;;  %v1199_v24 = vmul.f32 %v6690_v33, %v8995_v46  ;;  %v4985_v47 = vpack.c.bf16 %v1366_v54, %v1365_v2  ;;  %v8997_v35 = vld [vmem:[#allocation79_spill] sm:$0xff]  ;;  %v9000_v54 = vld [vmem:[#allocation128_spill] sm:$0xff]  ;;  %2862 = vmatprep.mubr.f32.mxu0 %v2775_v13 }
 0x21a   :  { %5163 = vset.pattern.permute.xlu1 %v8880_v43  ;;  %v1315_v38 = vadd.f32 %v6852_v40, %v1244_v56  ;;  %v1245_v10 = vadd.f32 %v1181_v44, %v857_v19  ;;  %v7031_v34 = vpop.permute.xlu1 %673  ;;  %4984 = vmatpush3.bf16.msra.mxu0 %v4983_v11  ;;  %v1395_v3 = vmax.f32 %v1331_v15, 0.0  ;;  %v1396_v17 = vmax.f32 %v1332_v52, 0.0  ;;  %v9003_v52 = vld [vmem:[#allocation137_spill] sm:$0xff] }
 0x21b   :  { %1566 = vperm.xlu1 %5163, %v6651_v16   ;;  %v764_v55 = vmul.f32 %v6547_v42, %v8996_v53  ;;  %v444_v25 = vmul.f32 %v6542_v62, %v8997_v35  ;;  %v486_v31 = vmul.f32 %v6542_v62, %v8998_v41  ;;  %v810_v0 = vmul.f32 %v6547_v42, %v8999_v30  ;;  %v910_v6 = vpop.permute.xlu0 %909  ;;  %v9005_v53 = vld [vmem:[#allocation85_spill] sm:$0xff] }
 0x21c   :  { %4986 = vmatprep.subr.bf16.mxu0 %v4985_v47  ;;  %v795_v15 = vmul.f32 %v6547_v42, %v9000_v54  ;;  %v1316_v56 = vadd.f32 %v6852_v40, %v1245_v10  ;;  %v1150_v8 = vmul.f32 %v6690_v33, %v910_v6  ;;  %v5013_v58 = vpack.c.bf16 %v1396_v17, %v1395_v3  ;;  %v9004_v3 = vld [vmem:[#allocation82_spill] sm:$0xff]  ;;  %v9007_v54 = vld [vmem:[#allocation87_spill] sm:$0xff] }
 0x21d   :  { %v766_v7 = vmul.f32 %v6547_v42, %v9001_v29  ;;  %v470_v32 = vmul.f32 %v6542_v62, %v9002_v60  ;;  %v1286_v2 = vadd.f32 %v6852_v40, %v1215_v45  ;;  %v1263_v19 = vadd.f32 %v1199_v24, %v6799_v59  ;;  %v9006_v45 = vld [vmem:[#allocation88_spill] sm:$0xff]  ;;  %v7069_v41 = vld [vmem:[%s8703_s0 + $0x320] sm:$0xff] }
 0x21e   :  { %v1183_v44 = vmul.f32 %v6690_v33, %v9003_v52  ;;  %v1214_v11 = vadd.f32 %v1150_v8, %v826_v14  ;;  %v7057_v46 = vpop.permute.xlu1 %677  ;;  %5014 = vmatprep.subr.bf16.mxu1 %v5013_v58  ;;  %v1379_v47 = vmax.f32 %v1315_v38, 0.0  ;;  %v1380_v10 = vmax.f32 %v1316_v56, 0.0  ;;  %2395 = vperm.xlu0 %5245, %v7069_v41   ;;  %v9009_v29 = vld [vmem:[#allocation141_spill] sm:$0xff] }
 0x21f   :  { %5164 = vset.pattern.permute.xlu1 %v8766_v57  ;;  %v768_v17 = vmul.f32 %v6547_v42, %v9004_v3  ;;  %v456_v35 = vmul.f32 %v6542_v62, %v9005_v53  ;;  %v780_v59 = vmul.f32 %v6547_v42, %v9006_v45  ;;  %v874_v24 = vadd.f32 %v810_v0, %v486_v31  ;;  %v1102_v14 = vpop.permute.xlu0 %1101  ;;  %v9008_v0 = vld [vmem:[#allocation26_spill] sm:$0xff]  ;;  %v9013_v45 = vld [vmem:[#allocation148_spill] sm:$0xff] }
 0x220   :  { %1935 = vperm.xlu1 %5164, %v6651_v16   ;;  %v859_v38 = vadd.f32 %v795_v15, %v6718_v39  ;;  %v1285_v30 = vadd.f32 %v6852_v40, %v1214_v11  ;;  %v1198_v6 = vmul.f32 %v6690_v33, %v1102_v14  ;;  %v5015_v13 = vpack.c.bf16 %v1380_v10, %v1379_v47  ;;  %v9010_v10 = vld [vmem:[#allocation132_spill] sm:$0xff] }
 0x221   :  { %v458_v31 = vmul.f32 %v6542_v62, %v9007_v54  ;;  %v858_v16 = vadd.f32 %v9008_v0, %v470_v32  ;;  %v1334_v56 = vadd.f32 %v6852_v40, %v1263_v19  ;;  %v1350_v8 = vmax.f32 %v1286_v2, 0.0  ;;  %v7092_v2 = vld [vmem:[%s8703_s0 + $0x298] sm:$0xff]  ;;  %v9015_v54 = vld [vmem:[#allocation95_spill] sm:$0xff] }
 0x222   :  { %v1247_v58 = vadd.f32 %v1183_v44, %v859_v38  ;;  %v1168_v60 = vmul.f32 %v6690_v33, %v9009_v29  ;;  %v1262_v39 = vadd.f32 %v1198_v6, %v874_v24  ;;  %5016 = vmatpush3.bf16.msra.mxu1 %v5015_v13  ;;  %v1349_v15 = vmax.f32 %v1285_v30, 0.0  ;;  %v9017_v29 = vld [vmem:[#allocation145_spill] sm:$0xff] }
 0x223   :  { %v828_v52 = vadd.f32 %v764_v55, %v7016_v4  ;;  %v7083_v11 = vadd.f32 %v766_v7, %v7020_v36  ;;  %v7085_v47 = vadd.f32 %v768_v17, %v444_v25  ;;  %v781_v32 = vmul.f32 %v6547_v42, %v9010_v10  ;;  %v7095_v19 = vpop.permute.xlu1 %937  ;;  %v1038_v44 = vpop.permute.xlu0 %1037  ;;  %v9011_v25 = vld [vmem:[#allocation30_spill] sm:$0xff]  ;;  %v9012_v17 = vld [vmem:[#allocation105_spill] sm:$0xff] }
 0x224   :  { %1939 = vperm.xlu1 %5164, %v7092_v2   ;;  %v844_v3 = vadd.f32 %v780_v59, %v456_v35  ;;  %v1333_v4 = vadd.f32 %v6852_v40, %v1262_v39  ;;  %v1182_v36 = vmul.f32 %v6690_v33, %v1038_v44  ;;  %v4987_v55 = vpack.c.bf16 %v1350_v8, %v1349_v15  ;;  %v9014_v59 = vld [vmem:[#allocation89_spill] sm:$0xff]  ;;  %v9018_v15 = vld [vmem:[#allocation143_spill] sm:$0xff] }
 0x225   :  { %v846_v7 = vadd.f32 %v9011_v25, %v458_v31  ;;  %v488_v53 = vmul.f32 %v6542_v62, %v9012_v17  ;;  %v1153_v24 = vmul.f32 %v6690_v33, %v9013_v45  ;;  %v1398_v14 = vmax.f32 %v1334_v56, 0.0  ;;  %v9016_v31 = vld [vmem:[#allocation18_spill] sm:$0xff] }
 0x226   :  { %v1318_v38 = vadd.f32 %v6852_v40, %v1247_v58  ;;  %v1232_v30 = vadd.f32 %v1168_v60, %v844_v3  ;;  %v1246_v6 = vadd.f32 %v1182_v36, %v858_v16  ;;  %4988 = vmatpush3.bf16.msra.mxu0 %v4987_v55  ;;  %v1397_v35 = vmax.f32 %v1333_v4, 0.0  ;;  %v9019_v3 = vld [vmem:[#allocation28_spill] sm:$0xff]  ;;  %v9021_v55 = vld [vmem:[#allocation155_spill] sm:$0xff]  ;;  %v9022_v17 = vld [vmem:[#allocation10_spill] sm:$0xff] }
 0x227   :  { %v460_v13 = vmul.f32 %v6542_v62, %v9014_v59  ;;  %v472_v0 = vmul.f32 %v6542_v62, %v9015_v54  ;;  %v845_v8 = vadd.f32 %v781_v32, %v9016_v31  ;;  %v797_v39 = vmul.f32 %v6547_v42, %v9017_v29  ;;  %v986_v56 = vpop.permute.xlu0 %985  ;;  %v9020_v4 = vld [vmem:[#allocation12_spill] sm:$0xff] }
 0x228   :  { %5165 = vset.pattern.permute.xlu1 %v8781_v49  ;;  %v796_v58 = vmul.f32 %v6547_v42, %v9018_v15  ;;  %v1317_v16 = vadd.f32 %v6852_v40, %v1246_v6  ;;  %v1169_v60 = vmul.f32 %v6690_v33, %v986_v56  ;;  %v7118_v10 = vpop.permute.xlu1 %621  ;;  %v5017_v44 = vpack.c.bf16 %v1398_v14, %v1397_v35  ;;  %v9024_v14 = vld [vmem:[#allocation139_spill] sm:$0xff]  ;;  %v9026_v56 = vld [vmem:[#allocation157_spill] sm:$0xff] }
 0x229   :  { %2447 = vperm.xlu1 %5165, %v6840_v5   ;;  %v876_v32 = vadd.f32 %v9019_v3, %v488_v53  ;;  %v1217_v36 = vadd.f32 %v1153_v24, %v9020_v4  ;;  %v1200_v25 = vmul.f32 %v6690_v33, %v9021_v55  ;;  %v1185_v45 = vmul.f32 %v6690_v33, %v9022_v17  ;;  %v9023_v5 = vld [vmem:[#allocation107_spill] sm:$0xff] }
 0x22a   :  { %v1303_v59 = vadd.f32 %v6852_v40, %v1232_v30  ;;  %v1233_v6 = vadd.f32 %v1169_v60, %v845_v8  ;;  %5018 = vmatprep.subr.bf16.mxu1 %v5017_v44  ;;  %v1381_v54 = vmax.f32 %v1317_v16, 0.0  ;;  %v1382_v31 = vmax.f32 %v1318_v38, 0.0  ;;  %v9025_v35 = vld [vmem:[#allocation27_spill] sm:$0xff]  ;;  %v9027_v44 = vld [vmem:[#allocation24_spill] sm:$0xff] }
 0x22b   :  { %v490_v29 = vmul.f32 %v6542_v62, %v9023_v5  ;;  %v813_v53 = vmul.f32 %v6547_v42, %v9024_v14  ;;  %v861_v24 = vadd.f32 %v797_v39, %v9025_v35  ;;  %v1184_v15 = vmul.f32 %v6690_v33, %v9026_v56  ;;  %v918_v3 = vpop.permute.xlu0 %917  ;;  %v9028_v39 = vld [vmem:[#allocation25_spill] sm:$0xff]  ;;  %v9029_v14 = vld [vmem:[#allocation22_spill] sm:$0xff]  ;;  %v9030_v56 = vld [vmem:[#allocation96_spill] sm:$0xff] }
 0x22c   :  { %v860_v4 = vadd.f32 %v796_v58, %v472_v0  ;;  %v1304_v55 = vadd.f32 %v6852_v40, %v1233_v6  ;;  %v1152_v30 = vmul.f32 %v6690_v33, %v918_v3  ;;  %v5019_v38 = vpack.c.bf16 %v1382_v31, %v1381_v54 }
 0x22d   :  { %5166 = vset.pattern.permute.xlu1 %v8880_v43  ;;  %v1288_v8 = vadd.f32 %v6852_v40, %v1217_v36  ;;  %v1264_v16 = vadd.f32 %v1200_v25, %v876_v32  ;;  %v1249_v60 = vadd.f32 %v1185_v45, %v861_v24  ;;  %v1170_v17 = vmul.f32 %v6690_v33, %v9027_v44  ;;  %v7141_v5 = vpop.permute.xlu1 %1125  ;;  %v9031_v36 = vld [vmem:[#allocation35_spill] sm:$0xff] }
 0x22e   :  { %1486 = vperm.xlu1 %5166, %v9028_v39   ;;  %v7144_v0 = vadd.f32 %v9029_v14, %v460_v13  ;;  %v1216_v58 = vadd.f32 %v1152_v30, %v828_v52  ;;  %5020 = vmatpush3.bf16.msra.mxu1 %v5019_v38  ;;  %v1367_v6 = vmax.f32 %v1303_v59, 0.0  ;;  %v1368_v35 = vmax.f32 %v1304_v55, 0.0  ;;  %v9032_v25 = vld [vmem:[#allocation151_spill] sm:$0xff] }
 0x22f   :  { %v474_v54 = vmul.f32 %v6542_v62, %v9030_v56  ;;  %v878_v32 = vadd.f32 %v9031_v36, %v490_v29  ;;  %v783_v45 = vmul.f32 %v6547_v42, %v9032_v25  ;;  %v1248_v31 = vadd.f32 %v1184_v15, %v860_v4  ;;  %v1114_v24 = vpop.permute.xlu0 %1113  ;;  %v9034_v25 = vld [vmem:[#allocation29_spill] sm:$0xff] }
 0x230   :  { %v877_v3 = vadd.f32 %v813_v53, %v6985_v22  ;;  %v1287_v44 = vadd.f32 %v6852_v40, %v1216_v58  ;;  %v1201_v13 = vmul.f32 %v6690_v33, %v1114_v24  ;;  %v4989_v52 = vpack.c.bf16 %v1368_v35, %v1367_v6 }
 0x231   :  { %v1335_v59 = vadd.f32 %v6852_v40, %v1264_v16  ;;  %v1320_v55 = vadd.f32 %v6852_v40, %v1249_v60  ;;  %v1234_v30 = vadd.f32 %v1170_v17, %v846_v7  ;;  %v7157_v29 = vpop.permute.xlu1 %1061  ;;  %v1352_v38 = vmax.f32 %v1288_v8, 0.0  ;;  %v7167_v7 = vld [vmem:[%s8703_s0 + $0x2b0] sm:$0xff] }
 0x232   :  { %5167 = vset.pattern.permute.xlu1 %v8766_v57  ;;  %v799_v15 = vmul.f32 %v6547_v42, %v6831_v51  ;;  %v1155_v22 = vmul.f32 %v6690_v33, %v6866_v1  ;;  %v1265_v53 = vadd.f32 %v1201_v13, %v877_v3  ;;  %4990 = vmatprep.subr.bf16.mxu0 %v4989_v52  ;;  %v1351_v4 = vmax.f32 %v1287_v44, 0.0  ;;  %v9033_v16 = vld [vmem:[#allocation19_spill] sm:$0xff]  ;;  %v9036_v13 = vld [vmem:[#allocation9_spill] sm:$0xff] }
 0x233   :  { %1871 = vperm.xlu1 %5167, %v9028_v39   ;;  %v847_v60 = vadd.f32 %v783_v45, %v9033_v16  ;;  %v1319_v8 = vadd.f32 %v6852_v40, %v1248_v31  ;;  %v798_v51 = vmul.f32 %v6547_v42, %v6788_v20  ;;  %v1202_v1 = vmul.f32 %v6690_v33, %v6913_v9  ;;  %v994_v17 = vpop.permute.xlu0 %993  ;;  %v9035_v31 = vld [vmem:[#allocation13_spill] sm:$0xff] }
 0x234   :  { %2339 = vperm.xlu0 %5245, %v7167_v7   ;;  %v1187_v39 = vmul.f32 %v6690_v33, %v6949_v18  ;;  %v1336_v14 = vadd.f32 %v6852_v40, %v1265_v53  ;;  %v1171_v58 = vmul.f32 %v6690_v33, %v994_v17  ;;  %v4991_v6 = vpack.c.bf16 %v1352_v38, %v1351_v4  ;;  %v7190_v18 = vld [vmem:[%s8703_s0 + $0x218] sm:$0xff] }
 0x235   :  { %v1305_v35 = vadd.f32 %v6852_v40, %v1234_v30  ;;  %v1186_v56 = vmul.f32 %v6690_v33, %v6930_v50  ;;  %v7183_v20 = vpop.permute.xlu1 %1065  ;;  %v1399_v36 = vmax.f32 %v1335_v59, 0.0  ;;  %v1384_v9 = vmax.f32 %v1320_v55, 0.0  ;;  %v9037_v4 = vld [vmem:[#allocation108_spill] sm:$0xff] }
 0x236   :  { %v863_v45 = vadd.f32 %v799_v15, %v9034_v25  ;;  %v1219_v24 = vadd.f32 %v1155_v22, %v9035_v31  ;;  %v1235_v3 = vadd.f32 %v1171_v58, %v847_v60  ;;  %4992 = vmatpush3.bf16.msra.mxu0 %v4991_v6  ;;  %v1400_v44 = vmax.f32 %v1336_v14, 0.0 }
 0x237   :  { %1875 = vperm.xlu1 %5167, %v7190_v18   ;;  %v815_v50 = vmul.f32 %v6547_v42, %v9036_v13  ;;  %v862_v52 = vadd.f32 %v798_v51, %v474_v54  ;;  %v1266_v59 = vadd.f32 %v1202_v1, %v878_v32  ;;  %v926_v55 = vpop.permute.xlu0 %925  ;;  %v1383_v30 = vmax.f32 %v1319_v8, 0.0 }
 0x238   :  { %v1251_v38 = vadd.f32 %v1187_v39, %v863_v45  ;;  %v1306_v15 = vadd.f32 %v6852_v40, %v1235_v3  ;;  %v1154_v22 = vmul.f32 %v6690_v33, %v926_v55  ;;  %v5021_v53 = vpack.c.bf16 %v1400_v44, %v1399_v36 }
 0x239   :  { %v492_v16 = vmul.f32 %v6542_v62, %v9037_v4  ;;  %v1250_v60 = vadd.f32 %v1186_v56, %v862_v52  ;;  %v1172_v17 = vmul.f32 %v6690_v33, %v7006_v21  ;;  %v5023_v14 = vpack.c.bf16 %v1384_v9, %v1383_v30 }
 0x23a   :  { %v1290_v58 = vadd.f32 %v6852_v40, %v1219_v24  ;;  %v1218_v54 = vadd.f32 %v1154_v22, %v7083_v11  ;;  %v7204_v32 = vpop.permute.xlu1 %749  ;;  %5022 = vmatprep.subr.bf16.mxu1 %v5021_v53  ;;  %v1369_v8 = vmax.f32 %v1305_v35, 0.0  ;;  %v1370_v51 = vmax.f32 %v1306_v15, 0.0  ;;  %v9038_v35 = vld [vmem:[#allocation90_spill] sm:$0xff]  ;;  %v9041_v15 = vld [vmem:[#allocation23_spill] sm:$0xff] }
 0x23b   :  { %5168 = vset.pattern.permute.xlu1 %v8781_v49  ;;  %v879_v1 = vadd.f32 %v815_v50, %v6989_v27  ;;  %v785_v39 = vmul.f32 %v6547_v42, %v6890_v63  ;;  %v1337_v6 = vadd.f32 %v6852_v40, %v1266_v59  ;;  %5024 = vmatpush3.bf16.msra.mxu1 %v5023_v14  ;;  %v1122_v21 = vpop.permute.xlu0 %1121  ;;  %v9039_v27 = vld [vmem:[#allocation98_spill] sm:$0xff]  ;;  %v9040_v50 = vld [vmem:[#allocation20_spill] sm:$0xff] }
 0x23c   :  { %2383 = vperm.xlu1 %5168, %v6974_v23   ;;  %v1322_v11 = vadd.f32 %v6852_v40, %v1251_v38  ;;  %v1289_v56 = vadd.f32 %v6852_v40, %v1218_v54  ;;  %v1203_v36 = vmul.f32 %v6690_v33, %v1122_v21  ;;  %v4993_v9 = vpack.c.bf16 %v1370_v51, %v1369_v8  ;;  %v9043_v51 = vld [vmem:[#allocation32_spill] sm:$0xff] }
 0x23d   :  { %v462_v25 = vmul.f32 %v6542_v62, %v9038_v35  ;;  %v476_v45 = vmul.f32 %v6542_v62, %v9039_v27  ;;  %v1321_v63 = vadd.f32 %v6852_v40, %v1250_v60  ;;  %v1236_v31 = vadd.f32 %v1172_v17, %v7144_v0  ;;  %v2777_v60 = vld [vmem:[%s8706_s3 + $0x18] sm:$0xff]  ;;  %v9042_v17 = vld [vmem:[#allocation15_spill] sm:$0xff] }
 0x23e   :  { %v1157_v23 = vmul.f32 %v6690_v33, %v7095_v19  ;;  %v1353_v24 = vmax.f32 %v1289_v56, 0.0  ;;  %v1267_v3 = vadd.f32 %v1203_v36, %v879_v1  ;;  %4994 = vmatprep.subr.bf16.mxu0 %v4993_v9  ;;  %v1354_v44 = vmax.f32 %v1290_v58, 0.0  ;;  %2942 = vmatprep.mubr.f32.mxu1 %v2777_v60  ;;  %v9049_v60 = vld [vmem:[#allocation81_spill] sm:$0xff] }
 0x23f   :  { %v880_v13 = vadd.f32 %v6778_v37, %v492_v16  ;;  %v849_v52 = vadd.f32 %v785_v39, %v9040_v50  ;;  %v801_v59 = vmul.f32 %v6547_v42, %v7057_v46  ;;  %v1006_v55 = vpop.permute.xlu1 %1005  ;;  %v1002_v30 = vpop.permute.xlu0 %1001  ;;  %v1401_v38 = vmax.f32 %v1337_v6, 0.0 }
 0x240   :  { %5169 = vset.pattern.permute.xlu1 %v8880_v43  ;;  %v1338_v0 = vadd.f32 %v6852_v40, %v1267_v3  ;;  %v1173_v19 = vmul.f32 %v6690_v33, %v1002_v30  ;;  %v4995_v22 = vpack.c.bf16 %v1354_v44, %v1353_v24  ;;  %v1386_v53 = vmax.f32 %v1322_v11, 0.0  ;;  %v9045_v30 = vld [vmem:[#allocation16_spill] sm:$0xff] }
 0x241   :  { %1726 = vperm.xlu1 %5169, %v9041_v15   ;;  %v1307_v37 = vadd.f32 %v6852_v40, %v1236_v31  ;;  %v800_v4 = vmul.f32 %v6547_v42, %v7031_v34  ;;  %v1189_v46 = vmul.f32 %v6690_v33, %v7183_v20  ;;  %v1385_v16 = vmax.f32 %v1321_v63, 0.0  ;;  %v9044_v20 = vld [vmem:[#allocation31_spill] sm:$0xff] }
 0x242   :  { %v1221_v14 = vadd.f32 %v1157_v23, %v9042_v17  ;;  %v1204_v58 = vmul.f32 %v6690_v33, %v7141_v5  ;;  %v1402_v54 = vmax.f32 %v1338_v0, 0.0  ;;  %v1237_v8 = vadd.f32 %v1173_v19, %v849_v52  ;;  %4996 = vmatpush3.bf16.msra.mxu0 %v4995_v22  ;;  %v9047_v0 = vld [vmem:[#allocation38_spill] sm:$0xff] }
 0x243   :  { %v850_v1 = vadd.f32 %v9043_v51, %v462_v25  ;;  %v817_v34 = vmul.f32 %v6547_v42, %v6977_v48  ;;  %v865_v39 = vadd.f32 %v801_v59, %v9044_v20  ;;  %v1188_v6 = vmul.f32 %v6690_v33, %v7157_v29  ;;  %v934_v21 = vpop.permute.xlu0 %933  ;;  %v7257_v29 = vld [vmem:[%s8703_s0 + $0x230] sm:$0xff] }
 0x244   :  { %v1308_v11 = vadd.f32 %v6852_v40, %v1237_v8  ;;  %v1156_v56 = vmul.f32 %v6690_v33, %v934_v21  ;;  %v7250_v5 = vpop.permute.xlu1 %681  ;;  %v5025_v36 = vpack.c.bf16 %v1402_v54, %v1401_v38  ;;  %v5027_v9 = vpack.c.bf16 %v1386_v53, %v1385_v16  ;;  %2275 = vperm.xlu0 %5245, %v7257_v29  }
 0x245   :  { %5170 = vset.pattern.permute.xlu1 %v8766_v57  ;;  %v864_v35 = vadd.f32 %v800_v4, %v476_v45  ;;  %v1253_v25 = vadd.f32 %v1189_v46, %v865_v39  ;;  %v1174_v48 = vmul.f32 %v6690_v33, %v1006_v55  ;;  %v1371_v27 = vmax.f32 %v1307_v37, 0.0  ;;  %v9048_v46 = vld [vmem:[#allocation60_spill] sm:$0xff]  ;;  %v9051_v39 = vld [vmem:[#allocation110_spill] sm:$0xff] }
 0x246   :  { %2063 = vperm.xlu1 %5170, %v9041_v15   ;;  %v1292_v63 = vadd.f32 %v6852_v40, %v1221_v14  ;;  %v1268_v31 = vadd.f32 %v1204_v58, %v880_v13  ;;  %v1372_v23 = vmax.f32 %v1308_v11, 0.0  ;;  %v1220_v24 = vadd.f32 %v1156_v56, %v7085_v47  ;;  %5026 = vmatprep.subr.bf16.mxu1 %v5025_v36  ;;  %v9046_v47 = vld [vmem:[#allocation17_spill] sm:$0xff]  ;;  %v9050_v14 = vld [vmem:[#allocation83_spill] sm:$0xff] }
 0x247   :  { %v881_v45 = vadd.f32 %v817_v34, %v7012_v28  ;;  %v1252_v3 = vadd.f32 %v1188_v6, %v864_v35  ;;  %5028 = vmatpush3.bf16.msra.mxu1 %v5027_v9  ;;  %v1130_v44 = vpop.permute.xlu0 %1129  ;;  %v787_v50 = vmul.f32 %v6547_v42, %v7118_v10  ;;  %v835_v38 = vadd.f32 %v9046_v47, %v9045_v30  ;;  %v7277_v10 = vld [vmem:[%s8703_s0 + $0x398] sm:$0xff] }
 0x248   :  { %v1291_v52 = vadd.f32 %v6852_v40, %v1220_v24  ;;  %v1205_v59 = vmul.f32 %v6690_v33, %v1130_v44  ;;  %v7267_v55 = vpop.permute.xlu1 %685  ;;  %v4997_v13 = vpack.c.bf16 %v1372_v23, %v1371_v27  ;;  %v463_v19 = vmul.f32 %v6542_v62, %v9047_v0  ;;  %v9052_v27 = vld [vmem:[#allocation68_spill] sm:$0xff] }
 0x249   :  { %v1324_v28 = vadd.f32 %v6852_v40, %v1253_v25  ;;  %v1238_v15 = vadd.f32 %v1174_v48, %v850_v1  ;;  %v1339_v22 = vadd.f32 %v6852_v40, %v1268_v31  ;;  %v1356_v4 = vmax.f32 %v1292_v63, 0.0 }
 0x24a   :  { %2067 = vperm.xlu1 %5170, %v7277_v10   ;;  %v1355_v53 = vmax.f32 %v1291_v52, 0.0  ;;  %v1269_v37 = vadd.f32 %v1205_v59, %v881_v45  ;;  %4998 = vmatprep.subr.bf16.mxu0 %v4997_v13  ;;  %v818_v16 = vmul.f32 %v6547_v42, %v9048_v46  ;;  %v446_v17 = vmul.f32 %v6542_v62, %v9049_v60 }
 0x24b   :  { %v770_v58 = vmul.f32 %v6547_v42, %v9050_v14  ;;  %v1323_v54 = vadd.f32 %v6852_v40, %v1252_v3  ;;  %v1010_v8 = vpop.permute.xlu0 %1009  ;;  %v851_v51 = vadd.f32 %v787_v50, %v463_v19  ;;  %v494_v6 = vmul.f32 %v6542_v62, %v9051_v39 }
 0x24c   :  { %v1340_v1 = vadd.f32 %v6852_v40, %v1269_v37  ;;  %v1175_v34 = vmul.f32 %v6690_v33, %v1010_v8  ;;  %v4999_v20 = vpack.c.bf16 %v1356_v4, %v1355_v53  ;;  %v819_v21 = vmul.f32 %v6547_v42, %v7204_v32 }
 0x24d   :  { %v1309_v11 = vadd.f32 %v6852_v40, %v1238_v15  ;;  %v946_v56 = vpop.permute.xlu1 %945  ;;  %v1388_v36 = vmax.f32 %v1324_v28, 0.0  ;;  %v1403_v48 = vmax.f32 %v1339_v22, 0.0  ;;  %v495_v63 = vmul.f32 %v6542_v62, %v9052_v27 }
 0x24e   :  { %5171 = vset.pattern.permute.xlu1 %v8781_v49  ;;  %v1404_v9 = vmax.f32 %v1340_v1, 0.0  ;;  %v1239_v35 = vadd.f32 %v1175_v34, %v851_v51  ;;  %v1159_v25 = vmul.f32 %v6690_v33, %v946_v56  ;;  %5000 = vmatpush3.bf16.msra.mxu0 %v4999_v20  ;;  %v834_v31 = vadd.f32 %v770_v58, %v446_v17  ;;  %v5381_v17 = vld [vmem:[%s8703_s0 + $0x310] sm:$0xff]  ;;  %v7328_v1 = vld [vmem:[%s8703_s0 + $0x318] sm:$0xff] }
 0x24f   :  { %2327 = vperm.xlu1 %5171, %v7092_v2   ;;  %v942_v23 = vpop.permute.xlu0 %941  ;;  %v1387_v32 = vmax.f32 %v1323_v54, 0.0  ;;  %v882_v50 = vadd.f32 %v818_v16, %v494_v6  ;;  %v883_v52 = vadd.f32 %v819_v21, %v495_v63  ;;  %v1373_v30 = vmax.f32 %v1309_v11, 0.0  ;;  %v7319_v58 = vld [vmem:[%s8703_s0 + $0x3b0] sm:$0xff]  ;;  %v5383_v63 = vld [vmem:[%s8703_s0 + $0x2a0] sm:$0xff] }
 0x250   :  { %v1310_v24 = vadd.f32 %v6852_v40, %v1239_v35  ;;  %v1223_v45 = vadd.f32 %v1159_v25, %v835_v38  ;;  %v1158_v3 = vmul.f32 %v6690_v33, %v942_v23  ;;  %v5029_v44 = vpack.c.bf16 %v1404_v9, %v1403_v48  ;;  %2467 = vperm.xlu0 %5245, %v7319_v58   ;;  %v9053_v20 = vld [vmem:[#allocation100_spill] sm:$0xff]  ;;  %v9054_v9 = vld [vmem:[#allocation54_spill] sm:$0xff] }
 0x251   :  { %v1138_v59 = vpop.permute.xlu1 %1137  ;;  %v5031_v13 = vpack.c.bf16 %v1388_v36, %v1387_v32  ;;  %v478_v39 = vmul.f32 %v6542_v62, %v9053_v20  ;;  %v802_v6 = vmul.f32 %v6547_v42, %v7250_v5  ;;  %v803_v56 = vmul.f32 %v6547_v42, %v7267_v55  ;;  %v5384_v42 = vld [vmem:[%s8705_s2] ss:$0 sm:$0xff]  ;;  %v7356_v32 = vld [vmem:[%s8703_s0 + $0x330] sm:$0xff] }
 0x252   :  { %v1374_v2 = vmax.f32 %v1310_v24, 0.0  ;;  %v1294_v47 = vadd.f32 %v6852_v40, %v1223_v45  ;;  %v1222_v0 = vadd.f32 %v1158_v3, %v834_v31  ;;  %v1207_v19 = vmul.f32 %v6690_v33, %v1138_v59  ;;  %5030 = vmatprep.subr.bf16.mxu1 %v5029_v44  ;;  %v7362_v3 = vld [vmem:[%s8703_s0 + $0x2a8] sm:$0xff]  ;;  %v2776_v44 = vld [vmem:[%s8706_s3 + $0x10] sm:$0xff] }
 0x253   :  { %5172 = vset.pattern.permute.xlu1 %v8880_v43  ;;  %5032 = vmatpush3.bf16.msra.mxu1 %v5031_v13  ;;  %v1134_v38 = vpop.permute.xlu0 %1133  ;;  %v866_v11 = vadd.f32 %v802_v6, %v478_v39  ;;  %v479_v35 = vmul.f32 %v6542_v62, %v9054_v9  ;;  %v9055_v59 = vld [vmem:[#allocation154_spill] sm:$0xff]  ;;  %v9061_v9 = vld [vmem:[#allocation112_spill] sm:$0xff] }
 0x254   :  { %1646 = vperm.xlu1 %5172, %v6818_v26   ;;  %v1293_v28 = vadd.f32 %v6852_v40, %v1222_v0  ;;  %v1271_v15 = vadd.f32 %v1207_v19, %v883_v52  ;;  %v1206_v22 = vmul.f32 %v6690_v33, %v1134_v38  ;;  %v5001_v53 = vpack.c.bf16 %v1374_v2, %v1373_v30  ;;  %v9056_v30 = vld [vmem:[#allocation153_spill] sm:$0xff]  ;;  %v9057_v0 = vld [vmem:[#allocation111_spill] sm:$0xff] }
 0x255   :  { %v1358_v60 = vmax.f32 %v1294_v47, 0.0  ;;  %v867_v27 = vadd.f32 %v803_v56, %v479_v35  ;;  %2403 = vperm.xlu0 %5245, %v7356_v32  }
 0x256   :  { %v1357_v37 = vmax.f32 %v1293_v28, 0.0  ;;  %v1342_v4 = vadd.f32 %v6852_v40, %v1271_v15  ;;  %v1270_v46 = vadd.f32 %v1206_v22, %v882_v50  ;;  %v7309_v16 = vpop.permute.xlu1 %1561  ;;  %5002 = vmatprep.subr.bf16.mxu0 %v5001_v53  ;;  %v4455_v50 = vld [vmem:[%s8704_s1 + $0x4] sm:$0x7] }
 0x257   :  { %v7376_v13 = vrot.slane %v4455_v50, %v9055_v59  ;;  %v7379_v2 = vrot.slane %v4455_v50, %v9056_v30  ;;  %v9058_v28 = vld [vmem:[#allocation150_spill] sm:$0xff] }
 0x258   :  { %5173 = vset.pattern.permute.xlu1 %v8766_v57  ;;  %v1341_v26 = vadd.f32 %v6852_v40, %v1270_v46  ;;  %v5003_v14 = vpack.c.bf16 %v1358_v60, %v1357_v37  ;;  %v1406_v8 = vmax.f32 %v1342_v4, 0.0  ;;  %v2774_v40 = vld [vmem:[%s8706_s3] sm:$0xff]  ;;  %v9059_v15 = vsub.s32 2, %v9058_v28 }
 0x259   :  { %1999 = vperm.xlu1 %5173, %v5381_v17   ;;  %v1814_v19 = vmul.f32 %v7379_v2, %v9057_v0  ;;  %v5386_v53 = vld [vmem:[%s8703_s0 + $0x220] sm:$0xff]  ;;  %v1815_v17 = vmul.f32 %v7379_v2, %v7309_v16  ;;  %v7417_v16 = vld [vmem:[%s8703_s0 + $0x228] sm:$0xff]  ;;  %v1798_v35 = vmul.f32 %v7379_v2, %v9061_v9 }
 0x25a   :  { %v1405_v54 = vmax.f32 %v1341_v26, 0.0  ;;  %5004 = vmatpush3.bf16.msra.mxu0 %v5003_v14  ;;  %v7388_v22 = vrot.slane %v4455_v50, %v9059_v15  ;;  %v9060_v60 = vld [vmem:[#allocation61_spill] sm:$0xff] }
 0x25b   :  { %v1928_v51 = vpop.permute.xlu1 %1927  ;;  %v2139_v26 = vmul.f32 %v7376_v13, %v9060_v60  ;;  %v7405_v14 = vld [vmem:[%s8703_s0 + $0x2c0] sm:$0xff] }
 0x25c   :  { %v5033_v34 = vpack.c.bf16 %v1406_v8, %v1405_v54  ;;  %v2138_v38 = vmul.f32 %v7376_v13, %v1928_v51  ;;  %2347 = vperm.xlu0 %5245, %v7405_v14   ;;  %v7411_v8 = vld [vmem:[%s8705_s2 + $0x1] ss:$0 sm:$0xff] }
 0x25d   :  { %2003 = vperm.xlu1 %5173, %v7328_v1   ;;  %2863 = vmatmul.mubr.f32.vlgmr.msra.gmra.mrb[0].mxu0 %v2774_v40  ;;  %v2203_v51 = vadd.f32 %v2139_v26, %v1815_v17 }
 0x25e   :  { %5034 = vmatprep.subr.bf16.mxu1 %v5033_v34  ;;  %v2202_v37 = vadd.f32 %v2138_v38, %v1814_v19 }
 0x260   :  { %v1070_v21 = vpop.permute.xlu1 %1069 }
 0x261   :  { %5174 = vset.pattern.permute.xlu1 %v8781_v49  ;;  %v1190_v36 = vmul.f32 %v6690_v33, %v1070_v21 }
 0x262   :  { %2263 = vperm.xlu1 %5174, %v7190_v18  }
 0x263   :  { %v1254_v25 = vadd.f32 %v1190_v36, %v866_v11 }
 0x264   :  { %v1074_v48 = vpop.permute.xlu1 %1073 }
 0x265   :  { %v1191_v5 = vmul.f32 %v6690_v33, %v1074_v48  ;;  %v1325_v18 = vadd.f32 %v5384_v42, %v1254_v25 }
 0x266   :  { %5175 = vset.pattern.permute.xlu1 %v8880_v43 }
 0x267   :  { %1576 = vperm.xlu1 %5175, %v5383_v63   ;;  %v1255_v55 = vadd.f32 %v1191_v5, %v867_v27  ;;  %v1389_v33 = vmax.f32 %v1325_v18, 0.0  ;;  %v7443_v18 = vld [vmem:[%s8703_s0 + $0x240] sm:$0xff] }
 0x268   :  { %2283 = vperm.xlu0 %5245, %v7443_v18  }
 0x269   :  { %v1326_v31 = vadd.f32 %v5384_v42, %v1255_v55  ;;  %v7350_v62 = vpop.permute.xlu1 %1481  ;;  %v9062_v55 = vld [vmem:[#allocation63_spill] sm:$0xff] }
 0x26a   :  { %v1799_v42 = vmul.f32 %v7379_v2, %v7350_v62  ;;  %v7452_v62 = vld [vmem:[%s8703_s0 + $0x3a8] sm:$0xff] }
 0x26b   :  { %5176 = vset.pattern.permute.xlu1 %v8766_v57  ;;  %v1390_v23 = vmax.f32 %v1326_v31, 0.0  ;;  %v2123_v31 = vmul.f32 %v7376_v13, %v9062_v55 }
 0x26c   :  { %1943 = vperm.xlu1 %5176, %v5383_v63  }
 0x26d   :  { %v5035_v24 = vpack.c.bf16 %v1390_v23, %v1389_v33 }
 0x26e   :  { %v1864_v45 = vpop.permute.xlu1 %1863 }
 0x26f   :  { %5036 = vmatpush3.bf16.msra.mxu1 %v5035_v24  ;;  %v2122_v25 = vmul.f32 %v7376_v13, %v1864_v45  ;;  %v2187_v24 = vadd.f32 %v2123_v31, %v1799_v42 }
 0x270   :  { %1947 = vperm.xlu1 %5176, %v7362_v3  }
 0x271   :  { %v2186_v5 = vadd.f32 %v2122_v25, %v1798_v35 }
 0x272   :  { %2943 = vmatmul.mubr.f32.vlgmr.msra.gmra.mrb[0].mxu1 %v2776_v44 }
 0x274   :  { %5177 = vset.pattern.permute.xlu1 %v8781_v49  ;;  %v7372_v52 = vpop.permute.xlu1 %1716 }
 0x275   :  { %2455 = vperm.xlu1 %5177, %v7277_v10   ;;  %v2316_v10 = vpop.permute.xlu0 %2315  ;;  %v1846_v15 = vmul.f32 %v7379_v2, %v7372_v52 }
 0x276   :  { %v2526_v4 = vmul.f32 %v7388_v22, %v2316_v10 }
 0x278   :  { %v7381_v47 = vpop.permute.xlu1 %1721  ;;  %v2590_v54 = vadd.f32 %v2526_v4, %v2202_v37  ;;  %v7470_v37 = vld [vmem:[%s8703_s0 + $0x3c0] sm:$0xff] }
 0x279   :  { %5178 = vset.pattern.permute.xlu1 %v8880_v43  ;;  %v2252_v27 = vpop.permute.xlu0 %2251  ;;  %2475 = vperm.xlu0 %5245, %v7470_v37  }
 0x27a   :  { %1496 = vperm.xlu1 %5178, %v5386_v53   ;;  %v2662_v20 = vadd.f32 %v7411_v8, %v2590_v54  ;;  %v2510_v63 = vmul.f32 %v7388_v22, %v2252_v27  ;;  %v7485_v54 = vld [vmem:[%s8703_s0 + $0x340] sm:$0xff] }
 0x27c   :  { %v2726_v11 = vmax.f32 %v2662_v20, 0.0  ;;  %v2574_v33 = vadd.f32 %v2510_v63, %v2186_v5 }
 0x27d   :  { %v7395_v46 = vpop.permute.xlu1 %2059  ;;  %2411 = vperm.xlu0 %5245, %v7485_v54  }
 0x27e   :  { %5179 = vset.pattern.permute.xlu1 %v8766_v57  ;;  %v2171_v17 = vmul.f32 %v7376_v13, %v7395_v46  ;;  %v7494_v46 = vld [vmem:[%s8703_s0 + $0x328] sm:$0xff] }
 0x27f   :  { %1879 = vperm.xlu1 %5179, %v5386_v53   ;;  %v2444_v53 = vpop.permute.xlu0 %2443 }
 0x280   :  { %v2558_v52 = vmul.f32 %v7388_v22, %v2444_v53 }
 0x282   :  { %v2320_v40 = vpop.permute.xlu1 %2319 }
 0x283   :  { %v2527_v34 = vmul.f32 %v7388_v22, %v2320_v40  ;;  %1883 = vperm.xlu1 %5179, %v7417_v16   ;;  %v2380_v63 = vpop.permute.xlu0 %2379 }
 0x284   :  { %v2542_v31 = vmul.f32 %v7388_v22, %v2380_v63 }
 0x285   :  { %v2591_v39 = vadd.f32 %v2527_v34, %v2203_v51  ;;  %v1847_v51 = vmul.f32 %v7379_v2, %v7381_v47 }
 0x287   :  { %v2663_v6 = vadd.f32 %v7411_v8, %v2591_v39  ;;  %5180 = vset.pattern.permute.xlu1 %v8781_v49  ;;  %v7423_v21 = vpop.permute.xlu1 %1636  ;;  %v2235_v20 = vadd.f32 %v2171_v17, %v1847_v51  ;;  %v2324_v51 = vpop.permute.xlu0 %2323 }
 0x288   :  { %2391 = vperm.xlu1 %5180, %v7328_v1   ;;  %v1830_v42 = vmul.f32 %v7379_v2, %v7423_v21 }
 0x289   :  { %v2727_v56 = vmax.f32 %v2663_v6, 0.0 }
 0x28b   :  { %v5037_v36 = vpack.c.bf16 %v2727_v56, %v2726_v11 }
 0x28c   :  { %5181 = vset.pattern.permute.xlu1 %v8880_v43  ;;  %v7430_v48 = vpop.permute.xlu1 %1991 }
 0x28d   :  { %1736 = vperm.xlu1 %5181, %v6959_v61   ;;  %5038 = vmatprep.subr.bf16.mxu0 %v5037_v36  ;;  %v7512_v36 = vld [vmem:[%s8703_s0 + $0x250] sm:$0xff]  ;;  %v2154_v27 = vmul.f32 %v7376_v13, %v7430_v48 }
 0x28e   :  { %v7532_v48 = vld [vmem:[%s8703_s0 + $0x350] sm:$0xff] }
 0x28f   :  { %v2218_v55 = vadd.f32 %v2154_v27, %v1830_v42  ;;  %v7613_v42 = vld [vmem:[%s8703_s0 + $0x238] sm:$0xff] }
 0x290   :  { %v7434_v1 = vpop.permute.xlu1 %1995 }
 0x291   :  { %5182 = vset.pattern.permute.xlu1 %v8766_v57  ;;  %v2155_v21 = vmul.f32 %v7376_v13, %v7434_v1 }
 0x292   :  { %2071 = vperm.xlu1 %5182, %v6959_v61   ;;  %v2646_v61 = vadd.f32 %v7411_v8, %v2574_v33 }
 0x294   :  { %v2710_v19 = vmax.f32 %v2646_v61, 0.0  ;;  %v7547_v61 = vld [vmem:[%s8703_s0 + $0x2e0] sm:$0xff] }
 0x295   :  { %v2256_v23 = vpop.permute.xlu1 %2255 }
 0x296   :  { %v2511_v45 = vmul.f32 %v7388_v22, %v2256_v23  ;;  %2075 = vperm.xlu1 %5182, %v7452_v62   ;;  %v9064_v23 = vld [vmem:[#allocation113_spill] sm:$0xff] }
 0x298   :  { %v2575_v44 = vadd.f32 %v2511_v45, %v2187_v24  ;;  %v1831_v24 = vmul.f32 %v7379_v2, %v9064_v23  ;;  %v2606_v45 = vadd.f32 %v2542_v31, %v2218_v55  ;;  %v7626_v23 = vld [vmem:[%s8703_s0 + $0x3f8] sm:$0xff] }
 0x29a   :  { %v2647_v50 = vadd.f32 %v7411_v8, %v2575_v44  ;;  %5183 = vset.pattern.permute.xlu1 %v8781_v49  ;;  %v7458_v0 = vpop.permute.xlu1 %1566 }
 0x29b   :  { %2335 = vperm.xlu1 %5183, %v7362_v3   ;;  %v9063_v3 = vld [vmem:[#allocation65_spill] sm:$0xff] }
 0x29c   :  { %v2711_v38 = vmax.f32 %v2647_v50, 0.0  ;;  %v2170_v4 = vmul.f32 %v7376_v13, %v9063_v3  ;;  %v2219_v50 = vadd.f32 %v2155_v21, %v1831_v24 }
 0x29e   :  { %v5039_v28 = vpack.c.bf16 %v2711_v38, %v2710_v19  ;;  %v2234_v60 = vadd.f32 %v2170_v4, %v1846_v15  ;;  %v7553_v38 = vld [vmem:[%s8703_s0 + $0x2b8] sm:$0xff] }
 0x29f   :  { %5184 = vset.pattern.permute.xlu1 %v8880_v43  ;;  %v7464_v10 = vpop.permute.xlu1 %1935 }
 0x2a0   :  { %1656 = vperm.xlu1 %5184, %v7069_v41   ;;  %5040 = vmatpush3.bf16.msra.mxu0 %v5039_v28  ;;  %v2622_v40 = vadd.f32 %v2558_v52, %v2234_v60  ;;  %v7561_v28 = vld [vmem:[%s8703_s0 + $0x260] sm:$0xff]  ;;  %v2140_v17 = vmul.f32 %v7376_v13, %v7464_v10  ;;  %v2528_v10 = vmul.f32 %v7388_v22, %v2324_v51 }
 0x2a1   :  { %v7572_v60 = vld [vmem:[%s8703_s0 + $0x3e0] sm:$0xff] }
 0x2a2   :  { %v2694_v47 = vadd.f32 %v7411_v8, %v2622_v40 }
 0x2a3   :  { %v7476_v26 = vpop.permute.xlu1 %1939 }
 0x2a4   :  { %5185 = vset.pattern.permute.xlu1 %v8766_v57  ;;  %v2758_v9 = vmax.f32 %v2694_v47, 0.0  ;;  %v7596_v47 = vld [vmem:[%s8703_s0 + $0x2f0] sm:$0xff] }
 0x2a5   :  { %2007 = vperm.xlu1 %5185, %v7069_v41   ;;  %v7500_v41 = vld [vmem:[%s8703_s0 + $0x2d0] sm:$0xff] }
 0x2a6   :  { %2355 = vperm.xlu0 %5245, %v7500_v41  }
 0x2a8   :  { %v2448_v34 = vpop.permute.xlu1 %2447 }
 0x2a9   :  { %v2559_v39 = vmul.f32 %v7388_v22, %v2448_v34  ;;  %2011 = vperm.xlu1 %5185, %v7494_v46   ;;  %v1816_v34 = vmul.f32 %v7379_v2, %v7458_v0  ;;  %v2141_v0 = vmul.f32 %v7376_v13, %v7476_v26 }
 0x2aa   :  { %2291 = vperm.xlu0 %5245, %v7512_v36  }
 0x2ab   :  { %v2623_v6 = vadd.f32 %v2559_v39, %v2235_v20  ;;  %v2204_v20 = vadd.f32 %v2140_v17, %v1816_v34 }
 0x2ad   :  { %v2695_v11 = vadd.f32 %v7411_v8, %v2623_v6  ;;  %5186 = vset.pattern.permute.xlu1 %v8781_v49  ;;  %v7506_v56 = vpop.permute.xlu1 %1486  ;;  %v9065_v6 = vld [vmem:[#allocation115_spill] sm:$0xff] }
 0x2ae   :  { %2271 = vperm.xlu1 %5186, %v7417_v16   ;;  %v7523_v16 = vld [vmem:[%s8703_s0 + $0x3d0] sm:$0xff] }
 0x2af   :  { %v2759_v35 = vmax.f32 %v2695_v11, 0.0  ;;  %2483 = vperm.xlu0 %5245, %v7523_v16   ;;  %v1817_v11 = vmul.f32 %v7379_v2, %v9065_v6 }
 0x2b1   :  { %v5069_v25 = vpack.c.bf16 %v2759_v35, %v2758_v9  ;;  %v2592_v9 = vadd.f32 %v2528_v10, %v2204_v20  ;;  %v2205_v27 = vadd.f32 %v2141_v0, %v1817_v11 }
 0x2b2   :  { %5187 = vset.pattern.permute.xlu1 %v8880_v43  ;;  %v7518_v5 = vpop.permute.xlu1 %1871 }
 0x2b3   :  { %1586 = vperm.xlu1 %5187, %v7167_v7   ;;  %5070 = vmatprep.subr.bf16.mxu1 %v5069_v25  ;;  %v7607_v25 = vld [vmem:[%s8703_s0 + $0x270] sm:$0xff] }
 0x2b4   :  { %2419 = vperm.xlu0 %5245, %v7532_v48  }
 0x2b6   :  { %v7535_v33 = vpop.permute.xlu1 %1875 }
 0x2b7   :  { %5188 = vset.pattern.permute.xlu1 %v8766_v57 }
 0x2b8   :  { %1951 = vperm.xlu1 %5188, %v7167_v7   ;;  %2363 = vperm.xlu0 %5245, %v7547_v61   ;;  %v2678_v7 = vadd.f32 %v7411_v8, %v2606_v45 }
 0x2ba   :  { %v2742_v3 = vmax.f32 %v2678_v7, 0.0  ;;  %v1800_v7 = vmul.f32 %v7379_v2, %v7506_v56  ;;  %v7652_v56 = vld [vmem:[%s8703_s0 + $0x3b8] sm:$0xff] }
 0x2bb   :  { %v2384_v44 = vpop.permute.xlu1 %2383 }
 0x2bc   :  { %v2543_v19 = vmul.f32 %v7388_v22, %v2384_v44  ;;  %1955 = vperm.xlu1 %5188, %v7553_v38   ;;  %2299 = vperm.xlu0 %5245, %v7561_v28   ;;  %v2124_v44 = vmul.f32 %v7376_v13, %v7518_v5 }
 0x2be   :  { %v2607_v1 = vadd.f32 %v2543_v19, %v2219_v50  ;;  %v2260_v19 = vpop.permute.xlu0 %2259 }
 0x2bf   :  { %v2512_v5 = vmul.f32 %v7388_v22, %v2260_v19 }
 0x2c0   :  { %v2679_v15 = vadd.f32 %v7411_v8, %v2607_v1  ;;  %5189 = vset.pattern.permute.xlu1 %v8781_v49  ;;  %v7565_v53 = vpop.permute.xlu1 %1726  ;;  %2491 = vperm.xlu0 %5245, %v7572_v60   ;;  %v2188_v1 = vadd.f32 %v2124_v44, %v1800_v7 }
 0x2c1   :  { %2463 = vperm.xlu1 %5189, %v7452_v62   ;;  %v7584_v62 = vld [vmem:[%s8703_s0 + $0x360] sm:$0xff] }
 0x2c2   :  { %v2743_v4 = vmax.f32 %v2679_v15, 0.0  ;;  %v2576_v17 = vadd.f32 %v2512_v5, %v2188_v1 }
 0x2c4   :  { %v5071_v52 = vpack.c.bf16 %v2743_v4, %v2742_v3  ;;  %2427 = vperm.xlu0 %5245, %v7584_v62   ;;  %v9066_v3 = vld [vmem:[#allocation116_spill] sm:$0xff]  ;;  %v2648_v10 = vadd.f32 %v7411_v8, %v2576_v17 }
 0x2c5   :  { %5190 = vset.pattern.permute.xlu1 %v8880_v43  ;;  %v7578_v40 = vpop.permute.xlu1 %2063  ;;  %v1801_v4 = vmul.f32 %v7379_v2, %v9066_v3 }
 0x2c6   :  { %1506 = vperm.xlu1 %5190, %v7257_v29   ;;  %5072 = vmatpush3.bf16.msra.mxu1 %v5071_v52  ;;  %v2125_v52 = vmul.f32 %v7376_v13, %v7535_v33  ;;  %v2712_v33 = vmax.f32 %v2648_v10, 0.0 }
 0x2c8   :  { %2371 = vperm.xlu0 %5245, %v7596_v47   ;;  %v2189_v34 = vadd.f32 %v2125_v52, %v1801_v4 }
 0x2c9   :  { %v7590_v39 = vpop.permute.xlu1 %2067 }
 0x2ca   :  { %5191 = vset.pattern.permute.xlu1 %v8766_v57 }
 0x2cb   :  { %1887 = vperm.xlu1 %5191, %v7257_v29   ;;  %v2664_v29 = vadd.f32 %v7411_v8, %v2592_v9 }
 0x2cc   :  { %2307 = vperm.xlu0 %5245, %v7607_v25  }
 0x2cd   :  { %v2728_v24 = vmax.f32 %v2664_v29, 0.0  ;;  %v1848_v29 = vmul.f32 %v7379_v2, %v7565_v53  ;;  %v7678_v53 = vld [vmem:[%s8703_s0 + $0x338] sm:$0xff] }
 0x2ce   :  { %v2328_v35 = vpop.permute.xlu1 %2327 }
 0x2cf   :  { %v2529_v63 = vmul.f32 %v7388_v22, %v2328_v35  ;;  %1891 = vperm.xlu1 %5191, %v7613_v42   ;;  %v2172_v35 = vmul.f32 %v7376_v13, %v7578_v40  ;;  %v2173_v40 = vmul.f32 %v7376_v13, %v7590_v39 }
 0x2d0   :  { %2503 = vperm.xlu0 %5245, %v7626_v23  }
 0x2d1   :  { %v2593_v26 = vadd.f32 %v2529_v63, %v2205_v27  ;;  %v2452_v63 = vpop.permute.xlu0 %2451 }
 0x2d3   :  { %v2665_v55 = vadd.f32 %v7411_v8, %v2593_v26  ;;  %5192 = vset.pattern.permute.xlu1 %v8781_v49  ;;  %v7620_v31 = vpop.permute.xlu1 %1646  ;;  %v2236_v26 = vadd.f32 %v2172_v35, %v1848_v29 }
 0x2d4   :  { %2399 = vperm.xlu1 %5192, %v7494_v46   ;;  %v7635_v46 = vld [vmem:[%s8703_s0 + $0x378] sm:$0xff] }
 0x2d5   :  { %v2729_v21 = vmax.f32 %v2665_v55, 0.0  ;;  %2439 = vperm.xlu0 %5245, %v7635_v46   ;;  %v2560_v55 = vmul.f32 %v7388_v22, %v2452_v63 }
 0x2d7   :  { %v5041_v45 = vpack.c.bf16 %v2729_v21, %v2728_v24  ;;  %v9067_v24 = vld [vmem:[#allocation118_spill] sm:$0xff] }
 0x2d8   :  { %5193 = vset.pattern.permute.xlu1 %v8880_v43  ;;  %v2000_v50 = vpop.permute.xlu1 %1999  ;;  %v1849_v21 = vmul.f32 %v7379_v2, %v9067_v24 }
 0x2d9   :  { %1746 = vperm.xlu1 %5193, %v7319_v58   ;;  %5042 = vmatprep.subr.bf16.mxu0 %v5041_v45  ;;  %v2624_v45 = vadd.f32 %v2560_v55, %v2236_v26  ;;  %v2156_v17 = vmul.f32 %v7376_v13, %v2000_v50  ;;  %v9068_v50 = vld [vmem:[#allocation120_spill] sm:$0xff] }
 0x2da   :  { %v2237_v19 = vadd.f32 %v2173_v40, %v1849_v21 }
 0x2db   :  { %v2696_v1 = vadd.f32 %v7411_v8, %v2624_v45 }
 0x2dc   :  { %v2004_v15 = vpop.permute.xlu1 %2003 }
 0x2dd   :  { %5194 = vset.pattern.permute.xlu1 %v8766_v57  ;;  %v2760_v39 = vmax.f32 %v2696_v1, 0.0 }
 0x2de   :  { %2079 = vperm.xlu1 %5194, %v7319_v58  }
 0x2e1   :  { %v2264_v51 = vpop.permute.xlu1 %2263 }
 0x2e2   :  { %v2513_v20 = vmul.f32 %v7388_v22, %v2264_v51  ;;  %2083 = vperm.xlu1 %5194, %v7652_v56  }
 0x2e4   :  { %v2577_v6 = vadd.f32 %v2513_v20, %v2189_v34  ;;  %v2388_v34 = vpop.permute.xlu0 %2387  ;;  %v1832_v20 = vmul.f32 %v7379_v2, %v7620_v31  ;;  %v7702_v31 = vld [vmem:[%s8703_s0 + $0x2c8] sm:$0xff] }
 0x2e6   :  { %v2649_v11 = vadd.f32 %v7411_v8, %v2577_v6  ;;  %5195 = vset.pattern.permute.xlu1 %v8781_v49  ;;  %v7658_v58 = vpop.permute.xlu1 %1576  ;;  %v2220_v10 = vadd.f32 %v2156_v17, %v1832_v20  ;;  %v2544_v6 = vmul.f32 %v7388_v22, %v2388_v34 }
 0x2e7   :  { %2343 = vperm.xlu1 %5195, %v7553_v38  }
 0x2e8   :  { %v2713_v0 = vmax.f32 %v2649_v11, 0.0 }
 0x2ea   :  { %v5043_v9 = vpack.c.bf16 %v2713_v0, %v2712_v33  ;;  %v1833_v33 = vmul.f32 %v7379_v2, %v9068_v50  ;;  %v2608_v0 = vadd.f32 %v2544_v6, %v2220_v10 }
 0x2eb   :  { %5196 = vset.pattern.permute.xlu1 %v8880_v43  ;;  %v1944_v27 = vpop.permute.xlu1 %1943 }
 0x2ec   :  { %1666 = vperm.xlu1 %5196, %v7356_v32   ;;  %5044 = vmatpush3.bf16.msra.mxu0 %v5043_v9  ;;  %v2680_v29 = vadd.f32 %v7411_v8, %v2608_v0  ;;  %v2142_v40 = vmul.f32 %v7376_v13, %v1944_v27  ;;  %v9069_v27 = vld [vmem:[#allocation122_spill] sm:$0xff] }
 0x2ee   :  { %v2744_v55 = vmax.f32 %v2680_v29, 0.0 }
 0x2ef   :  { %v1948_v38 = vpop.permute.xlu1 %1947 }
 0x2f0   :  { %5197 = vset.pattern.permute.xlu1 %v8766_v57 }
 0x2f1   :  { %2015 = vperm.xlu1 %5197, %v7356_v32  }
 0x2f4   :  { %v2456_v44 = vpop.permute.xlu1 %2455 }
 0x2f5   :  { %v2561_v7 = vmul.f32 %v7388_v22, %v2456_v44  ;;  %2019 = vperm.xlu1 %5197, %v7678_v53   ;;  %v2332_v44 = vpop.permute.xlu0 %2331 }
 0x2f6   :  { %v2530_v1 = vmul.f32 %v7388_v22, %v2332_v44 }
 0x2f7   :  { %v2625_v5 = vadd.f32 %v2561_v7, %v2237_v19  ;;  %v1818_v19 = vmul.f32 %v7379_v2, %v7658_v58  ;;  %v7726_v58 = vld [vmem:[%s8703_s0 + $0x248] sm:$0xff] }
 0x2f9   :  { %v2697_v3 = vadd.f32 %v7411_v8, %v2625_v5  ;;  %5198 = vset.pattern.permute.xlu1 %v8781_v49  ;;  %v7684_v32 = vpop.permute.xlu1 %1496  ;;  %v2206_v7 = vadd.f32 %v2142_v40, %v1818_v19  ;;  %v2268_v0 = vpop.permute.xlu0 %2267 }
 0x2fa   :  { %2279 = vperm.xlu1 %5198, %v7613_v42   ;;  %v2157_v42 = vmul.f32 %v7376_v13, %v2004_v15 }
 0x2fb   :  { %v2761_v4 = vmax.f32 %v2697_v3, 0.0  ;;  %v1819_v3 = vmul.f32 %v7379_v2, %v9069_v27 }
 0x2fc   :  { %v2221_v35 = vadd.f32 %v2157_v42, %v1833_v33 }
 0x2fd   :  { %v5073_v52 = vpack.c.bf16 %v2761_v4, %v2760_v39  ;;  %v2594_v39 = vadd.f32 %v2530_v1, %v2206_v7 }
 0x2fe   :  { %5199 = vset.pattern.permute.xlu1 %v8880_v43  ;;  %v1880_v51 = vpop.permute.xlu1 %1879 }
 0x2ff   :  { %1596 = vperm.xlu1 %5199, %v7405_v14   ;;  %5074 = vmatprep.subr.bf16.mxu1 %v5073_v52  ;;  %v2666_v34 = vadd.f32 %v7411_v8, %v2594_v39  ;;  %v2126_v50 = vmul.f32 %v7376_v13, %v1880_v51  ;;  %v9070_v51 = vld [vmem:[#allocation123_spill] sm:$0xff] }
 0x301   :  { %v2730_v10 = vmax.f32 %v2666_v34, 0.0 }
 0x302   :  { %v1884_v11 = vpop.permute.xlu1 %1883 }
 0x303   :  { %5200 = vset.pattern.permute.xlu1 %v8766_v57 }
 0x304   :  { %1959 = vperm.xlu1 %5200, %v7405_v14  }
 0x307   :  { %v2392_v9 = vpop.permute.xlu1 %2391 }
 0x308   :  { %v2545_v63 = vmul.f32 %v7388_v22, %v2392_v9  ;;  %1963 = vperm.xlu1 %5200, %v7702_v31   ;;  %v1802_v9 = vmul.f32 %v7379_v2, %v7684_v32  ;;  %v7750_v32 = vld [vmem:[%s8703_s0 + $0x3c8] sm:$0xff] }
 0x30a   :  { %v2609_v15 = vadd.f32 %v2545_v63, %v2221_v35  ;;  %v2190_v35 = vadd.f32 %v2126_v50, %v1802_v9  ;;  %v2514_v63 = vmul.f32 %v7388_v22, %v2268_v0 }
 0x30c   :  { %v2681_v14 = vadd.f32 %v7411_v8, %v2609_v15  ;;  %5201 = vset.pattern.permute.xlu1 %v8781_v49  ;;  %v7708_v26 = vpop.permute.xlu1 %1736  ;;  %v1803_v15 = vmul.f32 %v7379_v2, %v9070_v51 }
 0x30d   :  { %2471 = vperm.xlu1 %5201, %v7652_v56   ;;  %v2143_v56 = vmul.f32 %v7376_v13, %v1948_v38  ;;  %v1850_v39 = vmul.f32 %v7379_v2, %v7708_v26  ;;  %v7774_v26 = vld [vmem:[%s8703_s0 + $0x348] sm:$0xff] }
 0x30e   :  { %v2745_v24 = vmax.f32 %v2681_v14, 0.0  ;;  %v2578_v14 = vadd.f32 %v2514_v63, %v2190_v35 }
 0x30f   :  { %v2207_v52 = vadd.f32 %v2143_v56, %v1819_v3  ;;  %v2460_v3 = vpop.permute.xlu0 %2459 }
 0x310   :  { %v5075_v21 = vpack.c.bf16 %v2745_v24, %v2744_v55  ;;  %v2650_v40 = vadd.f32 %v7411_v8, %v2578_v14 }
 0x311   :  { %5202 = vset.pattern.permute.xlu1 %v8880_v43  ;;  %v2072_v45 = vpop.permute.xlu1 %2071 }
 0x312   :  { %1516 = vperm.xlu1 %5202, %v7443_v18   ;;  %5076 = vmatpush3.bf16.msra.mxu1 %v5075_v21  ;;  %v2714_v19 = vmax.f32 %v2650_v40, 0.0  ;;  %v2174_v56 = vmul.f32 %v7376_v13, %v2072_v45  ;;  %v9071_v45 = vld [vmem:[#allocation125_spill] sm:$0xff] }
 0x313   :  { %v1851_v34 = vmul.f32 %v7379_v2, %v9071_v45  ;;  %v2396_v51 = vpop.permute.xlu0 %2395 }
 0x315   :  { %v2076_v5 = vpop.permute.xlu1 %2075 }
 0x316   :  { %5203 = vset.pattern.permute.xlu1 %v8766_v57 }
 0x317   :  { %1895 = vperm.xlu1 %5203, %v7443_v18  }
 0x31a   :  { %v2336_v4 = vpop.permute.xlu1 %2335 }
 0x31b   :  { %v2531_v17 = vmul.f32 %v7388_v22, %v2336_v4  ;;  %1899 = vperm.xlu1 %5203, %v7726_v58   ;;  %v2238_v4 = vadd.f32 %v2174_v56, %v1850_v39 }
 0x31d   :  { %v2595_v38 = vadd.f32 %v2531_v17, %v2207_v52  ;;  %v2562_v52 = vmul.f32 %v7388_v22, %v2460_v3 }
 0x31f   :  { %v2667_v18 = vadd.f32 %v7411_v8, %v2595_v38  ;;  %5204 = vset.pattern.permute.xlu1 %v8781_v49  ;;  %v7732_v20 = vpop.permute.xlu1 %1656  ;;  %v2626_v38 = vadd.f32 %v2562_v52, %v2238_v4 }
 0x320   :  { %2407 = vperm.xlu1 %5204, %v7678_v53   ;;  %v2127_v53 = vmul.f32 %v7376_v13, %v1884_v11 }
 0x321   :  { %v2731_v6 = vmax.f32 %v2667_v18, 0.0 }
 0x322   :  { %v2191_v24 = vadd.f32 %v2127_v53, %v1803_v15  ;;  %v1834_v15 = vmul.f32 %v7379_v2, %v7732_v20  ;;  %v7798_v20 = vld [vmem:[%s8703_s0 + $0x2d8] sm:$0xff] }
 0x323   :  { %v5045_v42 = vpack.c.bf16 %v2731_v6, %v2730_v10 }
 0x324   :  { %5205 = vset.pattern.permute.xlu1 %v8880_v43  ;;  %v2008_v33 = vpop.permute.xlu1 %2007 }
 0x325   :  { %1756 = vperm.xlu1 %5205, %v7470_v37   ;;  %5046 = vmatprep.subr.bf16.mxu0 %v5045_v42  ;;  %v2698_v42 = vadd.f32 %v7411_v8, %v2626_v38  ;;  %v2158_v63 = vmul.f32 %v7376_v13, %v2008_v33  ;;  %v9072_v33 = vld [vmem:[#allocation127_spill] sm:$0xff] }
 0x327   :  { %v2762_v0 = vmax.f32 %v2698_v42, 0.0  ;;  %v2222_v14 = vadd.f32 %v2158_v63, %v1834_v15 }
 0x328   :  { %v2012_v29 = vpop.permute.xlu1 %2011 }
 0x329   :  { %5206 = vset.pattern.permute.xlu1 %v8766_v57 }
 0x32a   :  { %2087 = vperm.xlu1 %5206, %v7470_v37  }
 0x32d   :  { %v2272_v55 = vpop.permute.xlu1 %2271 }
 0x32e   :  { %v2515_v21 = vmul.f32 %v7388_v22, %v2272_v55  ;;  %2091 = vperm.xlu1 %5206, %v7750_v32   ;;  %v2546_v55 = vmul.f32 %v7388_v22, %v2396_v51 }
 0x330   :  { %v2579_v11 = vadd.f32 %v2515_v21, %v2191_v24  ;;  %v1835_v21 = vmul.f32 %v7379_v2, %v9072_v33  ;;  %v2610_v40 = vadd.f32 %v2546_v55, %v2222_v14 }
 0x332   :  { %v2651_v37 = vadd.f32 %v7411_v8, %v2579_v11  ;;  %5207 = vset.pattern.permute.xlu1 %v8781_v49  ;;  %v7756_v44 = vpop.permute.xlu1 %1586 }
 0x333   :  { %2351 = vperm.xlu1 %5207, %v7702_v31   ;;  %v2175_v31 = vmul.f32 %v7376_v13, %v2076_v5  ;;  %v1820_v45 = vmul.f32 %v7379_v2, %v7756_v44  ;;  %v7822_v44 = vld [vmem:[%s8703_s0 + $0x258] sm:$0xff] }
 0x334   :  { %v2715_v7 = vmax.f32 %v2651_v37, 0.0 }
 0x335   :  { %v2239_v10 = vadd.f32 %v2175_v31, %v1851_v34  ;;  %v2340_v31 = vpop.permute.xlu0 %2339 }
 0x336   :  { %v5047_v1 = vpack.c.bf16 %v2715_v7, %v2714_v19  ;;  %v2682_v7 = vadd.f32 %v7411_v8, %v2610_v40  ;;  %v2532_v38 = vmul.f32 %v7388_v22, %v2340_v31 }
 0x337   :  { %5208 = vset.pattern.permute.xlu1 %v8880_v43  ;;  %v1952_v27 = vpop.permute.xlu1 %1951 }
 0x338   :  { %1676 = vperm.xlu1 %5208, %v7485_v54   ;;  %5048 = vmatpush3.bf16.msra.mxu0 %v5047_v1  ;;  %v2746_v56 = vmax.f32 %v2682_v7, 0.0  ;;  %v2144_v4 = vmul.f32 %v7376_v13, %v1952_v27  ;;  %v9073_v27 = vld [vmem:[#allocation129_spill] sm:$0xff] }
 0x339   :  { %v2276_v55 = vpop.permute.xlu0 %2275 }
 0x33a   :  { %v2208_v34 = vadd.f32 %v2144_v4, %v1820_v45 }
 0x33b   :  { %v1956_v17 = vpop.permute.xlu1 %1955 }
 0x33c   :  { %5209 = vset.pattern.permute.xlu1 %v8766_v57 }
 0x33d   :  { %2023 = vperm.xlu1 %5209, %v7485_v54  }
 0x340   :  { %v2464_v18 = vpop.permute.xlu1 %2463 }
 0x341   :  { %v2563_v6 = vmul.f32 %v7388_v22, %v2464_v18  ;;  %2027 = vperm.xlu1 %5209, %v7774_v26  }
 0x343   :  { %v2627_v5 = vadd.f32 %v2563_v6, %v2239_v10  ;;  %v1821_v10 = vmul.f32 %v7379_v2, %v9073_v27  ;;  %v2596_v6 = vadd.f32 %v2532_v38, %v2208_v34  ;;  %v2468_v34 = vpop.permute.xlu0 %2467 }
 0x344   :  { %v2564_v27 = vmul.f32 %v7388_v22, %v2468_v34 }
 0x345   :  { %v2699_v54 = vadd.f32 %v7411_v8, %v2627_v5  ;;  %5210 = vset.pattern.permute.xlu1 %v8781_v49  ;;  %v7780_v50 = vpop.permute.xlu1 %1506 }
 0x346   :  { %2287 = vperm.xlu1 %5210, %v7726_v58   ;;  %v2159_v58 = vmul.f32 %v7376_v13, %v2012_v29 }
 0x347   :  { %v2763_v9 = vmax.f32 %v2699_v54, 0.0 }
 0x348   :  { %v2223_v37 = vadd.f32 %v2159_v58, %v1835_v21  ;;  %v1804_v58 = vmul.f32 %v7379_v2, %v7780_v50  ;;  %v2516_v21 = vmul.f32 %v7388_v22, %v2276_v55  ;;  %v7846_v50 = vld [vmem:[%s8703_s0 + $0x3d8] sm:$0xff] }
 0x349   :  { %v5077_v35 = vpack.c.bf16 %v2763_v9, %v2762_v0  ;;  %v2668_v0 = vadd.f32 %v7411_v8, %v2596_v6 }
 0x34a   :  { %5211 = vset.pattern.permute.xlu1 %v8880_v43  ;;  %v1888_v53 = vpop.permute.xlu1 %1887 }
 0x34b   :  { %1606 = vperm.xlu1 %5211, %v7500_v41   ;;  %5078 = vmatprep.subr.bf16.mxu1 %v5077_v35  ;;  %v2732_v35 = vmax.f32 %v2668_v0, 0.0  ;;  %v2128_v15 = vmul.f32 %v7376_v13, %v1888_v53  ;;  %v9074_v53 = vld [vmem:[#allocation131_spill] sm:$0xff] }
 0x34d   :  { %v2192_v33 = vadd.f32 %v2128_v15, %v1804_v58  ;;  %v2404_v58 = vpop.permute.xlu0 %2403 }
 0x34e   :  { %v1892_v24 = vpop.permute.xlu1 %1891 }
 0x34f   :  { %5212 = vset.pattern.permute.xlu1 %v8766_v57 }
 0x350   :  { %1967 = vperm.xlu1 %5212, %v7500_v41  }
 0x351   :  { %v2348_v34 = vpop.permute.xlu0 %2347 }
 0x353   :  { %v2400_v11 = vpop.permute.xlu1 %2399 }
 0x354   :  { %v2547_v19 = vmul.f32 %v7388_v22, %v2400_v11  ;;  %1971 = vperm.xlu1 %5212, %v7798_v20   ;;  %v1805_v11 = vmul.f32 %v7379_v2, %v9074_v53 }
 0x356   :  { %v2611_v29 = vadd.f32 %v2547_v19, %v2223_v37  ;;  %v2580_v37 = vadd.f32 %v2516_v21, %v2192_v33 }
 0x358   :  { %v2683_v41 = vadd.f32 %v7411_v8, %v2611_v29  ;;  %5213 = vset.pattern.permute.xlu1 %v8781_v49  ;;  %v7804_v1 = vpop.permute.xlu1 %1746 }
 0x359   :  { %2479 = vperm.xlu1 %5213, %v7750_v32   ;;  %v2145_v32 = vmul.f32 %v7376_v13, %v1956_v17  ;;  %v1852_v38 = vmul.f32 %v7379_v2, %v7804_v1  ;;  %v7870_v1 = vld [vmem:[%s8703_s0 + $0x358] sm:$0xff] }
 0x35a   :  { %v2747_v3 = vmax.f32 %v2683_v41, 0.0  ;;  %v2652_v41 = vadd.f32 %v7411_v8, %v2580_v37 }
 0x35b   :  { %v2209_v5 = vadd.f32 %v2145_v32, %v1821_v10 }
 0x35c   :  { %v5079_v39 = vpack.c.bf16 %v2747_v3, %v2746_v56  ;;  %v2716_v3 = vmax.f32 %v2652_v41, 0.0 }
 0x35d   :  { %5214 = vset.pattern.permute.xlu1 %v8880_v43  ;;  %v2080_v52 = vpop.permute.xlu1 %2079 }
 0x35e   :  { %1526 = vperm.xlu1 %5214, %v7512_v36   ;;  %5080 = vmatpush3.bf16.msra.mxu1 %v5079_v39  ;;  %v2176_v31 = vmul.f32 %v7376_v13, %v2080_v52  ;;  %v9075_v52 = vld [vmem:[#allocation133_spill] sm:$0xff] }
 0x35f   :  { %v1853_v6 = vmul.f32 %v7379_v2, %v9075_v52 }
 0x360   :  { %v2240_v32 = vadd.f32 %v2176_v31, %v1852_v38 }
 0x361   :  { %v2084_v18 = vpop.permute.xlu1 %2083 }
 0x362   :  { %5215 = vset.pattern.permute.xlu1 %v8766_v57 }
 0x363   :  { %1903 = vperm.xlu1 %5215, %v7512_v36  }
 0x366   :  { %v2344_v42 = vpop.permute.xlu1 %2343 }
 0x367   :  { %v2533_v54 = vmul.f32 %v7388_v22, %v2344_v42  ;;  %1907 = vperm.xlu1 %5215, %v7822_v44   ;;  %v2628_v42 = vadd.f32 %v2564_v27, %v2240_v32  ;;  %v2534_v27 = vmul.f32 %v7388_v22, %v2348_v34 }
 0x369   :  { %v2597_v17 = vadd.f32 %v2533_v54, %v2209_v5 }
 0x36b   :  { %v2669_v36 = vadd.f32 %v7411_v8, %v2597_v17  ;;  %5216 = vset.pattern.permute.xlu1 %v8781_v49  ;;  %v7828_v9 = vpop.permute.xlu1 %1666  ;;  %v2700_v17 = vadd.f32 %v7411_v8, %v2628_v42 }
 0x36c   :  { %2415 = vperm.xlu1 %5216, %v7774_v26   ;;  %v2129_v26 = vmul.f32 %v7376_v13, %v1892_v24  ;;  %v1836_v33 = vmul.f32 %v7379_v2, %v7828_v9  ;;  %v7894_v9 = vld [vmem:[%s8703_s0 + $0x2e8] sm:$0xff] }
 0x36d   :  { %v2733_v63 = vmax.f32 %v2669_v36, 0.0 }
 0x36e   :  { %v2193_v7 = vadd.f32 %v2129_v26, %v1805_v11  ;;  %v2548_v26 = vmul.f32 %v7388_v22, %v2404_v58 }
 0x36f   :  { %v5049_v51 = vpack.c.bf16 %v2733_v63, %v2732_v35  ;;  %v2764_v35 = vmax.f32 %v2700_v17, 0.0 }
 0x370   :  { %5217 = vset.pattern.permute.xlu1 %v8880_v43  ;;  %v2016_v14 = vpop.permute.xlu1 %2015 }
 0x371   :  { %1766 = vperm.xlu1 %5217, %v7523_v16   ;;  %5050 = vmatprep.subr.bf16.mxu0 %v5049_v51  ;;  %v2160_v15 = vmul.f32 %v7376_v13, %v2016_v14  ;;  %v9076_v14 = vld [vmem:[#allocation134_spill] sm:$0xff] }
 0x372   :  { %v1837_v11 = vmul.f32 %v7379_v2, %v9076_v14 }
 0x373   :  { %v2224_v21 = vadd.f32 %v2160_v15, %v1836_v33  ;;  %v2284_v15 = vpop.permute.xlu0 %2283 }
 0x374   :  { %v2020_v40 = vpop.permute.xlu1 %2019 }
 0x375   :  { %5218 = vset.pattern.permute.xlu1 %v8766_v57  ;;  %v2612_v37 = vadd.f32 %v2548_v26, %v2224_v21  ;;  %v2518_v21 = vmul.f32 %v7388_v22, %v2284_v15 }
 0x376   :  { %2095 = vperm.xlu1 %5218, %v7523_v16  }
 0x377   :  { %v2684_v41 = vadd.f32 %v7411_v8, %v2612_v37 }
 0x379   :  { %v2280_v19 = vpop.permute.xlu1 %2279 }
 0x37a   :  { %v2517_v29 = vmul.f32 %v7388_v22, %v2280_v19  ;;  %2099 = vperm.xlu1 %5218, %v7846_v50  }
 0x37c   :  { %v2581_v24 = vadd.f32 %v2517_v29, %v2193_v7 }
 0x37e   :  { %v2653_v16 = vadd.f32 %v7411_v8, %v2581_v24  ;;  %5219 = vset.pattern.permute.xlu1 %v8781_v49  ;;  %v7852_v56 = vpop.permute.xlu1 %1596 }
 0x37f   :  { %2359 = vperm.xlu1 %5219, %v7798_v20   ;;  %v2177_v20 = vmul.f32 %v7376_v13, %v2084_v18  ;;  %v1822_v38 = vmul.f32 %v7379_v2, %v7852_v56  ;;  %v7918_v56 = vld [vmem:[%s8703_s0 + $0x268] sm:$0xff] }
 0x380   :  { %v2717_v39 = vmax.f32 %v2653_v16, 0.0  ;;  %v2748_v16 = vmax.f32 %v2684_v41, 0.0 }
 0x381   :  { %v2241_v54 = vadd.f32 %v2177_v20, %v1853_v6 }
 0x382   :  { %v5051_v4 = vpack.c.bf16 %v2717_v39, %v2716_v3 }
 0x383   :  { %5220 = vset.pattern.permute.xlu1 %v8880_v43  ;;  %v1960_v45 = vpop.permute.xlu1 %1959 }
 0x384   :  { %1686 = vperm.xlu1 %5220, %v7532_v48   ;;  %5052 = vmatpush3.bf16.msra.mxu0 %v5051_v4  ;;  %v2146_v4 = vmul.f32 %v7376_v13, %v1960_v45  ;;  %v9077_v45 = vld [vmem:[#allocation136_spill] sm:$0xff] }
 0x385   :  { %v1823_v52 = vmul.f32 %v7379_v2, %v9077_v45 }
 0x386   :  { %v2210_v32 = vadd.f32 %v2146_v4, %v1822_v38 }
 0x387   :  { %v1964_v10 = vpop.permute.xlu1 %1963 }
 0x388   :  { %5221 = vset.pattern.permute.xlu1 %v8766_v57  ;;  %v2598_v6 = vadd.f32 %v2534_v27, %v2210_v32 }
 0x389   :  { %2031 = vperm.xlu1 %5221, %v7532_v48  }
 0x38c   :  { %v2472_v5 = vpop.permute.xlu1 %2471 }
 0x38d   :  { %v2565_v0 = vmul.f32 %v7388_v22, %v2472_v5  ;;  %2035 = vperm.xlu1 %5221, %v7870_v1  }
 0x38f   :  { %v2629_v18 = vadd.f32 %v2565_v0, %v2241_v54  ;;  %v2670_v0 = vadd.f32 %v7411_v8, %v2598_v6 }
 0x391   :  { %v2701_v48 = vadd.f32 %v7411_v8, %v2629_v18  ;;  %5222 = vset.pattern.permute.xlu1 %v8781_v49  ;;  %v7876_v36 = vpop.permute.xlu1 %1516  ;;  %v2734_v18 = vmax.f32 %v2670_v0, 0.0 }
 0x392   :  { %2295 = vperm.xlu1 %5222, %v7822_v44   ;;  %v2161_v44 = vmul.f32 %v7376_v13, %v2020_v40  ;;  %v1806_v58 = vmul.f32 %v7379_v2, %v7876_v36  ;;  %v7942_v36 = vld [vmem:[%s8703_s0 + $0x3e8] sm:$0xff] }
 0x393   :  { %v2765_v63 = vmax.f32 %v2701_v48, 0.0 }
 0x394   :  { %v2225_v7 = vadd.f32 %v2161_v44, %v1837_v11 }
 0x395   :  { %v5081_v51 = vpack.c.bf16 %v2765_v63, %v2764_v35 }
 0x396   :  { %5223 = vset.pattern.permute.xlu1 %v8880_v43  ;;  %v1896_v55 = vpop.permute.xlu1 %1895 }
 0x397   :  { %1616 = vperm.xlu1 %5223, %v7547_v61   ;;  %5082 = vmatprep.subr.bf16.mxu1 %v5081_v51  ;;  %v2130_v63 = vmul.f32 %v7376_v13, %v1896_v55  ;;  %v9078_v55 = vld [vmem:[#allocation138_spill] sm:$0xff] }
 0x398   :  { %v1807_v44 = vmul.f32 %v7379_v2, %v9078_v55 }
 0x399   :  { %v2194_v33 = vadd.f32 %v2130_v63, %v1806_v58 }
 0x39a   :  { %v1900_v53 = vpop.permute.xlu1 %1899 }
 0x39b   :  { %5224 = vset.pattern.permute.xlu1 %v8766_v57  ;;  %v2582_v14 = vadd.f32 %v2518_v21, %v2194_v33 }
 0x39c   :  { %1975 = vperm.xlu1 %5224, %v7547_v61  }
 0x39f   :  { %v2408_v19 = vpop.permute.xlu1 %2407 }
 0x3a0   :  { %v2549_v29 = vmul.f32 %v7388_v22, %v2408_v19  ;;  %1979 = vperm.xlu1 %5224, %v7894_v9  }
 0x3a2   :  { %v2613_v40 = vadd.f32 %v2549_v29, %v2225_v7  ;;  %v2654_v7 = vadd.f32 %v7411_v8, %v2582_v14 }
 0x3a4   :  { %v2685_v61 = vadd.f32 %v7411_v8, %v2613_v40  ;;  %5225 = vset.pattern.permute.xlu1 %v8781_v49  ;;  %v7900_v24 = vpop.permute.xlu1 %1756  ;;  %v2718_v41 = vmax.f32 %v2654_v7, 0.0 }
 0x3a5   :  { %2487 = vperm.xlu1 %5225, %v7846_v50   ;;  %v2147_v50 = vmul.f32 %v7376_v13, %v1964_v10 }
 0x3a6   :  { %v2749_v3 = vmax.f32 %v2685_v61, 0.0 }
 0x3a7   :  { %v2211_v5 = vadd.f32 %v2147_v50, %v1823_v52 }
 0x3a8   :  { %v5083_v39 = vpack.c.bf16 %v2749_v3, %v2748_v16 }
 0x3a9   :  { %5226 = vset.pattern.permute.xlu1 %v8880_v43  ;;  %v2088_v31 = vpop.permute.xlu1 %2087 }
 0x3aa   :  { %1536 = vperm.xlu1 %5226, %v7561_v28   ;;  %5084 = vmatpush3.bf16.msra.mxu1 %v5083_v39  ;;  %v2178_v16 = vmul.f32 %v7376_v13, %v2088_v31  ;;  %v2476_v39 = vpop.permute.xlu0 %2475  ;;  %v9079_v31 = vld [vmem:[#allocation140_spill] sm:$0xff] }
 0x3ab   :  { %v2566_v4 = vmul.f32 %v7388_v22, %v2476_v39  ;;  %v1855_v32 = vmul.f32 %v7379_v2, %v9079_v31 }
 0x3ad   :  { %v2092_v20 = vpop.permute.xlu1 %2091 }
 0x3ae   :  { %5227 = vset.pattern.permute.xlu1 %v8766_v57 }
 0x3af   :  { %1911 = vperm.xlu1 %5227, %v7561_v28  }
 0x3b2   :  { %v2352_v42 = vpop.permute.xlu1 %2351 }
 0x3b3   :  { %v2535_v54 = vmul.f32 %v7388_v22, %v2352_v42  ;;  %1915 = vperm.xlu1 %5227, %v7918_v56  }
 0x3b5   :  { %v2599_v10 = vadd.f32 %v2535_v54, %v2211_v5 }
 0x3b7   :  { %v2671_v28 = vadd.f32 %v7411_v8, %v2599_v10  ;;  %5228 = vset.pattern.permute.xlu1 %v8781_v49  ;;  %v7924_v17 = vpop.permute.xlu1 %1676 }
 0x3b8   :  { %2423 = vperm.xlu1 %5228, %v7870_v1   ;;  %v2131_v1 = vmul.f32 %v7376_v13, %v1900_v53 }
 0x3b9   :  { %v2735_v48 = vmax.f32 %v2671_v28, 0.0 }
 0x3ba   :  { %v2195_v37 = vadd.f32 %v2131_v1, %v1807_v44 }
 0x3bb   :  { %v5053_v35 = vpack.c.bf16 %v2735_v48, %v2734_v18  ;;  %v1838_v48 = vmul.f32 %v7379_v2, %v7924_v17  ;;  %v7995_v17 = vld [vmem:[%s8703_s0 + $0x2f8] sm:$0xff] }
 0x3bc   :  { %5229 = vset.pattern.permute.xlu1 %v8880_v43  ;;  %v2024_v51 = vpop.permute.xlu1 %2023 }
 0x3bd   :  { %1776 = vperm.xlu1 %5229, %v7572_v60   ;;  %5054 = vmatprep.subr.bf16.mxu0 %v5053_v35  ;;  %v2162_v28 = vmul.f32 %v7376_v13, %v2024_v51  ;;  %v2412_v35 = vpop.permute.xlu0 %2411  ;;  %v9080_v51 = vld [vmem:[#allocation142_spill] sm:$0xff] }
 0x3be   :  { %v2550_v63 = vmul.f32 %v7388_v22, %v2412_v35  ;;  %v1839_v33 = vmul.f32 %v7379_v2, %v9080_v51 }
 0x3bf   :  { %v2226_v15 = vadd.f32 %v2162_v28, %v1838_v48 }
 0x3c0   :  { %v2028_v26 = vpop.permute.xlu1 %2027 }
 0x3c1   :  { %5230 = vset.pattern.permute.xlu1 %v8766_v57  ;;  %v2614_v21 = vadd.f32 %v2550_v63, %v2226_v15 }
 0x3c2   :  { %2103 = vperm.xlu1 %5230, %v7572_v60  }
 0x3c5   :  { %v2288_v11 = vpop.permute.xlu1 %2287 }
 0x3c6   :  { %v2519_v19 = vmul.f32 %v7388_v22, %v2288_v11  ;;  %2107 = vperm.xlu1 %5230, %v7942_v36  }
 0x3c8   :  { %v2583_v53 = vadd.f32 %v2519_v19, %v2195_v37 }
 0x3ca   :  { %v2655_v60 = vadd.f32 %v7411_v8, %v2583_v53  ;;  %5231 = vset.pattern.permute.xlu1 %v8781_v49  ;;  %v7948_v29 = vpop.permute.xlu1 %1606  ;;  %v1854_v8 = vmul.f32 %v7379_v2, %v7900_v24  ;;  %v7966_v24 = vld [vmem:[%s8703_s0 + $0x368] sm:$0xff] }
 0x3cb   :  { %2367 = vperm.xlu1 %5231, %v7894_v9   ;;  %v2179_v9 = vmul.f32 %v7376_v13, %v2092_v20 }
 0x3cc   :  { %v2719_v40 = vmax.f32 %v2655_v60, 0.0  ;;  %v2242_v34 = vadd.f32 %v2178_v16, %v1854_v8 }
 0x3cd   :  { %v2243_v45 = vadd.f32 %v2179_v9, %v1855_v32 }
 0x3ce   :  { %v5055_v61 = vpack.c.bf16 %v2719_v40, %v2718_v41  ;;  %v2630_v27 = vadd.f32 %v2566_v4, %v2242_v34  ;;  %v1824_v41 = vmul.f32 %v7379_v2, %v7948_v29  ;;  %v2356_v40 = vpop.permute.xlu0 %2355  ;;  %v8019_v29 = vld [vmem:[%s8703_s0 + $0x278] sm:$0xff] }
 0x3cf   :  { %5232 = vset.pattern.permute.xlu1 %v8880_v43  ;;  %v1968_v3 = vpop.permute.xlu1 %1967 }
 0x3d0   :  { %1696 = vperm.xlu1 %5232, %v7584_v62   ;;  %5056 = vmatpush3.bf16.msra.mxu0 %v5055_v61  ;;  %v2148_v53 = vmul.f32 %v7376_v13, %v1968_v3  ;;  %v2536_v61 = vmul.f32 %v7388_v22, %v2356_v40  ;;  %v9081_v3 = vld [vmem:[#allocation144_spill] sm:$0xff] }
 0x3d1   :  { %v1825_v39 = vmul.f32 %v7379_v2, %v9081_v3 }
 0x3d2   :  { %v2212_v16 = vadd.f32 %v2148_v53, %v1824_v41 }
 0x3d3   :  { %v1972_v38 = vpop.permute.xlu1 %1971 }
 0x3d4   :  { %5233 = vset.pattern.permute.xlu1 %v8766_v57  ;;  %v2600_v4 = vadd.f32 %v2536_v61, %v2212_v16 }
 0x3d5   :  { %2039 = vperm.xlu1 %5233, %v7584_v62   ;;  %v7972_v62 = vld [vmem:[%s8705_s2 + $0x1] ss:$0 sm:$0xff] }
 0x3d6   :  { %v2702_v20 = vadd.f32 %v7972_v62, %v2630_v27  ;;  %v2686_v14 = vadd.f32 %v7972_v62, %v2614_v21 }
 0x3d8   :  { %v2480_v50 = vpop.permute.xlu1 %2479  ;;  %v2766_v54 = vmax.f32 %v2702_v20, 0.0  ;;  %v2750_v37 = vmax.f32 %v2686_v14, 0.0 }
 0x3d9   :  { %v2567_v52 = vmul.f32 %v7388_v22, %v2480_v50  ;;  %2043 = vperm.xlu1 %5233, %v7966_v24  }
 0x3db   :  { %v2631_v6 = vadd.f32 %v2567_v52, %v2243_v45  ;;  %v4453_v52 = vld [vmem:[%s8703_s0 + $0x3f0] sm:$0xff] }
 0x3dd   :  { %v2703_v42 = vadd.f32 %v7972_v62, %v2631_v6  ;;  %5234 = vset.pattern.permute.xlu1 %v8781_v49  ;;  %v7977_v5 = vpop.permute.xlu1 %1526 }
 0x3de   :  { %2303 = vperm.xlu1 %5234, %v7918_v56   ;;  %v2163_v56 = vmul.f32 %v7376_v13, %v2028_v26 }
 0x3df   :  { %v2767_v0 = vmax.f32 %v2703_v42, 0.0 }
 0x3e0   :  { %v2227_v55 = vadd.f32 %v2163_v56, %v1839_v33 }
 0x3e1   :  { %v5085_v10 = vpack.c.bf16 %v2767_v0, %v2766_v54  ;;  %v1808_v54 = vmul.f32 %v7379_v2, %v7977_v5 }
 0x3e2   :  { %5235 = vset.pattern.permute.xlu1 %v8880_v43  ;;  %v1904_v18 = vpop.permute.xlu1 %1903 }
 0x3e3   :  { %1626 = vperm.xlu1 %5235, %v7596_v47   ;;  %5086 = vmatprep.subr.bf16.mxu1 %v5085_v10  ;;  %v2132_v20 = vmul.f32 %v7376_v13, %v1904_v18  ;;  %v9082_v18 = vld [vmem:[#allocation146_spill] sm:$0xff] }
 0x3e4   :  { %v1809_v35 = vmul.f32 %v7379_v2, %v9082_v18 }
 0x3e5   :  { %v2196_v0 = vadd.f32 %v2132_v20, %v1808_v54  ;;  %v2784_v20 = vld [vmem:[%s8706_s3 + $0x50] sm:$0xff] }
 0x3e6   :  { %v1908_v58 = vpop.permute.xlu1 %1907 }
 0x3e7   :  { %5236 = vset.pattern.permute.xlu1 %v8766_v57  ;;  %v2133_v48 = vmul.f32 %v7376_v13, %v1908_v58 }
 0x3e8   :  { %1983 = vperm.xlu1 %5236, %v7596_v47  }
 0x3e9   :  { %v2197_v56 = vadd.f32 %v2133_v48, %v1809_v35  ;;  %v2792_v35 = vld [vmem:[%s8706_s3 + $0x90] sm:$0xf] }
 0x3eb   :  { %v2416_v1 = vpop.permute.xlu1 %2415 }
 0x3ec   :  { %v2551_v44 = vmul.f32 %v7388_v22, %v2416_v1  ;;  %1987 = vperm.xlu1 %5236, %v7995_v17  }
 0x3ee   :  { %v2615_v26 = vadd.f32 %v2551_v44, %v2227_v55  ;;  %v4437_v44 = vld [vmem:[%s8703_s0 + $0x370] sm:$0xff] }
 0x3f0   :  { %v2687_v47 = vadd.f32 %v7972_v62, %v2615_v26  ;;  %5237 = vset.pattern.permute.xlu1 %v8781_v49  ;;  %v8001_v11 = vpop.permute.xlu1 %1766 }
 0x3f1   :  { %2495 = vperm.xlu1 %5237, %v7942_v36   ;;  %v2149_v36 = vmul.f32 %v7376_v13, %v1972_v38  ;;  %v2672_v38 = vadd.f32 %v7972_v62, %v2600_v4 }
 0x3f2   :  { %v2751_v19 = vmax.f32 %v2687_v47, 0.0  ;;  %v1856_v47 = vmul.f32 %v7379_v2, %v8001_v11 }
 0x3f3   :  { %v2213_v9 = vadd.f32 %v2149_v36, %v1825_v39  ;;  %v2736_v45 = vmax.f32 %v2672_v38, 0.0 }
 0x3f4   :  { %v5087_v7 = vpack.c.bf16 %v2751_v19, %v2750_v37 }
 0x3f5   :  { %5238 = vset.pattern.permute.xlu1 %v8880_v43  ;;  %v2096_v60 = vpop.permute.xlu1 %2095 }
 0x3f6   :  { %1546 = vperm.xlu1 %5238, %v7607_v25   ;;  %5088 = vmatpush3.bf16.msra.mxu1 %v5087_v7 }
 0x3f9   :  { %v2100_v8 = vpop.permute.xlu1 %2099 }
 0x3fa   :  { %5239 = vset.pattern.permute.xlu1 %v8766_v57  ;;  %v2181_v53 = vmul.f32 %v7376_v13, %v2100_v8 }
 0x3fb   :  { %1919 = vperm.xlu1 %5239, %v7607_v25  }
 0x3fe   :  { %v2360_v34 = vpop.permute.xlu1 %2359 }
 0x3ff   :  { %v2537_v31 = vmul.f32 %v7388_v22, %v2360_v34  ;;  %1923 = vperm.xlu1 %5239, %v8019_v29  }
 0x401   :  { %v2601_v32 = vadd.f32 %v2537_v31, %v2213_v9 }
 0x403   :  { %v2673_v25 = vadd.f32 %v7972_v62, %v2601_v32  ;;  %5240 = vset.pattern.permute.xlu1 %v8781_v49  ;;  %v8025_v27 = vpop.permute.xlu1 %1686 }
 0x404   :  { %2431 = vperm.xlu1 %5240, %v7966_v24   ;;  %v2292_v24 = vpop.permute.xlu0 %2291 }
 0x405   :  { %v2737_v50 = vmax.f32 %v2673_v25, 0.0  ;;  %v2520_v28 = vmul.f32 %v7388_v22, %v2292_v24  ;;  %v2791_v25 = vld [vmem:[%s8706_s3 + $0x88] sm:$0xf] }
 0x406   :  { %v2779_v24 = vld [vmem:[%s8706_s3 + $0x28] sm:$0xff] }
 0x407   :  { %v5057_v6 = vpack.c.bf16 %v2737_v50, %v2736_v45  ;;  %v2584_v63 = vadd.f32 %v2520_v28, %v2196_v0  ;;  %v2790_v45 = vld [vmem:[%s8706_s3 + $0x80] sm:$0xf] }
 0x408   :  { %5241 = vset.pattern.permute.xlu1 %v8880_v43  ;;  %v2032_v42 = vpop.permute.xlu1 %2031  ;;  %v2484_v19 = vpop.permute.xlu0 %2483 }
 0x409   :  { %1786 = vperm.xlu1 %5241, %v4453_v52   ;;  %5058 = vmatprep.subr.bf16.mxu0 %v5057_v6  ;;  %v2656_v5 = vadd.f32 %v7972_v62, %v2584_v63  ;;  %v2568_v7 = vmul.f32 %v7388_v22, %v2484_v19  ;;  %v2164_v9 = vmul.f32 %v7376_v13, %v2032_v42  ;;  %v9084_v42 = vld [vmem:[#allocation149_spill] sm:$0xff] }
 0x40a   :  { %v1841_v54 = vmul.f32 %v7379_v2, %v9084_v42  ;;  %v9086_v42 = vld [vmem:[#allocation156_spill] sm:$0xff] }
 0x40b   :  { %v2720_v58 = vmax.f32 %v2656_v5, 0.0  ;;  %v2781_v5 = vld [vmem:[%s8706_s3 + $0x38] sm:$0xff] }
 0x40c   :  { %v8035_v10 = vpop.permute.xlu1 %2035  ;;  %v2420_v50 = vpop.permute.xlu0 %2419 }
 0x40d   :  { %5242 = vset.pattern.permute.xlu1 %v8766_v57  ;;  %v2165_v6 = vmul.f32 %v7376_v13, %v8035_v10  ;;  %v2793_v10 = vld [vmem:[%s8706_s3 + $0x98] sm:$0xf] }
 0x40e   :  { %2111 = vperm.xlu1 %5242, %v4453_v52  }
 0x40f   :  { %v2229_v48 = vadd.f32 %v2165_v6, %v1841_v54  ;;  %v1811_v54 = vmul.f32 %v7379_v2, %v9086_v42 }
 0x411   :  { %v2296_v15 = vpop.permute.xlu1 %2295 }
 0x412   :  { %v2521_v51 = vmul.f32 %v7388_v22, %v2296_v15  ;;  %2115 = vperm.xlu1 %5242, %v7626_v23   ;;  %v2180_v23 = vmul.f32 %v7376_v13, %v2096_v60  ;;  %v9083_v60 = vld [vmem:[#allocation147_spill] sm:$0xff] }
 0x413   :  { %v1857_v41 = vmul.f32 %v7379_v2, %v9083_v60  ;;  %v4709_v60 = vpop.f32.mrb[0].mxu1 }
 0x414   :  { %v2585_v33 = vadd.f32 %v2521_v51, %v2197_v56  ;;  %v2244_v37 = vadd.f32 %v2180_v23, %v1856_v47 }
 0x415   :  { %v2245_v16 = vadd.f32 %v2181_v53, %v1857_v41  ;;  %v4668_v53 = vpop.f32.mrb[0].mxu0 }
 0x416   :  { %v2657_v21 = vadd.f32 %v7972_v62, %v2585_v33  ;;  %5243 = vset.pattern.permute.xlu1 %v8781_v49  ;;  %v8047_v1 = vpop.permute.xlu1 %1616  ;;  %v2632_v40 = vadd.f32 %v2568_v7, %v2244_v37  ;;  %v2364_v37 = vpop.permute.xlu0 %2363 }
 0x417   :  { %2375 = vperm.xlu1 %5243, %v7995_v17   ;;  %v2538_v19 = vmul.f32 %v7388_v22, %v2364_v37  ;;  %v4669_v41 = vpop.f32.mrb[1].mxu0 }
 0x418   :  { %v2721_v55 = vmax.f32 %v2657_v21, 0.0  ;;  %v2704_v3 = vadd.f32 %v7972_v62, %v2632_v40  ;;  %v4710_v40 = vpop.f32.mrb[1].mxu1 }
 0x41a   :  { %v5059_v14 = vpack.c.bf16 %v2721_v55, %v2720_v58  ;;  %v2768_v4 = vmax.f32 %v2704_v3, 0.0 }
 0x41b   :  { %5244 = vset.pattern.permute.xlu1 %v8880_v43  ;;  %v8055_v26 = vpop.permute.xlu1 %1975 }
 0x41c   :  { %1706 = vperm.xlu1 %5244, %v4437_v44   ;;  %5060 = vmatpush3.bf16.msra.mxu0 %v5059_v14  ;;  %v2150_v55 = vmul.f32 %v7376_v13, %v8055_v26  ;;  %v1826_v14 = vmul.f32 %v7379_v2, %v8047_v1 }
 0x41e   :  { %v2214_v23 = vadd.f32 %v2150_v55, %v1826_v14 }
 0x41f   :  { %v8059_v17 = vpop.permute.xlu1 %1979 }
 0x420   :  { %5246 = vset.pattern.permute.xlu1 %v8766_v57  ;;  %v2151_v7 = vmul.f32 %v7376_v13, %v8059_v17 }
 0x421   :  { %2047 = vperm.xlu1 %5246, %v4437_v44  }
 0x424   :  { %v2488_v61 = vpop.permute.xlu1 %2487 }
 0x425   :  { %v2569_v36 = vmul.f32 %v7388_v22, %v2488_v61  ;;  %2051 = vperm.xlu1 %5246, %v7635_v46   ;;  %v2783_v46 = vld [vmem:[%s8706_s3 + $0x48] sm:$0xff]  ;;  %v9085_v61 = vld [vmem:[#allocation152_spill] sm:$0xff] }
 0x426   :  { %2867 = vmatprep.mubr.f32.mxu0 %v2783_v46  ;;  %v1827_v26 = vmul.f32 %v7379_v2, %v9085_v61 }
 0x427   :  { %v2633_v11 = vadd.f32 %v2569_v36, %v2245_v16  ;;  %v2602_v16 = vadd.f32 %v2538_v19, %v2214_v23  ;;  %v4670_v36 = vadd.f32 %v4669_v41, %v4668_v53  ;;  %v9087_v23 = vld [vmem:[#allocation158_spill] sm:$0xff] }
 0x428   :  { %v2215_v1 = vadd.f32 %v2151_v7, %v1827_v26  ;;  %v1859_v37 = vmul.f32 %v7379_v2, %v9087_v23 }
 0x429   :  { %v2705_v57 = vadd.f32 %v7972_v62, %v2633_v11  ;;  %5247 = vset.pattern.permute.xlu1 %v8781_v49  ;;  %v8071_v39 = vpop.permute.xlu1 %1536  ;;  %v2782_v49 = vld [vmem:[%s8706_s3 + $0x40] sm:$0xff]  ;;  %v4711_v11 = vadd.f32 %v4710_v40, %v4709_v60 }
 0x42a   :  { %2311 = vperm.xlu1 %5247, %v8019_v29   ;;  %v1840_v29 = vmul.f32 %v7379_v2, %v8025_v27  ;;  %2868 = vmatmul.mubr.f32.gmra.mrb[2].mxu0 %v2782_v49  ;;  %v2552_v27 = vmul.f32 %v7388_v22, %v2420_v50  ;;  %v1810_v50 = vmul.f32 %v7379_v2, %v8071_v39 }
 0x42b   :  { %v2769_v8 = vmax.f32 %v2705_v57, 0.0  ;;  %2872 = vmatprep.mubr.f32.mxu0 %v2791_v25 }
 0x42c   :  { %v2228_v32 = vadd.f32 %v2164_v9, %v1840_v29 }
 0x42d   :  { %v5089_v34 = vpack.c.bf16 %v2769_v8, %v2768_v4  ;;  %v8129_v8 = vadd.f32 %v4711_v11, %v4670_v36 }
 0x42e   :  { %2499 = vperm.xlu1 %5247, %v4453_v52   ;;  %v8075_v31 = vpop.permute.xlu1 %1911  ;;  %v2785_v52 = vld [vmem:[%s8706_s3 + $0x58] sm:$0xff]  ;;  %2873 = vmatmul.mubr.f32.gmra.mrb[4].mxu0 %v2790_v45  ;;  %v2616_v0 = vadd.f32 %v2552_v27, %v2228_v32  ;;  %v2300_v27 = vpop.permute.xlu0 %2299 }
 0x42f   :  { %5090 = vmatprep.subr.bf16.mxu1 %v5089_v34  ;;  %2947 = vmatprep.mubr.f32.mxu1 %v2785_v52  ;;  %v2674_v34 = vadd.f32 %v7972_v62, %v2602_v16  ;;  %v2134_v32 = vmul.f32 %v7376_v13, %v8075_v31  ;;  %v2522_v6 = vmul.f32 %v7388_v22, %v2300_v27 }
 0x430   :  { %2948 = vmatmul.mubr.f32.gmra.mrb[2].mxu1 %v2784_v20  ;;  %3022 = vmatprep.mubr.f32.mxu0 %v2779_v24  ;;  %v2688_v63 = vadd.f32 %v7972_v62, %v2616_v0 }
 0x431   :  { %2952 = vmatprep.mubr.f32.mxu1 %v2793_v10  ;;  %v2738_v49 = vmax.f32 %v2674_v34, 0.0  ;;  %v2198_v45 = vadd.f32 %v2134_v32, %v1810_v50 }
 0x432   :  { %2435 = vperm.xlu1 %5247, %v4437_v44   ;;  %v8085_v38 = vpop.permute.xlu1 %1915  ;;  %v2752_v33 = vmax.f32 %v2688_v63, 0.0 }
 0x433   :  { %v2135_v20 = vmul.f32 %v7376_v13, %v8085_v38  ;;  %v2586_v0 = vadd.f32 %v2522_v6, %v2198_v45 }
 0x434   :  { %2953 = vmatmul.mubr.f32.gmra.mrb[4].mxu1 %v2792_v35 }
 0x435   :  { %3102 = vmatprep.mubr.f32.mxu1 %v2781_v5  ;;  %v2658_v10 = vadd.f32 %v7972_v62, %v2586_v0 }
 0x437   :  { %v2424_v28 = vpop.permute.xlu1 %2423  ;;  %v2722_v35 = vmax.f32 %v2658_v10, 0.0 }
 0x438   :  { %v2553_v18 = vmul.f32 %v7388_v22, %v2424_v28  ;;  %v2199_v28 = vadd.f32 %v2135_v20, %v1811_v54 }
 0x43a   :  { %v2617_v15 = vadd.f32 %v2553_v18, %v2229_v48 }
 0x43c   :  { %v2689_v56 = vadd.f32 %v7972_v62, %v2617_v15  ;;  %v1777_v51 = vpop.permute.xlu1 %1776 }
 0x43d   :  { %v1858_v5 = vmul.f32 %v7379_v2, %v1777_v51 }
 0x43e   :  { %v2753_v21 = vmax.f32 %v2689_v56, 0.0 }
 0x440   :  { %v5091_v58 = vpack.c.bf16 %v2753_v21, %v2752_v33 }
 0x441   :  { %v2104_v44 = vpop.permute.xlu1 %2103 }
 0x442   :  { %5092 = vmatpush3.bf16.msra.mxu1 %v5091_v58  ;;  %v2182_v56 = vmul.f32 %v7376_v13, %v2104_v44  ;;  %v2492_v58 = vpop.permute.xlu0 %2491 }
 0x443   :  { %v2570_v55 = vmul.f32 %v7388_v22, %v2492_v58 }
 0x444   :  { %v2246_v33 = vadd.f32 %v2182_v56, %v1858_v5 }
 0x445   :  { %v2108_v47 = vpop.permute.xlu1 %2107 }
 0x446   :  { %v2183_v14 = vmul.f32 %v7376_v13, %v2108_v47  ;;  %v2634_v19 = vadd.f32 %v2570_v55, %v2246_v33 }
 0x448   :  { %v2247_v53 = vadd.f32 %v2183_v14, %v1859_v37  ;;  %v2706_v41 = vadd.f32 %v7972_v62, %v2634_v19 }
 0x44a   :  { %v2368_v3 = vpop.permute.xlu1 %2367  ;;  %v2770_v26 = vmax.f32 %v2706_v41, 0.0 }
 0x44b   :  { %v2539_v57 = vmul.f32 %v7388_v22, %v2368_v3 }
 0x44d   :  { %v2603_v4 = vadd.f32 %v2539_v57, %v2215_v1  ;;  %v2428_v57 = vpop.permute.xlu0 %2427 }
 0x44f   :  { %v2675_v17 = vadd.f32 %v7972_v62, %v2603_v4  ;;  %v1697_v9 = vpop.permute.xlu1 %1696  ;;  %v2554_v4 = vmul.f32 %v7388_v22, %v2428_v57 }
 0x450   :  { %v1842_v11 = vmul.f32 %v7379_v2, %v1697_v9 }
 0x451   :  { %v2739_v46 = vmax.f32 %v2675_v17, 0.0  ;;  %v9088_v17 = vld [vmem:[#allocation11_spill] sm:$0xff] }
 0x453   :  { %v5061_v29 = vpack.c.bf16 %v2739_v46, %v2738_v49  ;;  %v1843_v46 = vmul.f32 %v7379_v2, %v9088_v17 }
 0x454   :  { %v2040_v25 = vpop.permute.xlu1 %2039 }
 0x455   :  { %5062 = vmatprep.subr.bf16.mxu0 %v5061_v29  ;;  %v2166_v36 = vmul.f32 %v7376_v13, %v2040_v25 }
 0x457   :  { %v2230_v3 = vadd.f32 %v2166_v36, %v1842_v11 }
 0x458   :  { %v2044_v52 = vpop.permute.xlu1 %2043 }
 0x459   :  { %v2167_v34 = vmul.f32 %v7376_v13, %v2044_v52  ;;  %v2618_v49 = vadd.f32 %v2554_v4, %v2230_v3 }
 0x45b   :  { %v2231_v32 = vadd.f32 %v2167_v34, %v1843_v46  ;;  %v2690_v25 = vadd.f32 %v7972_v62, %v2618_v49  ;;  %v1845_v34 = vmul.f32 %v7379_v2, %v6806_v12 }
 0x45d   :  { %v2304_v24 = vpop.permute.xlu1 %2303  ;;  %v2754_v6 = vmax.f32 %v2690_v25, 0.0 }
 0x45e   :  { %v2523_v31 = vmul.f32 %v7388_v22, %v2304_v24 }
 0x460   :  { %v2587_v48 = vadd.f32 %v2523_v31, %v2199_v28  ;;  %v2372_v31 = vpop.permute.xlu0 %2371 }
 0x461   :  { %v2540_v10 = vmul.f32 %v7388_v22, %v2372_v31 }
 0x462   :  { %v2659_v39 = vadd.f32 %v7972_v62, %v2587_v48  ;;  %v1627_v18 = vpop.permute.xlu1 %1626 }
 0x463   :  { %v1828_v0 = vmul.f32 %v7379_v2, %v1627_v18 }
 0x464   :  { %v2723_v63 = vmax.f32 %v2659_v39, 0.0  ;;  %v9089_v39 = vld [vmem:[#allocation14_spill] sm:$0xff]  ;;  %v2308_v23 = vpop.permute.xlu0 %2307 }
 0x466   :  { %v5063_v15 = vpack.c.bf16 %v2723_v63, %v2722_v35  ;;  %v1829_v35 = vmul.f32 %v7379_v2, %v9089_v39 }
 0x467   :  { %v1984_v38 = vpop.permute.xlu1 %1983 }
 0x468   :  { %5064 = vmatpush3.bf16.msra.mxu0 %v5063_v15  ;;  %v2152_v54 = vmul.f32 %v7376_v13, %v1984_v38 }
 0x46a   :  { %v2216_v24 = vadd.f32 %v2152_v54, %v1828_v0 }
 0x46b   :  { %v1988_v21 = vpop.permute.xlu1 %1987 }
 0x46c   :  { %v2153_v48 = vmul.f32 %v7376_v13, %v1988_v21  ;;  %v2604_v63 = vadd.f32 %v2540_v10, %v2216_v24 }
 0x46e   :  { %v2217_v56 = vadd.f32 %v2153_v48, %v1829_v35  ;;  %v2676_v33 = vadd.f32 %v7972_v62, %v2604_v63  ;;  %v5250_v48 = vld [vmem:[%s8707_s4 + $0x4] ss:$8 sps:$4 sm:$0xff]  }
 0x470   :  { %v2496_v7 = vpop.permute.xlu1 %2495  ;;  %v2740_v14 = vmax.f32 %v2676_v33, 0.0  ;;  %v2787_v33 = vld [vmem:[%s8706_s3 + $0x68] sm:$0xff] }
 0x471   :  { %v2571_v60 = vmul.f32 %v7388_v22, %v2496_v7 }
 0x473   :  { %v2635_v44 = vadd.f32 %v2571_v60, %v2247_v53 }
 0x475   :  { %v2707_v51 = vadd.f32 %v7972_v62, %v2635_v44  ;;  %v1547_v40 = vpop.permute.xlu1 %1546  ;;  %v2504_v44 = vpop.permute.xlu0 %2503 }
 0x476   :  { %v1812_v7 = vmul.f32 %v7379_v2, %v1547_v40  ;;  %v2573_v57 = vmul.f32 %v7388_v22, %v2504_v44  ;;  %v2780_v44 = vld [vmem:[%s8706_s3 + $0x30] sm:$0xff] }
 0x477   :  { %v2771_v61 = vmax.f32 %v2707_v51, 0.0  ;;  %v9090_v51 = vld [vmem:[#allocation40_spill] sm:$0xff] }
 0x479   :  { %v5093_v16 = vpack.c.bf16 %v2771_v61, %v2770_v26  ;;  %v1861_v61 = vmul.f32 %v7379_v2, %v9090_v51  ;;  %v2524_v26 = vmul.f32 %v7388_v22, %v2308_v23  ;;  %v2440_v17 = vpop.permute.xlu0 %2439  ;;  %v2789_v51 = vld [vmem:[%s8706_s3 + $0x78] sm:$0xff] }
 0x47a   :  { %v1920_v47 = vpop.permute.xlu1 %1919 }
 0x47b   :  { %5094 = vmatprep.subr.bf16.mxu1 %v5093_v16  ;;  %v2136_v37 = vmul.f32 %v7376_v13, %v1920_v47  ;;  %v9091_v47 = vld [vmem:[#allocation21_spill] sm:$0xff] }
 0x47c   :  { %v1813_v3 = vmul.f32 %v7379_v2, %v9091_v47  ;;  %v2797_v47 = vld [vmem:[%s8706_s3 + $0xb8] sm:$0xf] }
 0x47d   :  { %v2200_v53 = vadd.f32 %v2136_v37, %v1812_v7  ;;  %v2786_v37 = vld [vmem:[%s8706_s3 + $0x60] sm:$0xff] }
 0x47e   :  { %v1924_v1 = vpop.permute.xlu1 %1923 }
 0x47f   :  { %v2137_v16 = vmul.f32 %v7376_v13, %v1924_v1  ;;  %v2588_v36 = vadd.f32 %v2524_v26, %v2200_v53  ;;  %v5256_v53 = vld [vmem:[%s8707_s4 + $0x24] ss:$8 sps:$4 sm:$0xff]   ;;  %v5265_v26 = vld [vmem:[%s8707_s4 + $0x94] ss:$8 sps:$4 sm:$0xff]  }
 0x481   :  { %v2201_v46 = vadd.f32 %v2137_v16, %v1813_v3  ;;  %v2660_v1 = vadd.f32 %v7972_v62, %v2588_v36  ;;  %v5262_v16 = vld [vmem:[%s8707_s4 + $0x34] ss:$8 sps:$4 sm:$0xff]   ;;  %v5260_v3 = vld [vmem:[%s8707_s4 + $0x30] ss:$8 sps:$4 sm:$0xff]  }
 0x482   :  { %v2788_v36 = vld [vmem:[%s8706_s3 + $0x70] sm:$0xff] }
 0x483   :  { %v2432_v29 = vpop.permute.xlu1 %2431 }
 0x484   :  { %v2555_v50 = vmul.f32 %v7388_v22, %v2432_v29 }
 0x486   :  { %v2619_v45 = vadd.f32 %v2555_v50, %v2231_v32 }
 0x488   :  { %v2691_v9 = vadd.f32 %v7972_v62, %v2619_v45  ;;  %v1787_v27 = vpop.permute.xlu1 %1786 }
 0x489   :  { %v1860_v50 = vmul.f32 %v7379_v2, %v1787_v27 }
 0x48a   :  { %v2755_v20 = vmax.f32 %v2691_v9, 0.0  ;;  %v2557_v9 = vmul.f32 %v7388_v22, %v2440_v17 }
 0x48c   :  { %v5095_v42 = vpack.c.bf16 %v2755_v20, %v2754_v6 }
 0x48d   :  { %v2112_v52 = vpop.permute.xlu1 %2111 }
 0x48e   :  { %5096 = vmatpush3.bf16.msra.mxu1 %v5095_v42  ;;  %v2184_v49 = vmul.f32 %v7376_v13, %v2112_v52  ;;  %v2724_v52 = vmax.f32 %v2660_v1, 0.0 }
 0x490   :  { %v2248_v20 = vadd.f32 %v2184_v49, %v1860_v50  ;;  %v5271_v50 = vld [vmem:[%s8707_s4 + $0xa4] ss:$8 sps:$4 sm:$0xff]  }
 0x491   :  { %v2116_v28 = vpop.permute.xlu1 %2115 }
 0x492   :  { %v2185_v60 = vmul.f32 %v7376_v13, %v2116_v28 }
 0x494   :  { %v2249_v11 = vadd.f32 %v2185_v60, %v1861_v61  ;;  %v2794_v60 = vld [vmem:[%s8706_s3 + $0xa0] sm:$0xf] }
 0x495   :  { %v5254_v61 = vld [vmem:[%s8707_s4 + $0x20] ss:$8 sps:$4 sm:$0xff]  }
 0x496   :  { %v2376_v15 = vpop.permute.xlu1 %2375  ;;  %v2637_v32 = vadd.f32 %v2573_v57, %v2249_v11  ;;  %v5263_v11 = vld [vmem:[%s8707_s4 + $0x90] ss:$8 sps:$4 sm:$0xff]  }
 0x497   :  { %v2541_v5 = vmul.f32 %v7388_v22, %v2376_v15 }
 0x498   :  { %v2709_v0 = vadd.f32 %v7972_v62, %v2637_v32  ;;  %v5268_v32 = vld [vmem:[%s8707_s4 + $0x44] ss:$8 sps:$4 sm:$0xff]  }
 0x499   :  { %v2605_v38 = vadd.f32 %v2541_v5, %v2217_v56 }
 0x49b   :  { %v2677_v18 = vadd.f32 %v7972_v62, %v2605_v38  ;;  %v1707_v58 = vpop.permute.xlu1 %1706  ;;  %v2773_v38 = vmax.f32 %v2709_v0, 0.0  ;;  %v5275_v0 = vld [vmem:[%s8707_s4 + $0xb0] ss:$8 sps:$4 sm:$0xff]  }
 0x49c   :  { %v1844_v24 = vmul.f32 %v7379_v2, %v1707_v58  ;;  %v2778_v2 = vld [vmem:[%s8706_s3 + $0x20] sm:$0xff] }
 0x49d   :  { %v2741_v55 = vmax.f32 %v2677_v18, 0.0  ;;  %v5248_v18 = vld [vmem:[%s8707_s4] ss:$8 sps:$4 sm:$0xff]  }
 0x49f   :  { %v5065_v21 = vpack.c.bf16 %v2741_v55, %v2740_v14  ;;  %v5253_v55 = vld [vmem:[%s8707_s4 + $0x14] ss:$8 sps:$4 sm:$0xff]  }
 0x4a0   :  { %v2048_v19 = vpop.permute.xlu1 %2047 }
 0x4a1   :  { %5066 = vmatprep.subr.bf16.mxu0 %v5065_v21  ;;  %v2168_v42 = vmul.f32 %v7376_v13, %v2048_v19  ;;  %v2795_v21 = vld [vmem:[%s8706_s3 + $0xa8] sm:$0xf]  ;;  %v5259_v19 = vld [vmem:[%s8707_s4 + $0x84] ss:$8 sps:$4 sm:$0xff]  }
 0x4a3   :  { %v2232_v39 = vadd.f32 %v2168_v42, %v1844_v24  ;;  %v5274_v42 = vld [vmem:[%s8707_s4 + $0x54] ss:$8 sps:$4 sm:$0xff]  }
 0x4a4   :  { %v2052_v41 = vpop.permute.xlu1 %2051 }
 0x4a5   :  { %v2169_v40 = vmul.f32 %v7376_v13, %v2052_v41  ;;  %v5257_v41 = vld [vmem:[%s8707_s4 + $0x80] ss:$8 sps:$4 sm:$0xff]  }
 0x4a7   :  { %v2233_v25 = vadd.f32 %v2169_v40, %v1845_v34  ;;  %v2796_v40 = vld [vmem:[%s8706_s3 + $0xb0] sm:$0xf] }
 0x4a9   :  { %v2312_v4 = vpop.permute.xlu1 %2311  ;;  %v2621_v28 = vadd.f32 %v2557_v9, %v2233_v25 }
 0x4aa   :  { %v2525_v29 = vmul.f32 %v7388_v22, %v2312_v4 }
 0x4ab   :  { %v2693_v15 = vadd.f32 %v7972_v62, %v2621_v28  ;;  %v5280_v28 = vld [vmem:[%s8707_s4 + $0x64] ss:$8 sps:$4 sm:$0xff]  }
 0x4ac   :  { %v2589_v45 = vadd.f32 %v2525_v29, %v2201_v46 }
 0x4ad   :  { %v2500_v6 = vpop.permute.xlu1 %2499  ;;  %v2757_v14 = vmax.f32 %v2693_v15, 0.0  ;;  %v5290_v15 = vld [vmem:[%s8707_s4 + $0xe0] ss:$8 sps:$4 sm:$0xff]  }
 0x4ae   :  { %v2661_v12 = vadd.f32 %v7972_v62, %v2589_v45  ;;  %v2572_v54 = vmul.f32 %v7388_v22, %v2500_v6  ;;  %v5269_v45 = vld [vmem:[%s8707_s4 + $0xa0] ss:$8 sps:$4 sm:$0xff]  }
 0x4b0   :  { %v2725_v31 = vmax.f32 %v2661_v12, 0.0  ;;  %v2636_v27 = vadd.f32 %v2572_v54, %v2248_v20  ;;  %v5277_v12 = vld [vmem:[%s8707_s4 + $0xb4] ss:$8 sps:$4 sm:$0xff]  }
 0x4b1   :  { %v2436_v10 = vpop.permute.xlu1 %2435 }
 0x4b2   :  { %v5067_v35 = vpack.c.bf16 %v2725_v31, %v2724_v52  ;;  %v2708_v13 = vadd.f32 %v7972_v62, %v2636_v27  ;;  %v2556_v63 = vmul.f32 %v7388_v22, %v2436_v10  ;;  %v5272_v52 = vld [vmem:[%s8707_s4 + $0x50] ss:$8 sps:$4 sm:$0xff]   ;;  %v5283_v31 = vld [vmem:[%s8707_s4 + $0xc4] ss:$8 sps:$4 sm:$0xff]   ;;  %v5278_v27 = vld [vmem:[%s8707_s4 + $0x60] ss:$8 sps:$4 sm:$0xff]  }
 0x4b3   :  { %v5281_v10 = vld [vmem:[%s8707_s4 + $0xc0] ss:$8 sps:$4 sm:$0xff]  }
 0x4b4   :  { %v2772_v56 = vmax.f32 %v2708_v13, 0.0  ;;  %v2620_v5 = vadd.f32 %v2556_v63, %v2232_v39  ;;  %5068 = vmatpush3.bf16.msra.mxu0 %v5067_v35  ;;  %v5289_v39 = vld [vmem:[%s8707_s4 + $0xd4] ss:$8 sps:$4 sm:$0xff]   ;;  %v5284_v35 = vld [vmem:[%s8707_s4 + $0x70] ss:$8 sps:$4 sm:$0xff]  }
 0x4b5   :  { %3227 = vmatprep.subr.bf16.mxu0 %v5250_v48  ;;  %v5286_v48 = vld [vmem:[%s8707_s4 + $0x74] ss:$8 sps:$4 sm:$0xff]   ;;  %v5287_v13 = vld [vmem:[%s8707_s4 + $0xd0] ss:$8 sps:$4 sm:$0xff]   ;;  %v5292_v63 = vld [vmem:[%s8707_s4 + $0xe4] ss:$8 sps:$4 sm:$0xff]  }
 0x4b6   :  { %v2692_v22 = vadd.f32 %v7972_v62, %v2620_v5  ;;  %v5097_v58 = vpack.c.bf16 %v2773_v38, %v2772_v56  ;;  %v5251_v62 = vld [vmem:[%s8707_s4 + $0x10] ss:$8 sps:$4 sm:$0xff]   ;;  %v5295_v56 = vld [vmem:[%s8707_s4 + $0xf4] ss:$8 sps:$4 sm:$0xff]  }
 0x4b7   :  { %3023 = vmatmul.mubr.f32.vlgmr.msra.gmra.mrb[6].mxu0 %v2778_v2  ;;  %v5293_v5 = vld [vmem:[%s8707_s4 + $0xf0] ss:$8 sps:$4 sm:$0xff]   ;;  %v5296_v2 = vld [vmem:[%s8709_s6 + $0x40] sm:$0xff]  }
 0x4b8   :  { %v2756_v23 = vmax.f32 %v2692_v22, 0.0  ;;  %5098 = vmatprep.subr.bf16.mxu1 %v5097_v58  ;;  %3027 = vmatprep.mubr.f32.mxu0 %v2787_v33 }
 0x4b9   :  { %3228 = vmatpush1.bf16.msra.mxu0 %v5248_v18 }
 0x4ba   :  { %v5099_v7 = vpack.c.bf16 %v2757_v14, %v2756_v23  ;;  %3229 = vmatprep.subr.bf16.mxu0 %v5253_v55 }
 0x4bb   :  { %3028 = vmatmul.mubr.f32.gmra.mrb[8].mxu0 %v2786_v37 }
 0x4bc   :  { %5100 = vmatpush3.bf16.msra.mxu1 %v5099_v7  ;;  %3032 = vmatprep.mubr.f32.mxu0 %v2795_v21 }
 0x4bd   :  { %3230 = vmatpush1.bf16.msra.mxu0 %v5251_v62  ;;  %3379 = vmatprep.subr.bf16.mxu1 %v5259_v19 }
 0x4be   :  { %3231 = vmatprep.subr.bf16.mxu0 %v5256_v53 }
 0x4bf   :  { %3033 = vmatmul.mubr.f32.gmra.mrb[10].mxu0 %v2794_v60  ;;  %3103 = vmatmul.mubr.f32.vlgmr.msra.gmra.mrb[6].mxu1 %v2780_v44 }
 0x4c0   :  { %3107 = vmatprep.mubr.f32.mxu1 %v2789_v51  ;;  %3380 = vmatpush1.bf16.msra.mxu1 %v5257_v41 }
 0x4c1   :  { %3232 = vmatpush1.bf16.msra.mxu0 %v5254_v61  ;;  %3381 = vmatprep.subr.bf16.mxu1 %v5265_v26  ;;  %v5297_v61 = vld [vmem:[%s8709_s6] sm:$0xff]  }
 0x4c2   :  { %3233 = vmatprep.subr.bf16.mxu0 %v5262_v16  ;;  %3259 = vmatprep.mubr.bf16.mxu0 %v8880_v43  ;;  %v5298_v16 = vld [vmem:[%s8709_s6 + $0x48] sm:$0xff]  }
 0x4c3   :  { %3108 = vmatmul.mubr.f32.gmra.mrb[8].mxu1 %v2788_v36 }
 0x4c4   :  { %3112 = vmatprep.mubr.f32.mxu1 %v2797_v47  ;;  %3382 = vmatpush1.bf16.msra.mxu1 %v5263_v11 }
 0x4c5   :  { %3234 = vmatpush1.bf16.msra.mxu0 %v5260_v3  ;;  %3383 = vmatprep.subr.bf16.mxu1 %v5271_v50  ;;  %v5299_v3 = vld [vmem:[%s8709_s6 + $0x8] sm:$0xff]  }
 0x4c6   :  { %3235 = vmatprep.subr.bf16.mxu0 %v5268_v32  ;;  %v5306_v32 = vld [vmem:[%s8709_s6 + $0x68] sm:$0xff]  }
 0x4c7   :  { %3113 = vmatmul.mubr.f32.gmra.mrb[10].mxu1 %v2796_v40  ;;  %v5307_v50 = vld [vmem:[%s8709_s6 + $0x28] sm:$0xff]  }
 0x4c8   :  { %3411 = vmatprep.mubr.bf16.mxu1 %v8880_v43  ;;  %v5266_v43 = vld [vmem:[%s8707_s4 + $0x40] ss:$8 sps:$4 sm:$0xff]   ;;  %3384 = vmatpush1.bf16.msra.mxu1 %v5269_v45  ;;  %v5310_v45 = vld [vmem:[%s8709_s6 + $0x78] sm:$0xff]  }
 0x4c9   :  { %3236 = vmatpush1.bf16.msra.mxu0 %v5266_v43  ;;  %3385 = vmatprep.subr.bf16.mxu1 %v5277_v12  ;;  %v5309_v43 = vld [vmem:[%s8709_s6 + $0x30] sm:$0xff]   ;;  %v3135_v12 = vld [vmem:[%s8708_s5] ss:$2 sm:$0x3] }
 0x4ca   :  { %3237 = vmatprep.subr.bf16.mxu0 %v5274_v42 }
 0x4cc   :  { %3386 = vmatpush1.bf16.msra.mxu1 %v5275_v0  ;;  %v4490_v0 = vld [vmem:[%s8708_s5 + $0x1] ss:$2 sm:$0x3] }
 0x4cd   :  { %3238 = vmatpush1.bf16.msra.mxu0 %v5272_v52  ;;  %3387 = vmatprep.subr.bf16.mxu1 %v5283_v31  ;;  %v3140_v31 = vrot.slane %v3135_v12, %v9056_v30 }
 0x4ce   :  { %3239 = vmatprep.subr.bf16.mxu0 %v5280_v28  ;;  %v3144_v28 = vrot.slane %v3135_v12, %v9055_v59  ;;  %v5321_v12 = vld [vmem:[%s8712_s9 + $0x28] sm:$0xff]  }
 0x4d0   :  { %3388 = vmatpush1.bf16.msra.mxu1 %v5281_v10  ;;  %v3296_v10 = vrot.slane %v4490_v0, %v9055_v59 }
 0x4d1   :  { %3240 = vmatpush1.bf16.msra.mxu0 %v5278_v27  ;;  %3389 = vmatprep.subr.bf16.mxu1 %v5289_v39  ;;  %v3292_v27 = vrot.slane %v4490_v0, %v9056_v30  ;;  %v5326_v0 = vld [vmem:[%s8712_s9 + $0x70] sm:$0xff]  }
 0x4d2   :  { %3241 = vmatprep.subr.bf16.mxu0 %v5286_v48 }
 0x4d4   :  { %3390 = vmatpush1.bf16.msra.mxu1 %v5287_v13 }
 0x4d5   :  { %3242 = vmatpush1.bf16.msra.mxu0 %v5284_v35  ;;  %3391 = vmatprep.subr.bf16.mxu1 %v5292_v63 }
 0x4d6   :  { %4800 = vmatprep.subr.bf16.mxu0 %v5296_v2 }
 0x4d8   :  { %3392 = vmatpush1.bf16.msra.mxu1 %v5290_v15 }
 0x4d9   :  { %3393 = vmatprep.subr.bf16.mxu1 %v5295_v56 }
 0x4dc   :  { %3394 = vmatpush1.bf16.msra.mxu1 %v5293_v5 }
 0x4fd   :  { %v4671_v57 = vpop.f32.mrb[2].mxu0 }
 0x4fe   :  { %v4672_v4 = vpop.f32.mrb[3].mxu0 }
 0x4ff   :  { %v4673_v34 = vadd.f32 %v4672_v4, %v4671_v57  ;;  %v5300_v57 = vld [vmem:[%s8709_s6 + $0x50] sm:$0xff]  }
 0x501   :  { %v4674_v17 = vpop.f32.mrb[4].mxu0 }
 0x502   :  { %v4675_v49 = vpop.f32.mrb[5].mxu0 }
 0x503   :  { %v4712_v46 = vpop.f32.mrb[2].mxu1  ;;  %v4676_v1 = vadd.f32 %v4675_v49, %v4674_v17  ;;  %v5303_v49 = vld [vmem:[%s8709_s6 + $0x18] sm:$0xff]  }
 0x504   :  { %v4713_v29 = vpop.f32.mrb[3].mxu1 }
 0x505   :  { %v4714_v25 = vadd.f32 %v4713_v29, %v4712_v46  ;;  %v5302_v46 = vld [vmem:[%s8709_s6 + $0x58] sm:$0xff]   ;;  %v5304_v29 = vld [vmem:[%s8709_s6 + $0x60] sm:$0xff]  }
 0x507   :  { %v2950_v9 = vadd.f32 %v4714_v25, %v4673_v34  ;;  %v4715_v6 = vpop.f32.mrb[4].mxu1  ;;  %v5301_v34 = vld [vmem:[%s8709_s6 + $0x10] sm:$0xff]  }
 0x508   :  { %v4716_v20 = vpop.f32.mrb[5].mxu1  ;;  %v5308_v25 = vld [vmem:[%s8709_s6 + $0x70] sm:$0xff]  }
 0x509   :  { %v4717_v54 = vadd.f32 %v4716_v20, %v4715_v6  ;;  %v4525_v6 = vld [vmem:[%s8710_s7 + $0x1] ss:$0 sm:$0xff] }
 0x50a   :  { %v4526_v20 = vld [vmem:[%s8711_s8 + $0x1] ss:$0 sm:$0xff]  ;;  %3677 = vrot.lane.b32.xlu1 %v4525_v6, %s5462_s20 }
 0x50b   :  { %v2955_v24 = vadd.f32 %v4717_v54, %v4676_v1  ;;  %v5305_v1 = vld [vmem:[%s8709_s6 + $0x20] sm:$0xff]   ;;  %3689 = vrot.lane.b32.xlu0 %v4526_v20, %s5462_s20 }
 0x50c   :  { %v5319_v20 = vld [vmem:[%s8712_s9 + $0x20] sm:$0xff]  }
 0x58a   :  { %v4750_v38 = vpop.f32.mrb[6].mxu0 }
 0x58b   :  { %v4751_v33 = vpop.f32.mrb[7].mxu0 }
 0x58c   :  { %v4752_v18 = vadd.f32 %v4751_v33, %v4750_v38 }
 0x58e   :  { %v3025_v22 = vadd.f32 %v4752_v18, %v8129_v8  ;;  %v4753_v58 = vpop.f32.mrb[8].mxu0 }
 0x58f   :  { %v4754_v55 = vpop.f32.mrb[9].mxu0 }
 0x590   :  { %v4755_v14 = vadd.f32 %v4754_v55, %v4753_v58 }
 0x592   :  { %v3030_v23 = vadd.f32 %v4755_v14, %v2950_v9  ;;  %v4756_v37 = vpop.f32.mrb[10].mxu0  ;;  %v4791_v21 = vpop.f32.mrb[6].mxu1  ;;  %v5311_v9 = vld [vmem:[%s8709_s6 + $0x38] sm:$0xff]  }
 0x593   :  { %v4757_v62 = vpop.f32.mrb[11].mxu0  ;;  %v4792_v19 = vpop.f32.mrb[7].mxu1 }
 0x594   :  { %v4758_v7 = vadd.f32 %v4757_v62, %v4756_v37  ;;  %v4793_v53 = vadd.f32 %v4792_v19, %v4791_v21  ;;  %v3678_v19 = vpop.permute.xlu1 %3677 }
 0x596   :  { %v3035_v60 = vadd.f32 %v4758_v7, %v2955_v24  ;;  %v3105_v44 = vadd.f32 %v4793_v53, %v3025_v22  ;;  %v4794_v41 = vpop.f32.mrb[8].mxu1 }
 0x597   :  { %v4795_v51 = vpop.f32.mrb[9].mxu1 }
 0x598   :  { %v3118_v26 = vpack.c.bf16 %v3105_v44, %v3105_v44  ;;  %v4796_v8 = vadd.f32 %v4795_v51, %v4794_v41  ;;  %v3690_v44 = vpop.permute.xlu0 %3689 }
 0x59a   :  { %v3110_v36 = vadd.f32 %v4796_v8, %v3030_v23  ;;  %v4797_v11 = vpop.f32.mrb[10].mxu1  ;;  %3260 = vmatmul.mubr.bf16.vlgmr.msra.gmra.mrb[12].mxu0 %v3118_v26  ;;  %v5312_v26 = vld [vmem:[%s8712_s9] sm:$0xff]  }
 0x59b   :  { %v4798_v47 = vpop.f32.mrb[11].mxu1  ;;  %4801 = vmatpush3.bf16.msra.mxu0 %v5297_v61  ;;  %v5314_v8 = vld [vmem:[%s8712_s9 + $0x40] sm:$0xff]  }
 0x59c   :  { %v4799_v40 = vadd.f32 %v4798_v47, %v4797_v11  ;;  %4802 = vmatprep.subr.bf16.mxu0 %v5298_v16  ;;  %v5463_v47 = vmov 0.0  }
 0x59d   :  { %4873 = vmatprep.subr.bf16.mxu1 %v5463_v47 }
 0x59e   :  { %v3115_v4 = vadd.f32 %v4799_v40, %v3035_v60  ;;  %v5313_v40 = vld [vmem:[%s8712_s9 + $0x8] sm:$0xff]  }
 0x59f   :  { %4803 = vmatpush3.bf16.msra.mxu0 %v5299_v3 }
 0x5a0   :  { %v3268_v17 = vpack.c.bf16 %v3115_v4, %v3110_v36  ;;  %4804 = vmatprep.subr.bf16.mxu0 %v5300_v57  ;;  %v5316_v57 = vld [vmem:[%s8712_s9 + $0x48] sm:$0xff]  }
 0x5a2   :  { %3412 = vmatmul.mubr.bf16.vlgmr.msra.gmra.mrb[12].mxu1 %v3268_v17 }
 0x5a3   :  { %4805 = vmatpush3.bf16.msra.mxu0 %v5301_v34  ;;  %4874 = vmatpush3.bf16.msra.mxu1 %v5312_v26  ;;  %v5338_v26 = vld [vmem:[%s8712_s9 + $0xe0] sm:$0xff]  }
 0x5a4   :  { %4806 = vmatprep.subr.bf16.mxu0 %v5302_v46  ;;  %4875 = vmatprep.subr.bf16.mxu1 %v5463_v47 }
 0x5a5   :  { %4889 = vmatprep.mubr.msk.bf16.mxu1 %vm5464_vm0, %v5463_v47 }
 0x5a7   :  { %4807 = vmatpush3.bf16.msra.mxu0 %v5303_v49  ;;  %4876 = vmatpush3.bf16.msra.mxu1 %v5313_v40  ;;  %v5342_v40 = vld [vmem:[%s8712_s9 + $0xf0] sm:$0xff]  }
 0x5a8   :  { %4808 = vmatprep.subr.bf16.mxu0 %v5304_v29  ;;  %v5315_v29 = vld [vmem:[%s8712_s9 + $0x10] sm:$0xff]   ;;  %4877 = vmatprep.subr.bf16.mxu1 %v5463_v47 }
 0x5ab   :  { %4809 = vmatpush3.bf16.msra.mxu0 %v5305_v1  ;;  %v5318_v1 = vld [vmem:[%s8712_s9 + $0x50] sm:$0xff]   ;;  %4878 = vmatpush3.bf16.msra.mxu1 %v5315_v29 }
 0x5ac   :  { %4810 = vmatprep.subr.bf16.mxu0 %v5306_v32  ;;  %4879 = vmatprep.subr.bf16.mxu1 %v5463_v47 }
 0x5af   :  { %4811 = vmatpush3.bf16.msra.mxu0 %v5307_v50 }
 0x5b0   :  { %4812 = vmatprep.subr.bf16.mxu0 %v5308_v25 }
 0x5b3   :  { %4813 = vmatpush3.bf16.msra.mxu0 %v5309_v43 }
 0x5b4   :  { %4814 = vmatprep.subr.bf16.mxu0 %v5310_v45  ;;  %v5317_v45 = vld [vmem:[%s8712_s9 + $0x18] sm:$0xff]  }
 0x5b5   :  { %4880 = vmatpush3.bf16.msra.mxu1 %v5317_v45  ;;  %v5348_v45 = vld [vmem:[%s8712_s9 + $0x120] sm:$0xff]  }
 0x5b6   :  { %4881 = vmatprep.subr.bf16.mxu1 %v5463_v47 }
 0x5b7   :  { %4815 = vmatpush3.bf16.msra.mxu0 %v5311_v9  ;;  %v5320_v9 = vld [vmem:[%s8712_s9 + $0x58] sm:$0xff]  }
 0x5b8   :  { %4893 = vmatprep.subr.bf16.mxu0 %v5463_v47 }
 0x5b9   :  { %4882 = vmatpush3.bf16.msra.mxu1 %v5319_v20  ;;  %v5350_v20 = vld [vmem:[%s8712_s9 + $0x130] sm:$0xff]  }
 0x5ba   :  { %4883 = vmatprep.subr.bf16.mxu1 %v5463_v47 }
 0x5bd   :  { %4884 = vmatpush3.bf16.msra.mxu1 %v5321_v12  ;;  %v5351_v12 = vld [vmem:[%s8712_s9 + $0x138] sm:$0xff]  }
 0x5be   :  { %4885 = vmatprep.subr.bf16.mxu1 %v5463_v47 }
 0x66d   :  { %v3261_v42 = vpop.f32.mrb[12].mxu0 }
 0x66e   :  { %v3263_v54 = vpop.f32.mrb[13].mxu0  ;;  %v3262_v35 = vadd.f32 %v3261_v42, %v3140_v31  ;;  %v5322_v42 = vld [vmem:[%s8712_s9 + $0x60] sm:$0xff]   ;;  %v5327_v31 = vld [vmem:[%s8712_s9 + $0x78] sm:$0xff]  }
 0x66f   :  { %v3265_v52 = vpop.f32.mrb[14].mxu0  ;;  %v3264_v48 = vadd.f32 %v3263_v54, %v3144_v28  ;;  %v5324_v54 = vld [vmem:[%s8712_s9 + $0x68] sm:$0xff]   ;;  %v4523_v28 = vld [vmem:[%s8710_s7] ss:$0 sm:$0xff] }
 0x670   :  { %v3266_v24 = vpop.f32.mrb[15].mxu0  ;;  %v8400_v22 = vmax.f32 %v3262_v35, 0.0  ;;  %v5323_v52 = vld [vmem:[%s8712_s9 + $0x30] sm:$0xff]  }
 0x671   :  { %v8396_v38 = vmax.f32 %v3264_v48, 0.0  ;;  %4886 = vmatpush3.bf16.msra.mxu1 %v5323_v52  ;;  %v5325_v24 = vld [vmem:[%s8712_s9 + $0x38] sm:$0xff]  }
 0x672   :  { %4887 = vmatprep.subr.bf16.mxu1 %v5463_v47 }
 0x675   :  { %v3413_v39 = vpop.f32.mrb[12].mxu1  ;;  %4888 = vmatpush3.bf16.msra.mxu1 %v5325_v24 }
 0x676   :  { %v3414_v13 = vadd.f32 %v3413_v39, %v3292_v27  ;;  %v3415_v63 = vpop.f32.mrb[13].mxu1  ;;  %4913 = vmatprep.subr.bf16.mxu1 %v5463_v47 }
 0x677   :  { %v3416_v15 = vadd.f32 %v3415_v63, %v3296_v10  ;;  %v3417_v56 = vpop.f32.mrb[14].mxu1 }
 0x678   :  { %v8394_v5 = vmax.f32 %v3414_v13, 0.0  ;;  %v3419_v2 = vpop.f32.mrb[15].mxu1  ;;  %v3418_v55 = vadd.f32 %v3417_v56, %v3292_v27 }
 0x679   :  { %v8398_v33 = vmax.f32 %v3416_v15, 0.0  ;;  %v3420_v18 = vadd.f32 %v3419_v2, %v3296_v10  ;;  %v4524_v10 = vld [vmem:[%s8711_s8] ss:$0 sm:$0xff] }
 0x67a   :  { %v3479_v58 = vpack.c.bf16 %v8394_v5, %v8400_v22  ;;  %v8410_v23 = vmax.f32 %v3418_v55, 0.0 }
 0x67b   :  { %v8402_v30 = vmax.f32 %v3420_v18, 0.0  ;;  %v3480_v59 = vpack.c.bf16 %v8398_v33, %v8396_v38 }
 0x67c   :  { %v3481_v37 = vpack.c.bf16 %v8410_v23, %v8410_v23 }
 0x67d   :  { %3643 = vmatprep.mubr.bf16.mxu0 %v3480_v59  ;;  %v3482_v14 = vpack.c.bf16 %v8402_v30, %v8402_v30  ;;  %v5328_v59 = vld [vmem:[%s8712_s9 + $0x80] sm:$0xff]  }
 0x67e   :  { %3644 = vmatmul.mubr.bf16.vlgmr.msra.gmra.mrb[16].mxu0 %v3479_v58 }
 0x67f   :  { %3651 = vmatprep.mubr.bf16.mxu0 %v3482_v14  ;;  %4894 = vmatpush3.bf16.msra.mxu0 %v5314_v8  ;;  %v5339_v8 = vld [vmem:[%s8712_s9 + $0xb0] sm:$0xff]  }
 0x680   :  { %4895 = vmatprep.subr.bf16.mxu0 %v5463_v47 }
 0x683   :  { %4896 = vmatpush3.bf16.msra.mxu0 %v5316_v57 }
 0x684   :  { %4897 = vmatprep.subr.bf16.mxu0 %v5463_v47 }
 0x686   :  { %3652 = vmatmul.mubr.bf16.gmra.mrb[20].mxu0 %v3481_v37 }
 0x687   :  { %4898 = vmatpush3.bf16.msra.mxu0 %v5318_v1  ;;  %4909 = vmatprep.mubr.msk.bf16.mxu0 %vm5464_vm0, %v5463_v47  ;;  %v5345_v1 = vld [vmem:[%s8712_s9 + $0x108] sm:$0xff]  }
 0x688   :  { %4899 = vmatprep.subr.bf16.mxu0 %v5463_v47 }
 0x68b   :  { %4900 = vmatpush3.bf16.msra.mxu0 %v5320_v9  ;;  %v5349_v9 = vld [vmem:[%s8712_s9 + $0x128] sm:$0xff]  }
 0x68c   :  { %4901 = vmatprep.subr.bf16.mxu0 %v5463_v47 }
 0x68f   :  { %4902 = vmatpush3.bf16.msra.mxu0 %v5322_v42 }
 0x690   :  { %4903 = vmatprep.subr.bf16.mxu0 %v5463_v47 }
 0x693   :  { %4904 = vmatpush3.bf16.msra.mxu0 %v5324_v54 }
 0x694   :  { %4905 = vmatprep.subr.bf16.mxu0 %v5463_v47 }
 0x697   :  { %4906 = vmatpush3.bf16.msra.mxu0 %v5326_v0 }
 0x698   :  { %4907 = vmatprep.subr.bf16.mxu0 %v5463_v47 }
 0x69b   :  { %4908 = vmatpush3.bf16.msra.mxu0 %v5327_v31 }
 0x69c   :  { %4933 = vmatprep.subr.bf16.mxu0 %v5463_v47 }
 0x751   :  { %v4816_v21 = vpop.f32.mrb[16].mxu0 }
 0x752   :  { %v4817_v62 = vpop.f32.mrb[17].mxu0 }
 0x753   :  { %v8414_v7 = vadd.f32 %v4817_v62, %v4816_v21  ;;  %v4819_v53 = vpop.f32.mrb[18].mxu0  ;;  %v5329_v21 = vld [vmem:[%s8712_s9 + $0x88] sm:$0xff]   ;;  %v5330_v62 = vld [vmem:[%s8712_s9 + $0xc0] sm:$0xff]  }
 0x754   :  { %v4820_v60 = vpop.f32.mrb[19].mxu0 }
 0x755   :  { %v3680_v41 = vmul.f32 %v8414_v7, %v3678_v19  ;;  %v4821_v51 = vadd.f32 %v4820_v60, %v4819_v53  ;;  %v3664_v27 = vmul.f32 %v8414_v7, %v4523_v28  ;;  %v5331_v7 = vld [vmem:[%s8712_s9 + $0x90] sm:$0xff]   ;;  %v5332_v53 = vld [vmem:[%s8712_s9 + $0xc8] sm:$0xff]   ;;  %v5333_v60 = vld [vmem:[%s8712_s9 + $0x98] sm:$0xff]  }
 0x757   :  { %v3692_v61 = vadd.f32 %v3690_v44, %v3680_v41  ;;  %v3681_v4 = vmul.f32 %v4821_v51, %v3678_v19  ;;  %v3670_v48 = vadd.f32 %v4524_v10, %v3664_v27  ;;  %v5335_v41 = vld [vmem:[%s8712_s9 + $0xa0] sm:$0xff]   ;;  %v5336_v51 = vld [vmem:[%s8712_s9 + $0xd8] sm:$0xff]  }
 0x759   :  { %v3696_v16 = vrot.slane %v3692_v61, 4  ;;  %v3711_v36 = vpack.c.bf16 %v3692_v61, %v3692_v61  ;;  %v4822_v11 = vpop.f32.mrb[20].mxu0  ;;  %v8441_v32 = vadd.f32 %v3690_v44, %v3681_v4  ;;  %v3710_v18 = vpack.c.bf16 %v3670_v48, %v3670_v48  ;;  %v5337_v61 = vld [vmem:[%s8712_s9 + $0xa8] sm:$0xff]  }
 0x75a   :  { %v4823_v3 = vpop.f32.mrb[21].mxu0 }
 0x75b   :  { %v4824_v34 = vadd.f32 %v4823_v3, %v4822_v11  ;;  %v4825_v17 = vpop.f32.mrb[22].mxu0  ;;  %3844 = vrot.lane.b32.xlu0 %v3711_v36, %s5462_s20  ;;  %3697 = vrot.lane.b32.xlu1 %v3696_v16, %s5462_s20  ;;  %v3712_v56 = vpack.c.bf16 %v8441_v32, %v8441_v32  ;;  %v5340_v16 = vld [vmem:[%s8712_s9 + $0xe8] sm:$0xff]   ;;  %v5341_v3 = vld [vmem:[%s8712_s9 + $0xb8] sm:$0xff]  }
 0x75c   :  { %v4826_v46 = vpop.f32.mrb[23].mxu0  ;;  %v5343_v17 = vld [vmem:[%s8712_s9 + $0xf8] sm:$0xff]  }
 0x75d   :  { %v3682_v49 = vmul.f32 %v4824_v34, %v3678_v19  ;;  %v5344_v46 = vld [vmem:[%s8712_s9 + $0x100] sm:$0xff]  }
 0x75f   :  { %v3694_v50 = vadd.f32 %v3690_v44, %v3682_v49  ;;  %v5334_v44 = vld [vmem:[%s8712_s9 + $0xd0] sm:$0xff]  }
 0x761   :  { %v3706_v25 = vrot.slane %v3694_v50, 4  ;;  %v8446_v43 = vadd.f32 %v3694_v50, %v8441_v32  ;;  %v3713_v15 = vpack.c.bf16 %v3694_v50, %v3694_v50 }
 0x763   :  { %v8457_v6 = vadd.f32 %v3706_v25, %v8441_v32  ;;  %v3717_v11 = vpack.c.bf16 %v8446_v43, %v8446_v43  ;;  %v5346_v25 = vld [vmem:[%s8712_s9 + $0x110] sm:$0xff]   ;;  %v5347_v43 = vld [vmem:[%s8712_s9 + $0x118] sm:$0xff]  }
 0x765   :  { %v3716_v36 = vpack.c.bf16 %v8457_v6, %v8457_v6  ;;  %v4099_v34 = vrot.slane %v3717_v11, 6  ;;  %v3702_v6 = vrot.slane %v8441_v32, 4  ;;  %v4577_v11 = vld [vmem:[%s8713_s10 + $0x2] ss:$0 sm:$0xff] }
 0x767   :  { %v3976_v4 = vrot.slane %v3716_v36, 2  ;;  %v3704_v42 = vadd.f32 %v3702_v6, %v8441_v32  ;;  %v4552_v32 = vld [vmem:[%s8713_s10 + $0x1] ss:$0 sm:$0xff] }
 0x769   :  { %v3715_v52 = vpack.c.bf16 %v3704_v42, %v3704_v42 }
 0x7cd   :  { %v3698_v39 = vpop.permute.xlu1 %3697  ;;  %v3845_v2 = vpop.permute.xlu0 %3844 }
 0x7ce   :  { %v3700_v35 = vadd.f32 %v3698_v39, %v3670_v48 }
 0x7d0   :  { %v3714_v13 = vpack.c.bf16 %v3700_v35, %v3700_v35 }
 0x7d2   :  { %v3846_v63 = vrot.slane %v3714_v13, 6  ;;  %3719 = vrot.lane.b32.xlu0 %v3714_v13, %s5462_s20 }
 0x7d4   :  { %3847 = vrot.lane.b32.xlu1 %v3846_v63, %s5462_s20 }
 0x7d6   :  { %4223 = vrot.lane.b32.xlu0 %v3713_v15, %s5462_s20  ;;  %v3430_v15 = vmul.f32 %v8394_v5, %v8394_v5 }
 0x7d8   :  { %3973 = vrot.lane.b32.xlu1 %v3712_v56, %s5462_s20  ;;  %v3431_v56 = vmul.f32 %v8398_v33, %v8398_v33 }
 0x844   :  { %v3720_v58 = vpop.permute.xlu0 %3719 }
 0x845   :  { %v3724_v55 = vsel %vm3721_vm1, %v3710_v18, %v3720_v58 }
 0x846   :  { %4890 = vmatmul.mubr.bf16.vlgmr.msra.gmra.mrb[16].mxu1 %v3724_v55  ;;  %v3848_v14 = vpop.permute.xlu1 %3847 }
 0x847   :  { %4914 = vmatpush3.bf16.msra.mxu1 %v5328_v59  ;;  %v3851_v37 = vsel %vm3721_vm1, %v3845_v2, %v3848_v14  ;;  %4929 = vmatprep.mubr.msk.bf16.mxu1 %vm5464_vm0, %v5463_v47  ;;  %v3437_v59 = vadd.f32 %v3431_v56, %v3430_v15 }
 0x848   :  { %v3875_v19 = vrot.slane %v3851_v37, 2  ;;  %4915 = vmatprep.subr.bf16.mxu1 %v5463_v47  ;;  %v4224_v54 = vpop.permute.xlu0 %4223 }
 0x849   :  { %v4227_v0 = vsel %vm3721_vm1, %v4224_v54, %v3715_v52 }
 0x84a   :  { %4910 = vmatmul.mubr.bf16.vlgmr.msra.gmra.mrb[24].mxu0 %v3875_v19  ;;  %v3974_v57 = vpop.permute.xlu1 %3973 }
 0x84b   :  { %4916 = vmatpush3.bf16.msra.mxu1 %v5329_v21  ;;  %4934 = vmatpush3.bf16.msra.mxu0 %v5330_v62  ;;  %v3979_v49 = vsel %vm3721_vm1, %v3974_v57, %v3976_v4  ;;  %v4101_v29 = vsel %vm3721_vm1, %v3974_v57, %v4099_v34  ;;  %v4602_v62 = vld [vmem:[%s8713_s10 + $0x3] ss:$0 sm:$0xff] }
 0x84c   :  { %4917 = vmatprep.subr.bf16.mxu1 %v5463_v47  ;;  %4935 = vmatprep.subr.bf16.mxu0 %v5463_v47  ;;  %v4125_v50 = vrot.slane %v4101_v29, 2 }
 0x84d   :  { %4949 = vmatprep.mubr.msk.bf16.mxu0 %vm5464_vm0, %v5463_v47 }
 0x84f   :  { %4918 = vmatpush3.bf16.msra.mxu1 %v5331_v7  ;;  %4936 = vmatpush3.bf16.msra.mxu0 %v5332_v53 }
 0x850   :  { %4919 = vmatprep.subr.bf16.mxu1 %v5463_v47  ;;  %4937 = vmatprep.subr.bf16.mxu0 %v5463_v47 }
 0x853   :  { %4920 = vmatpush3.bf16.msra.mxu1 %v5333_v60  ;;  %4938 = vmatpush3.bf16.msra.mxu0 %v5334_v44 }
 0x854   :  { %4921 = vmatprep.subr.bf16.mxu1 %v5463_v47  ;;  %4939 = vmatprep.subr.bf16.mxu0 %v5463_v47 }
 0x857   :  { %4922 = vmatpush3.bf16.msra.mxu1 %v5335_v41  ;;  %4940 = vmatpush3.bf16.msra.mxu0 %v5336_v51 }
 0x858   :  { %4923 = vmatprep.subr.bf16.mxu1 %v5463_v47  ;;  %4941 = vmatprep.subr.bf16.mxu0 %v5463_v47 }
 0x85b   :  { %4924 = vmatpush3.bf16.msra.mxu1 %v5337_v61  ;;  %4942 = vmatpush3.bf16.msra.mxu0 %v5338_v26  ;;  %v3428_v61 = vmul.f32 %v8400_v22, %v8400_v22  ;;  %v3429_v26 = vmul.f32 %v8396_v38, %v8396_v38 }
 0x85c   :  { %4925 = vmatprep.subr.bf16.mxu1 %v5463_v47  ;;  %4943 = vmatprep.subr.bf16.mxu0 %v5463_v47 }
 0x85f   :  { %4926 = vmatpush3.bf16.msra.mxu1 %v5339_v8  ;;  %4944 = vmatpush3.bf16.msra.mxu0 %v5340_v16  ;;  %v3432_v8 = vmul.f32 %v8410_v23, %v8410_v23  ;;  %v3433_v16 = vmul.f32 %v8402_v30, %v8402_v30 }
 0x860   :  { %4927 = vmatprep.subr.bf16.mxu1 %v5463_v47  ;;  %4945 = vmatprep.subr.bf16.mxu0 %v5463_v47 }
 0x861   :  { %v3441_v57 = vsel %vm3440_vm3, %v3432_v8, 0.0  ;;  %v3442_v4 = vsel %vm3440_vm3, %v3433_v16, 0.0 }
 0x862   :  { %v3443_v34 = vadd.f32 %v3442_v4, %v3441_v57 }
 0x863   :  { %4928 = vmatpush3.bf16.msra.mxu1 %v5341_v3  ;;  %4946 = vmatpush3.bf16.msra.mxu0 %v5342_v40  ;;  %v3434_v3 = vadd.f32 %v3429_v26, %v3428_v61 }
 0x864   :  { %4947 = vmatprep.subr.bf16.mxu0 %v5463_v47  ;;  %4953 = vmatprep.subr.bf16.mxu1 %v5463_v47 }
 0x866   :  { %4930 = vmatmul.mubr.bf16.vlgmr.msra.gmra.mrb[20].mxu1 %v3979_v49  ;;  %v4627_v49 = vld [vmem:[%s8713_s10 + $0x4] ss:$0 sm:$0xff] }
 0x867   :  { %4948 = vmatpush3.bf16.msra.mxu0 %v5343_v17  ;;  %4954 = vmatpush3.bf16.msra.mxu1 %v5344_v46 }
 0x868   :  { %4955 = vmatprep.subr.bf16.mxu1 %v5463_v47  ;;  %4969 = vmatprep.mubr.msk.bf16.mxu1 %vm5464_vm0, %v5463_v47 }
 0x86a   :  { %4950 = vmatmul.mubr.bf16.vlgmr.msra.gmra.mrb[28].mxu0 %v4125_v50 }
 0x86b   :  { %4956 = vmatpush3.bf16.msra.mxu1 %v5345_v1 }
 0x86c   :  { %4957 = vmatprep.subr.bf16.mxu1 %v5463_v47 }
 0x86f   :  { %4958 = vmatpush3.bf16.msra.mxu1 %v5346_v25 }
 0x870   :  { %4959 = vmatprep.subr.bf16.mxu1 %v5463_v47 }
 0x873   :  { %4960 = vmatpush3.bf16.msra.mxu1 %v5347_v43 }
 0x874   :  { %4961 = vmatprep.subr.bf16.mxu1 %v5463_v47 }
 0x877   :  { %4962 = vmatpush3.bf16.msra.mxu1 %v5348_v45 }
 0x878   :  { %4963 = vmatprep.subr.bf16.mxu1 %v5463_v47 }
 0x87b   :  { %4964 = vmatpush3.bf16.msra.mxu1 %v5349_v9 }
 0x87c   :  { %4965 = vmatprep.subr.bf16.mxu1 %v5463_v47 }
 0x87f   :  { %4966 = vmatpush3.bf16.msra.mxu1 %v5350_v20 }
 0x880   :  { %4967 = vmatprep.subr.bf16.mxu1 %v5463_v47  ;;  %v4527_v47 = vld [vmem:[%s8713_s10] ss:$0 sm:$0xff]  ;;  %s5465_s10 = smov [#allocation2]  }
 0x881   :  { %s4368_s16 = sshll.u32 %s5465_s10, 4  ;;  %s4369_s16 = int_to_ptr.vmem [resolvable:$true] %s4368_s16 }
 0x882   :  { %p5416_p1 = scmp.lt.s32.totalorder %s4369_s16, %s4369_s16 }
 0x883   :  { %4968 = vmatpush3.bf16.msra.mxu1 %v5351_v12 }
 0x886   :  { %4970 = vmatmul.mubr.bf16.vlgmr.msra.gmra.mrb[24].mxu1 %v4227_v0 }
 0x919   :  { %v3829_v24 = vpop.f32.mrb[16].mxu1 }
 0x91a   :  { %v4891_v28 = vpop.f32.mrb[17].mxu1  ;;  %v8631_v2 = vadd.f32 %v4527_v47, %v3829_v24 }
 0x91b   :  { %v3832_v31 = vpop.f32.mrb[18].mxu1 }
 0x91c   :  { %v4892_v27 = vpop.f32.mrb[19].mxu1  ;;  %v3835_v58 = vmul.f32 %v8631_v2, %v8631_v2 }
 0x91d   :  { %v3959_v10 = vpop.f32.mrb[24].mxu0 }
 0x91e   :  { %v3960_v48 = vadd.f32 %v4552_v32, %v3959_v10  ;;  %v4911_v39 = vpop.f32.mrb[25].mxu0  ;;  %v3837_v55 = vsel %vm3836_vm2, %v3835_v58, 0.0 }
 0x91f   :  { %v3962_v35 = vpop.f32.mrb[26].mxu0 }
 0x920   :  { %v3965_v13 = vmul.f32 %v3960_v48, %v3960_v48  ;;  %v4912_v63 = vpop.f32.mrb[27].mxu0 }
 0x922   :  { %v3966_v18 = vsel %vm3836_vm2, %v3965_v13, 0.0 }
 0x923   :  { %3967 = vadd.xlane.f32.xlu1 %v3966_v18 }
 0x927   :  { %3438 = vadd.xlane.f32.xlu1 %v3437_v59 }
 0x92b   :  { %3838 = vadd.xlane.f32.xlu1 %v3837_v55 }
 0x939   :  { %v4085_v14 = vpop.f32.mrb[20].mxu1 }
 0x93a   :  { %v4931_v37 = vpop.f32.mrb[21].mxu1  ;;  %v8652_v40 = vadd.f32 %v4577_v11, %v4085_v14 }
 0x93b   :  { %v4088_v21 = vpop.f32.mrb[22].mxu1 }
 0x93c   :  { %v4932_v19 = vpop.f32.mrb[23].mxu1  ;;  %v4091_v17 = vmul.f32 %v8652_v40, %v8652_v40 }
 0x93d   :  { %v4209_v7 = vpop.f32.mrb[28].mxu0 }
 0x93e   :  { %v4210_v53 = vadd.f32 %v4602_v62, %v4209_v7  ;;  %v4951_v60 = vpop.f32.mrb[29].mxu0  ;;  %v4092_v46 = vsel %vm3836_vm2, %v4091_v17, 0.0 }
 0x93f   :  { %v4212_v44 = vpop.f32.mrb[30].mxu0 }
 0x940   :  { %v4215_v41 = vmul.f32 %v4210_v53, %v4210_v53  ;;  %v4952_v51 = vpop.f32.mrb[31].mxu0 }
 0x942   :  { %v4216_v36 = vsel %vm3836_vm2, %v4215_v41, 0.0 }
 0x943   :  { %4217 = vadd.xlane.f32.xlu0 %v4216_v36 }
 0x947   :  { %3435 = vadd.xlane.f32.xlu0 %v3434_v3 }
 0x94b   :  { %3444 = vadd.xlane.f32.xlu0 %v3443_v34 }
 0x94f   :  { %4093 = vadd.xlane.f32.xlu0 %v4092_v46 }
 0x959   :  { %v4333_v29 = vpop.f32.mrb[24].mxu1 }
 0x95a   :  { %v8660_v1 = vadd.f32 %v4627_v49, %v4333_v29  ;;  %v4971_v50 = vpop.f32.mrb[25].mxu1 }
 0x95b   :  { %v4336_v25 = vpop.f32.mrb[26].mxu1 }
 0x95c   :  { %v4339_v43 = vmul.f32 %v8660_v1, %v8660_v1  ;;  %v4972_v45 = vpop.f32.mrb[27].mxu1 }
 0x95e   :  { %v4340_v9 = vsel %vm3836_vm2, %v4339_v43, 0.0 }
 0x95f   :  { %4341 = vadd.xlane.f32.xlu1 %v4340_v9 }
 0x9b0   :  { %v3968_v6 = vpop.xlane.xlu1 %3967 }
 0x9b1   :  { %v3969_v20 = vadd.f32 1e-12, %v3968_v6 }
 0x9b3   :  { %5352 = vrsqrt.f32 %v3969_v20 }
 0x9b4   :  { %v3439_v42 = vpop.xlane.xlu1 %3438 }
 0x9b5   :  { %v3447_v12 = vadd.f32 1e-12, %v3439_v42 }
 0x9b7   :  { %5354 = vrsqrt.f32 %v3447_v12 }
 0x9b8   :  { %v3839_v14 = vpop.xlane.xlu1 %3838 }
 0x9bd   :  { %v5353_v54 = vpop.eup %5352 }
 0x9be   :  { %v3971_v52 = vmul.f32 %v5353_v54, %v3960_v48 }
 0x9c0   :  { %4347 = vrot.lane.b32.xlu0 %v3971_v52, %s5462_s20 }
 0x9c1   :  { %v5355_v0 = vpop.eup %5354 }
 0x9c2   :  { %v3454_v24 = vmul.f32 %v5355_v0, %v8394_v5  ;;  %v3455_v28 = vmul.f32 %v5355_v0, %v8398_v33 }
 0x9c4   :  { %v3468_v31 = vcombine.low %v3454_v24, %v3455_v28  ;;  %v3471_v32 = vcombine.high %v3454_v24, %v3455_v28 }
 0x9c6   :  { %3470 = vst [vmem:[#allocation2 + $0x10] sm:$0xff] %v3468_v31  ;;  %3473 = vst [vmem:[#allocation2 + $0x18] sm:$0xff] %v3471_v32 }
 0x9d0   :  { %v4218_v27 = vpop.xlane.xlu0 %4217 }
 0x9d1   :  { %v4219_v10 = vadd.f32 1e-12, %v4218_v27 }
 0x9d3   :  { %5356 = vrsqrt.f32 %v4219_v10 }
 0x9d4   :  { %v3436_v39 = vpop.xlane.xlu0 %3435 }
 0x9d5   :  { %v3446_v47 = vadd.f32 1e-12, %v3436_v39 }
 0x9d7   :  { %5358 = vrsqrt.f32 %v3446_v47 }
 0x9d8   :  { %v3445_v35 = vpop.xlane.xlu0 %3444 }
 0x9d9   :  { %v3448_v13 = vadd.f32 1e-12, %v3445_v35 }
 0x9db   :  { %5360 = vrsqrt.f32 %v3448_v13 }
 0x9dd   :  { %v5357_v48 = vpop.eup %5356 }
 0x9de   :  { %v4221_v63 = vmul.f32 %v5357_v48, %v4210_v53 }
 0x9e0   :  { %4351 = vrot.lane.b32.xlu1 %v4221_v63, %s5462_s20  ;;  %s5411_s20 = scalar_lea.vmem %s4369_s16, 640 }
 0x9e1   :  { %v5359_v5 = vpop.eup %5358  ;;  %p5412_p0 = scmp.ne.s32.totalorder %s4369_s16, %s5411_s20  ;;  %p5417_p2 = scmp.lt.s32.totalorder %s5411_s20, %s5411_s20 }
 0x9e2   :  { %v3452_v33 = vmul.f32 %v5359_v5, %v8400_v22  ;;  %v3453_v15 = vmul.f32 %v5359_v5, %v8396_v38 }
 0x9e3   :  { %p5418_p3 = por %p5417_p2, %p5416_p1 }
 0x9e4   :  { %v3460_v56 = vcombine.low %v3452_v33, %v3453_v15  ;;  %v3463_v18 = vcombine.high %v3452_v33, %v3453_v15 }
 0x9e5   :  { %v5361_v59 = vpop.eup %5360  ;;  %p5419_p4 = pnand %p5418_p3, %p5412_p0 }
 0x9e6   :  { %v3456_v58 = vmul.f32 %v5361_v59, %v8410_v23  ;;  %v3457_v55 = vmul.f32 %v5361_v59, %v8402_v30  ;;  %3462 = vst [vmem:[#allocation2] sm:$0xff] %v3460_v56  ;;  %3465 = vst [vmem:[#allocation2 + $0x8] sm:$0xff] %v3463_v18 }
 0x9e8   :  { %v3476_v37 = vcombine.low %v3456_v58, %v3457_v55 }
 0x9ea   :  { %3478 = vst [vmem:[#allocation2 + $0x20] sm:$0xff] %v3476_v37 }
 0x9eb   :  { %5422 = shalt.err (!%p5419_p4)
}
 0x9ec   :  { %s5423_s18 = scalar_lea.hbm %s8714_s11, 640 }
 0x9ed   :  { %p5424_p5 = scmp.ne.s32.totalorder %s8714_s11, %s5423_s18  ;;  %p5427_p6 = scmp.lt.u32.totalorder %s5423_s18, %s8714_s11 }
 0x9ef   :  { %p5429_p7 = pnand %p5427_p6, %p5424_p5 }
 0x9f1   :  { %5432 = shalt.err (!%p5429_p7)
}
 0x9f2   :  { %4371 = dma.vmem_to_hbm [thread:$0]  %s4369_s16, 640, %s8714_s11, [#allocation3]   ;;  %v4342_v38 = vpop.xlane.xlu1 %4341  ;;  %v4094_v21 = vpop.xlane.xlu0 %4093  ;;  %v3840_v62 = vadd.f32 1e-12, %v3839_v14 }
 0x9f3   :  { %v4343_v22 = vadd.f32 1e-12, %v4342_v38  ;;  %v4095_v19 = vadd.f32 1e-12, %v4094_v21  ;;  %s5466_s11 = smov [#allocation4]  }
 0x9f4   :  { %s4378_s24 = sshll.u32 %s5466_s11, 4  ;;  %s4379_s24 = int_to_ptr.vmem [resolvable:$true] %s4378_s24 }
 0x9f5   :  { %5362 = vrsqrt.f32 %v4343_v22  ;;  %s5433_s2 = scalar_lea.vmem %s4379_s24, 192  ;;  %p5438_p9 = scmp.lt.s32.totalorder %s4379_s24, %s4379_s24 }
 0x9f6   :  { %5364 = vrsqrt.f32 %v3840_v62  ;;  %p5434_p8 = scmp.ne.s32.totalorder %s4379_s24, %s5433_s2  ;;  %p5439_p10 = scmp.lt.s32.totalorder %s5433_s2, %s5433_s2 }
 0x9f7   :  { %5366 = vrsqrt.f32 %v4095_v19 }
 0x9f8   :  { %p5440_p11 = por %p5439_p10, %p5438_p9 }
 0x9fa   :  { %p5441_p12 = pnand %p5440_p11, %p5434_p8 }
 0x9ff   :  { %v5363_v30 = vpop.eup %5362 }
 0xa00   :  { %v4345_v23 = vmul.f32 %v5363_v30, %v8660_v1  ;;  %v5365_v7 = vpop.eup %5364 }
 0xa01   :  { %v5367_v53 = vpop.eup %5366  ;;  %v3842_v44 = vmul.f32 %v5365_v7, %v8631_v2 }
 0xa02   :  { %4361 = vst.msk [vmem:[#allocation4 + $0x8] sm:$0xf] %vm3836_vm2, %v4345_v23  ;;  %v4097_v41 = vmul.f32 %v5367_v53, %v8652_v40 }
 0xa32   :  { %v4348_v60 = vpop.permute.xlu0 %4347 }
 0xa33   :  { %v4354_v61 = vsel %vm3721_vm1, %v3842_v44, %v4348_v60 }
 0xa52   :  { %v4352_v51 = vpop.permute.xlu1 %4351 }
 0xa53   :  { %v4355_v26 = vsel %vm3721_vm1, %v4097_v41, %v4352_v51 }
 0xa54   :  { %v4358_v8 = vcombine.low %v4354_v61, %v4355_v26 }
 0xa56   :  { %4360 = vst [vmem:[#allocation4] sm:$0xff] %v4358_v8 }
 0xa57   :  { %5444 = shalt.err (!%p5441_p12)
}
 0xa58   :  { %s5445_s26 = scalar_lea.hbm %s8715_s12, 192 }
 0xa59   :  { %p5446_p13 = scmp.ne.s32.totalorder %s8715_s12, %s5445_s26  ;;  %p5449_p0 = scmp.lt.u32.totalorder %s5445_s26, %s8715_s12 }
 0xa5b   :  { %p5451_p1 = pnand %p5449_p0, %p5446_p13 }
 0xa5d   :  { %5454 = shalt.err (!%p5451_p1)
}
 0xa5e   :  { %4381 = dma.vmem_to_hbm [thread:$0]  %s4379_s24, 192, %s8715_s12, [#allocation5]  }
 0xa5f   :  { %5455 = dma.done.wait [#allocation3], 640  }
 0xa60   :  { %5456 = vsyncadd [#allocation3], 4294966656 }
 0xa61   :  { %5457 = dma.done.wait [#allocation5], 192  }
 0xa62   :  { %5458 = vsyncadd [#allocation5], 4294967104 }
 0xa63   :  { %4388 = vsyncpa [#allocation3], 1 }
 0xa64   :  { %4389 = vsyncpa [#allocation5], 1 }

</bundles_post_ra>
